<compile_context>
chip_gen: v5e
topology: v5e:2x2
jax: 0.10.0
libtpu: 0.0.40
codegen_flags: <defaults>
</compile_context>

<pallas_src>
import functools
import numpy as np
import jax
import jax.numpy as jnp
from jax.experimental import pallas as pl
from jax.experimental.pallas import tpu as pltpu


# ------------------------------ small helpers --------------------------------

def _vmem_limit_bytes():
    """Generation-aware scoped-VMEM cap (<=32 MiB on v7x, <=64 MiB elsewhere)."""
    cap = 128 * 1024 * 1024
    try:
        cap = int(getattr(pltpu.get_tpu_info(), "vmem_capacity_bytes", cap))
    except Exception:
        pass
    return int(min(64 * 1024 * 1024, max(16 * 1024 * 1024, cap // 2)))


def _largest_divisor_leq(n, cap):
    cap = max(1, min(n, int(cap)))
    for d in range(cap, 0, -1):
        if n % d == 0:
            return d
    return 1


# ----------------------------- fused Pallas kernel ----------------------------

def _fused_attn_kernel(x_ref, wqkv_ref, wproj_ref, bproj_ref, bias_ref, o_ref,
                       *, num_heads, head_dim, ws, shuffle):
    H, D = num_heads, head_dim
    C = H * D
    T = ws * ws

    wqkv = wqkv_ref[...]            # (C, 3C)   bf16, scale folded, per-head cols
    wproj = wproj_ref[...]          # (C, C)    bf16
    bproj = bproj_ref[...]          # (1, C)    f32
    bias = bias_ref[...]            # (H, T, T) f32

    def attend(xw):
        """xw: (nw, T, C) window tokens -> (nw, T, C) f32 projected output."""
        nw = xw.shape[0]
        x2 = xw.reshape(nw * T, C).astype(jnp.bfloat16)
        qkv = jnp.dot(x2, wqkv, preferred_element_type=jnp.float32)
        qkv = qkv.reshape(nw, T, 3 * C)                       # f32
        heads = []
        for h in range(H):                      # static unroll: H tiny GEMMs
            blk = qkv[:, :, h * 3 * D:(h + 1) * 3 * D]        # [q_h | k_h | v_h]
            q = blk[..., :D].astype(jnp.bfloat16)             # scale pre-folded
            k = blk[..., D:2 * D].astype(jnp.bfloat16)
            v = blk[..., 2 * D:].astype(jnp.bfloat16)
            s = jnp.einsum('wqd,wkd->wqk', q, k,
                           preferred_element_type=jnp.float32)
            s = s + bias[h][None]
            s = s - jnp.max(s, axis=-1, keepdims=True)        # stable softmax
            p = jnp.exp(s)
            inv = pl.reciprocal(jnp.sum(p, axis=-1, keepdims=True), approx=True)
            p = (p * inv).astype(jnp.bfloat16)
            heads.append(jnp.einsum('wqk,wkd->wqd', p, v,
                                    preferred_element_type=jnp.float32))
        a = jnp.concatenate(heads, axis=-1)                   # (nw, T, C) f32
        a2 = a.reshape(nw * T, C).astype(jnp.bfloat16)
        out = jnp.dot(a2, wproj, preferred_element_type=jnp.float32) + bproj
        return out.reshape(nw, T, C)

    if not shuffle:
        # x_ref: (b_blk, hh_blk, ws, 1, ws, C); windows are the (b, hh) dims,
        # tokens are (ws1, ws2) -> a plain reshape gives (nw, T, C).
        b_blk, hh_blk = x_ref.shape[0], x_ref.shape[1]
        nw = b_blk * hh_blk
        out = attend(x_ref[...].reshape(nw, T, C))
        o_ref[...] = out.reshape(o_ref.shape).astype(o_ref.dtype)
    else:
        # x_ref: (b_blk, ws, 1, ws, ww, C); the ww windows are interleaved
        # with the token dims, so process them with a static unrolled loop
        # (avoids an in-VMEM 5-D transpose).
        b_blk, ww = x_ref.shape[0], x_ref.shape[4]
        x_all = x_ref[...]
        outs = []
        for wi in range(ww):
            xw = x_all[:, :, 0, :, wi, :].reshape(b_blk, T, C)
            outs.append(attend(xw).reshape(b_blk, ws, ws, C))
        out = jnp.stack(outs, axis=3)                 # (b_blk, ws, ws, ww, C)
        o_ref[...] = out.reshape(o_ref.shape).astype(o_ref.dtype)


def fused_window_attention(x_win, w_qkv, w_proj, b_proj, bias, *, shuffle, ws,
                           num_heads, head_dim, out_dtype, b_blk, hh_blk):
    """x_win: 6-D windowed view of the NHWC activation; returns same shape."""
    C = num_heads * head_dim
    kern = functools.partial(_fused_attn_kernel, num_heads=num_heads,
                             head_dim=head_dim, ws=ws, shuffle=shuffle)
    if not shuffle:
        b, hh = x_win.shape[0], x_win.shape[1]
        ww = x_win.shape[3]
        grid = (b // b_blk, hh // hh_blk, ww)
        blk = (b_blk, hh_blk, ws, 1, ws, C)
        xmap = lambda i, j, k: (i, j, 0, k, 0, 0)
        w2map = lambda i, j, k: (0, 0)
        w3map = lambda i, j, k: (0, 0, 0)
        sem = ("parallel", "parallel", "parallel")
    else:
        b, hh = x_win.shape[0], x_win.shape[2]
        ww = x_win.shape[4]
        grid = (b // b_blk, hh)
        blk = (b_blk, ws, 1, ws, ww, C)
        xmap = lambda i, j: (i, 0, j, 0, 0, 0)
        w2map = lambda i, j: (0, 0)
        w3map = lambda i, j: (0, 0, 0)
        sem = ("parallel", "parallel")

    return pl.pallas_call(
        kern,
        out_shape=jax.ShapeDtypeStruct(x_win.shape, out_dtype),
        grid=grid,
        in_specs=[pl.BlockSpec(blk, xmap),
                  pl.BlockSpec(w_qkv.shape, w2map),   # VMEM-resident weights
                  pl.BlockSpec(w_proj.shape, w2map),
                  pl.BlockSpec(b_proj.shape, w2map),
                  pl.BlockSpec(bias.shape, w3map)],
        out_specs=pl.BlockSpec(blk, xmap),
        compiler_params=pltpu.CompilerParams(
            dimension_semantics=sem,
            vmem_limit_bytes=_vmem_limit_bytes()),
    )(x_win, w_qkv, w_proj, b_proj, bias)


# --------------------------------- module port --------------------------------

class AttentionPallas:
    def __init__(self, dim, num_heads, window_size=1, shuffle=False,
                 qk_scale=None, relative_pos_embedding=False, key=None):
        assert dim % num_heads == 0
        self.dim = dim
        self.num_heads = num_heads
        self.ws = window_size
        self.shuffle = shuffle
        self.head_dim = dim // num_heads
        self.scale = qk_scale or self.head_dim ** (-0.5)
        self.relative_pos_embedding = relative_pos_embedding

        k1, k2, k3, k4 = jax.random.split(key, 4)
        C, H, D = dim, num_heads, self.head_dim
        T = window_size * window_size

        # ---- logical (f32) parameters, PyTorch layout ------------------------
        # Conv2d(dim, 3*dim, 1, bias=False): weight (3C, C); stored transposed
        # for channel-last matmul, original output-channel order (qkv, h, d).
        w_qkv = jax.random.normal(k1, (3 * C, C), jnp.float32) * 0.1
        self.w_qkv_ref = w_qkv.T                                    # (C, 3C)
        w_proj = jax.random.normal(k2, (C, C), jnp.float32) * 0.1
        self.w_proj_ref = w_proj.T                                  # (C, C)
        self.b_proj_ref = (jax.random.normal(k3, (C,), jnp.float32) * 0.1
                           ).reshape(1, C)

        # ---- relative position bias (H, T, T) --------------------------------
        if relative_pos_embedding:
            # TODO(synk): trunc_normal_ init approximated by plain normal*0.02.
            table = jax.random.normal(
                k4, ((2 * window_size - 1) ** 2, H), jnp.float32) * 0.02
            coords = np.stack(np.meshgrid(np.arange(window_size),
                                          np.arange(window_size),
                                          indexing='ij'))
            coords_flat = coords.reshape(2, -1)
            rel = coords_flat[:, :, None] - coords_flat[:, None, :]
            rel = rel.transpose(1, 2, 0).astype(np.int64)
            rel[:, :, 0] += window_size - 1
            rel[:, :, 1] += window_size - 1
            rel[:, :, 0] *= 2 * window_size - 1
            rel_idx = rel.sum(-1)                                   # (T, T)
            bias = table[jnp.asarray(rel_idx.reshape(-1))]
            self.attn_bias = jnp.transpose(bias.reshape(T, T, H), (2, 0, 1))
        else:
            self.attn_bias = jnp.zeros((H, T, T), jnp.float32)

        # ---- kernel-packed parameters (bf16 for the MXU) ----------------------
        # Fold the qk scale into the q columns (free constant fold) and permute
        # the output columns into per-head [q_h | k_h | v_h] blocks so the
        # kernel takes one contiguous lane slice per head.
        w_scaled = self.w_qkv_ref.at[:, :C].multiply(self.scale)
        perm = np.concatenate(
            [np.concatenate([np.arange(h * D, (h + 1) * D),
                             C + np.arange(h * D, (h + 1) * D),
                             2 * C + np.arange(h * D, (h + 1) * D)])
             for h in range(H)])
        self.w_qkv_k = w_scaled[:, jnp.asarray(perm)].astype(jnp.bfloat16)
        self.w_proj_k = self.w_proj_ref.astype(jnp.bfloat16)
        self.b_proj_k = self.b_proj_ref                             # f32

    # ------------------------------ Pallas forward -----------------------------
    def __call__(self, x):
        b, c, hsp, wsp = x.shape
        ws, H, D = self.ws, self.num_heads, self.head_dim
        assert c == self.dim and hsp % ws == 0 and wsp % ws == 0
        hh, ww = hsp // ws, wsp // ws
        T = ws * ws

        # NCHW -> NHWC (single XLA transpose pass in / out of the module).
        x_nhwc = jnp.transpose(x, (0, 2, 3, 1))

        # Free reshape exposing the window structure; the per-window gather
        # itself is done by the kernel's BlockSpec index_map (no 6-D transpose).
        if self.shuffle:
            x_win = x_nhwc.reshape(b, ws, hh, ws, ww, c)    # hsp = (ws1 hh)
        else:
            x_win = x_nhwc.reshape(b, hh, ws, ww, ws, c)    # hsp = (hh ws1)

        # Window batch per grid step, sized from a ~2 MiB token budget.
        budget = 2 * 1024 * 1024
        win_target = max(8, budget // max(1, T * c * 4))
        if self.shuffle:
            b_blk = _largest_divisor_leq(b, max(1, win_target // max(1, ww)))
            hh_blk = 1
        else:
            hh_blk = _largest_divisor_leq(hh, win_target)
            b_blk = _largest_divisor_leq(b, max(1, win_target // hh_blk))

        o_win = fused_window_attention(
            x_win, self.w_qkv_k, self.w_proj_k, self.b_proj_k, self.attn_bias,
            shuffle=self.shuffle, ws=ws, num_heads=H, head_dim=D,
            out_dtype=x.dtype, b_blk=b_blk, hh_blk=hh_blk)

        # attn_drop / proj_drop are p=0.0 (identity at inference) -> skipped.
        o_nhwc = o_win.reshape(b, hsp, wsp, c)
        return jnp.transpose(o_nhwc, (0, 3, 1, 2))

    # --------------------------- pure-JAX f32 reference ------------------------
    def reference(self, x):
        b, c, hsp, wsp = x.shape
        ws, H, D = self.ws, self.num_heads, self.head_dim
        hh, ww = hsp // ws, wsp // ws
        T = ws * ws
        x_t = jnp.transpose(x, (0, 2, 3, 1)).reshape(-1, c)
        qkv = x_t @ self.w_qkv_ref                                  # (N, 3C)
        if self.shuffle:
            qkv = qkv.reshape(b, ws, hh, ws, ww, 3 * c)
            qkv = jnp.transpose(qkv, (0, 2, 4, 1, 3, 5))
        else:
            qkv = qkv.reshape(b, hh, ws, ww, ws, 3 * c)
            qkv = jnp.transpose(qkv, (0, 1, 3, 2, 4, 5))
        qkv = qkv.reshape(b * hh * ww, T, 3 * c)
        q = qkv[..., :c].reshape(-1, T, H, D)
        k = qkv[..., c:2 * c].reshape(-1, T, H, D)
        v = qkv[..., 2 * c:].reshape(-1, T, H, D)
        s = jnp.einsum('wqhd,wkhd->whqk', q, k) * self.scale
        s = s + self.attn_bias[None]
        p = jax.nn.softmax(s, axis=-1)
        o = jnp.einsum('whqk,wkhd->wqhd', p, v).reshape(-1, T, c)
        o = o.reshape(b, hh, ww, ws, ws, c)
        if self.shuffle:
            o = jnp.transpose(o, (0, 3, 1, 4, 2, 5))
        else:
            o = jnp.transpose(o, (0, 1, 3, 2, 4, 5))
        o = o.reshape(-1, c) @ self.w_proj_ref + self.b_proj_ref
        return jnp.transpose(o.reshape(b, hsp, wsp, c), (0, 3, 1, 2))


# ------------------------------------ main -------------------------------------

if __name__ == "__main__":
    key = jax.random.PRNGKey(0)
    k_p1, k_p2, k_x = jax.random.split(key, 3)

    dim, num_heads, window_size = 32, 4, 4
    b, h, w = 2, 16, 16

    x = jax.random.normal(k_x, (b, dim, h, w), jnp.float32)

    for shuffle, k_p in ((False, k_p1), (True, k_p2)):
        mod = AttentionPallas(dim, num_heads, window_size=window_size,
                              shuffle=shuffle, relative_pos_embedding=True,
                              key=k_p)
        out = jax.block_until_ready(mod(x))
        ref = jax.block_until_ready(mod.reference(x))
        # Tolerance accounts for bf16 MXU operands (qkv / qk / pv / proj) and
        # the approximate EUP reciprocal vs. the f32 reference path.
        np.testing.assert_allclose(np.asarray(out), np.asarray(ref),
                                   rtol=3e-2, atol=3e-2)
        assert out.shape == (b, dim, h, w)

    print("KERNEL_OK")
</pallas_src>

<mosaic_0001>
module attributes {stable_mosaic.version = 11 : i64} {
  func.func @_fused_attn_kernel(%arg0: i32, %arg1: i32, %arg2: i32, %arg3: memref<2x4x4x1x4x32xf32, #tpu.memory_space<vmem>>, %arg4: memref<32x96xbf16, #tpu.memory_space<vmem>>, %arg5: memref<32x32xbf16, #tpu.memory_space<vmem>>, %arg6: memref<1x32xf32, #tpu.memory_space<vmem>>, %arg7: memref<4x16x16xf32, #tpu.memory_space<vmem>>, %arg8: memref<2x4x4x1x4x32xf32, #tpu.memory_space<vmem>>) attributes {dimension_semantics = [#tpu.dimension_semantics<parallel>, #tpu.dimension_semantics<parallel>, #tpu.dimension_semantics<parallel>], iteration_bounds = array<i64: 1, 1, 4>, scalar_prefetch = 0 : i64, scratch_operands = 0 : i64, tpu.core_type = #tpu.core_type<tc>, window_params = [{transform_indices = @transform_0, window_bounds = array<i64: 2, 4, 4, 1, 4, 32>}, {pipeline_mode = #tpu.pipeline_mode<synchronous>, transform_indices = @transform_1, window_bounds = array<i64: 32, 96>}, {pipeline_mode = #tpu.pipeline_mode<synchronous>, transform_indices = @transform_2, window_bounds = array<i64: 32, 32>}, {pipeline_mode = #tpu.pipeline_mode<synchronous>, transform_indices = @transform_3, window_bounds = array<i64: 1, 32>}, {pipeline_mode = #tpu.pipeline_mode<synchronous>, transform_indices = @transform_4, window_bounds = array<i64: 4, 16, 16>}, {transform_indices = @transform_5, window_bounds = array<i64: 2, 4, 4, 1, 4, 32>}]} {
    %c0 = arith.constant 0 : index
    %c0_0 = arith.constant 0 : index
    %0 = vector.load %arg4[%c0, %c0_0] : memref<32x96xbf16, #tpu.memory_space<vmem>>, vector<32x96xbf16>
    %c0_1 = arith.constant 0 : index
    %c0_2 = arith.constant 0 : index
    %1 = vector.load %arg5[%c0_1, %c0_2] : memref<32x32xbf16, #tpu.memory_space<vmem>>, vector<32x32xbf16>
    %c0_3 = arith.constant 0 : index
    %c0_4 = arith.constant 0 : index
    %2 = vector.load %arg6[%c0_3, %c0_4] : memref<1x32xf32, #tpu.memory_space<vmem>>, vector<1x32xf32>
    %c0_5 = arith.constant 0 : index
    %c0_6 = arith.constant 0 : index
    %c0_7 = arith.constant 0 : index
    %3 = vector.load %arg7[%c0_5, %c0_6, %c0_7] : memref<4x16x16xf32, #tpu.memory_space<vmem>>, vector<4x16x16xf32>
    %c0_8 = arith.constant 0 : index
    %c0_9 = arith.constant 0 : index
    %c0_10 = arith.constant 0 : index
    %c0_11 = arith.constant 0 : index
    %c0_12 = arith.constant 0 : index
    %c0_13 = arith.constant 0 : index
    %4 = vector.load %arg3[%c0_8, %c0_9, %c0_10, %c0_11, %c0_12, %c0_13] : memref<2x4x4x1x4x32xf32, #tpu.memory_space<vmem>>, vector<2x4x4x1x4x32xf32>
    %5 = vector.shape_cast %4 : vector<2x4x4x1x4x32xf32> to vector<8x16x32xf32>
    %6 = vector.shape_cast %5 : vector<8x16x32xf32> to vector<128x32xf32>
    %7 = arith.truncf %6 : vector<128x32xf32> to vector<128x32xbf16>
    %cst = arith.constant dense<0.000000e+00> : vector<128x96xf32>
    %8 = tpu.matmul %7, %0, %cst {dimension_numbers = #tpu.dot_dimension_numbers<[1], [0], [0], [1], [0, 0, 1, 1], [], []>} : vector<128x32xbf16>, vector<32x96xbf16>, vector<128x96xf32> -> vector<128x96xf32>
    %9 = vector.shape_cast %8 : vector<128x96xf32> to vector<8x16x96xf32>
    %10 = vector.extract_strided_slice %9 {offsets = [0, 0, 0], sizes = [8, 16, 24], strides = [1, 1, 1]} : vector<8x16x96xf32> to vector<8x16x24xf32>
    %11 = vector.extract_strided_slice %10 {offsets = [0, 0, 0], sizes = [8, 16, 8], strides = [1, 1, 1]} : vector<8x16x24xf32> to vector<8x16x8xf32>
    %12 = arith.truncf %11 : vector<8x16x8xf32> to vector<8x16x8xbf16>
    %13 = vector.extract_strided_slice %10 {offsets = [0, 0, 8], sizes = [8, 16, 8], strides = [1, 1, 1]} : vector<8x16x24xf32> to vector<8x16x8xf32>
    %14 = arith.truncf %13 : vector<8x16x8xf32> to vector<8x16x8xbf16>
    %15 = vector.extract_strided_slice %10 {offsets = [0, 0, 16], sizes = [8, 16, 8], strides = [1, 1, 1]} : vector<8x16x24xf32> to vector<8x16x8xf32>
    %16 = arith.truncf %15 : vector<8x16x8xf32> to vector<8x16x8xbf16>
    "tpu.trace_start"() <{level = 10 : i32, message = "wqd,wkd->wqk"}> : () -> ()
    %cst_14 = arith.constant dense<0.000000e+00> : vector<8x16x16xf32>
    %17 = tpu.matmul %12, %14, %cst_14 {dimension_numbers = #tpu.dot_dimension_numbers<[2], [2], [1], [1], [0, 0, 0, 1, 1, 1], [0], [0]>} : vector<8x16x8xbf16>, vector<8x16x8xbf16>, vector<8x16x16xf32> -> vector<8x16x16xf32>
    "tpu.trace_stop"() : () -> ()
    %18 = vector.extract_strided_slice %3 {offsets = [0, 0, 0], sizes = [1, 16, 16], strides = [1, 1, 1]} : vector<4x16x16xf32> to vector<1x16x16xf32>
    %19 = vector.shape_cast %18 : vector<1x16x16xf32> to vector<16x16xf32>
    %20 = vector.shape_cast %19 : vector<16x16xf32> to vector<1x16x16xf32>
    %21 = vector.broadcast %20 : vector<1x16x16xf32> to vector<8x16x16xf32>
    %22 = arith.addf %17, %21 : vector<8x16x16xf32>
    %cst_15 = arith.constant dense<0xFF800000> : vector<8x16xf32>
    %23 = vector.multi_reduction <maximumf>, %22, %cst_15 [2] : vector<8x16x16xf32> to vector<8x16xf32>
    %24 = vector.shape_cast %23 : vector<8x16xf32> to vector<8x16x1xf32>
    %25 = vector.broadcast %24 : vector<8x16x1xf32> to vector<8x16x16xf32>
    %26 = arith.subf %22, %25 : vector<8x16x16xf32>
    %27 = math.exp %26 : vector<8x16x16xf32>
    %cst_16 = arith.constant dense<0.000000e+00> : vector<8x16xf32>
    %28 = vector.multi_reduction <add>, %27, %cst_16 [2] : vector<8x16x16xf32> to vector<8x16xf32>
    %29 = vector.shape_cast %28 : vector<8x16xf32> to vector<8x16x1xf32>
    %30 = tpu.reciprocal %29 {approx = true} : vector<8x16x1xf32> -> vector<8x16x1xf32>
    %31 = vector.broadcast %30 : vector<8x16x1xf32> to vector<8x16x16xf32>
    %32 = arith.mulf %27, %31 : vector<8x16x16xf32>
    %33 = arith.truncf %32 : vector<8x16x16xf32> to vector<8x16x16xbf16>
    "tpu.trace_start"() <{level = 10 : i32, message = "wqk,wkd->wqd"}> : () -> ()
    %cst_17 = arith.constant dense<0.000000e+00> : vector<8x16x8xf32>
    %34 = tpu.matmul %33, %16, %cst_17 {dimension_numbers = #tpu.dot_dimension_numbers<[2], [1], [1], [2], [0, 0, 0, 1, 1, 2], [0], [0]>} : vector<8x16x16xbf16>, vector<8x16x8xbf16>, vector<8x16x8xf32> -> vector<8x16x8xf32>
    "tpu.trace_stop"() : () -> ()
    %35 = vector.extract_strided_slice %9 {offsets = [0, 0, 24], sizes = [8, 16, 24], strides = [1, 1, 1]} : vector<8x16x96xf32> to vector<8x16x24xf32>
    %36 = vector.extract_strided_slice %35 {offsets = [0, 0, 0], sizes = [8, 16, 8], strides = [1, 1, 1]} : vector<8x16x24xf32> to vector<8x16x8xf32>
    %37 = arith.truncf %36 : vector<8x16x8xf32> to vector<8x16x8xbf16>
    %38 = vector.extract_strided_slice %35 {offsets = [0, 0, 8], sizes = [8, 16, 8], strides = [1, 1, 1]} : vector<8x16x24xf32> to vector<8x16x8xf32>
    %39 = arith.truncf %38 : vector<8x16x8xf32> to vector<8x16x8xbf16>
    %40 = vector.extract_strided_slice %35 {offsets = [0, 0, 16], sizes = [8, 16, 8], strides = [1, 1, 1]} : vector<8x16x24xf32> to vector<8x16x8xf32>
    %41 = arith.truncf %40 : vector<8x16x8xf32> to vector<8x16x8xbf16>
    "tpu.trace_start"() <{level = 10 : i32, message = "wqd,wkd->wqk"}> : () -> ()
    %cst_18 = arith.constant dense<0.000000e+00> : vector<8x16x16xf32>
    %42 = tpu.matmul %37, %39, %cst_18 {dimension_numbers = #tpu.dot_dimension_numbers<[2], [2], [1], [1], [0, 0, 0, 1, 1, 1], [0], [0]>} : vector<8x16x8xbf16>, vector<8x16x8xbf16>, vector<8x16x16xf32> -> vector<8x16x16xf32>
    "tpu.trace_stop"() : () -> ()
    %43 = vector.extract_strided_slice %3 {offsets = [1, 0, 0], sizes = [1, 16, 16], strides = [1, 1, 1]} : vector<4x16x16xf32> to vector<1x16x16xf32>
    %44 = vector.shape_cast %43 : vector<1x16x16xf32> to vector<16x16xf32>
    %45 = vector.shape_cast %44 : vector<16x16xf32> to vector<1x16x16xf32>
    %46 = vector.broadcast %45 : vector<1x16x16xf32> to vector<8x16x16xf32>
    %47 = arith.addf %42, %46 : vector<8x16x16xf32>
    %cst_19 = arith.constant dense<0xFF800000> : vector<8x16xf32>
    %48 = vector.multi_reduction <maximumf>, %47, %cst_19 [2] : vector<8x16x16xf32> to vector<8x16xf32>
    %49 = vector.shape_cast %48 : vector<8x16xf32> to vector<8x16x1xf32>
    %50 = vector.broadcast %49 : vector<8x16x1xf32> to vector<8x16x16xf32>
    %51 = arith.subf %47, %50 : vector<8x16x16xf32>
    %52 = math.exp %51 : vector<8x16x16xf32>
    %cst_20 = arith.constant dense<0.000000e+00> : vector<8x16xf32>
    %53 = vector.multi_reduction <add>, %52, %cst_20 [2] : vector<8x16x16xf32> to vector<8x16xf32>
    %54 = vector.shape_cast %53 : vector<8x16xf32> to vector<8x16x1xf32>
    %55 = tpu.reciprocal %54 {approx = true} : vector<8x16x1xf32> -> vector<8x16x1xf32>
    %56 = vector.broadcast %55 : vector<8x16x1xf32> to vector<8x16x16xf32>
    %57 = arith.mulf %52, %56 : vector<8x16x16xf32>
    %58 = arith.truncf %57 : vector<8x16x16xf32> to vector<8x16x16xbf16>
    "tpu.trace_start"() <{level = 10 : i32, message = "wqk,wkd->wqd"}> : () -> ()
    %cst_21 = arith.constant dense<0.000000e+00> : vector<8x16x8xf32>
    %59 = tpu.matmul %58, %41, %cst_21 {dimension_numbers = #tpu.dot_dimension_numbers<[2], [1], [1], [2], [0, 0, 0, 1, 1, 2], [0], [0]>} : vector<8x16x16xbf16>, vector<8x16x8xbf16>, vector<8x16x8xf32> -> vector<8x16x8xf32>
    "tpu.trace_stop"() : () -> ()
    %60 = vector.extract_strided_slice %9 {offsets = [0, 0, 48], sizes = [8, 16, 24], strides = [1, 1, 1]} : vector<8x16x96xf32> to vector<8x16x24xf32>
    %61 = vector.extract_strided_slice %60 {offsets = [0, 0, 0], sizes = [8, 16, 8], strides = [1, 1, 1]} : vector<8x16x24xf32> to vector<8x16x8xf32>
    %62 = arith.truncf %61 : vector<8x16x8xf32> to vector<8x16x8xbf16>
    %63 = vector.extract_strided_slice %60 {offsets = [0, 0, 8], sizes = [8, 16, 8], strides = [1, 1, 1]} : vector<8x16x24xf32> to vector<8x16x8xf32>
    %64 = arith.truncf %63 : vector<8x16x8xf32> to vector<8x16x8xbf16>
    %65 = vector.extract_strided_slice %60 {offsets = [0, 0, 16], sizes = [8, 16, 8], strides = [1, 1, 1]} : vector<8x16x24xf32> to vector<8x16x8xf32>
    %66 = arith.truncf %65 : vector<8x16x8xf32> to vector<8x16x8xbf16>
    "tpu.trace_start"() <{level = 10 : i32, message = "wqd,wkd->wqk"}> : () -> ()
    %cst_22 = arith.constant dense<0.000000e+00> : vector<8x16x16xf32>
    %67 = tpu.matmul %62, %64, %cst_22 {dimension_numbers = #tpu.dot_dimension_numbers<[2], [2], [1], [1], [0, 0, 0, 1, 1, 1], [0], [0]>} : vector<8x16x8xbf16>, vector<8x16x8xbf16>, vector<8x16x16xf32> -> vector<8x16x16xf32>
    "tpu.trace_stop"() : () -> ()
    %68 = vector.extract_strided_slice %3 {offsets = [2, 0, 0], sizes = [1, 16, 16], strides = [1, 1, 1]} : vector<4x16x16xf32> to vector<1x16x16xf32>
    %69 = vector.shape_cast %68 : vector<1x16x16xf32> to vector<16x16xf32>
    %70 = vector.shape_cast %69 : vector<16x16xf32> to vector<1x16x16xf32>
    %71 = vector.broadcast %70 : vector<1x16x16xf32> to vector<8x16x16xf32>
    %72 = arith.addf %67, %71 : vector<8x16x16xf32>
    %cst_23 = arith.constant dense<0xFF800000> : vector<8x16xf32>
    %73 = vector.multi_reduction <maximumf>, %72, %cst_23 [2] : vector<8x16x16xf32> to vector<8x16xf32>
    %74 = vector.shape_cast %73 : vector<8x16xf32> to vector<8x16x1xf32>
    %75 = vector.broadcast %74 : vector<8x16x1xf32> to vector<8x16x16xf32>
    %76 = arith.subf %72, %75 : vector<8x16x16xf32>
    %77 = math.exp %76 : vector<8x16x16xf32>
    %cst_24 = arith.constant dense<0.000000e+00> : vector<8x16xf32>
    %78 = vector.multi_reduction <add>, %77, %cst_24 [2] : vector<8x16x16xf32> to vector<8x16xf32>
    %79 = vector.shape_cast %78 : vector<8x16xf32> to vector<8x16x1xf32>
    %80 = tpu.reciprocal %79 {approx = true} : vector<8x16x1xf32> -> vector<8x16x1xf32>
    %81 = vector.broadcast %80 : vector<8x16x1xf32> to vector<8x16x16xf32>
    %82 = arith.mulf %77, %81 : vector<8x16x16xf32>
    %83 = arith.truncf %82 : vector<8x16x16xf32> to vector<8x16x16xbf16>
    "tpu.trace_start"() <{level = 10 : i32, message = "wqk,wkd->wqd"}> : () -> ()
    %cst_25 = arith.constant dense<0.000000e+00> : vector<8x16x8xf32>
    %84 = tpu.matmul %83, %66, %cst_25 {dimension_numbers = #tpu.dot_dimension_numbers<[2], [1], [1], [2], [0, 0, 0, 1, 1, 2], [0], [0]>} : vector<8x16x16xbf16>, vector<8x16x8xbf16>, vector<8x16x8xf32> -> vector<8x16x8xf32>
    "tpu.trace_stop"() : () -> ()
    %85 = vector.extract_strided_slice %9 {offsets = [0, 0, 72], sizes = [8, 16, 24], strides = [1, 1, 1]} : vector<8x16x96xf32> to vector<8x16x24xf32>
    %86 = vector.extract_strided_slice %85 {offsets = [0, 0, 0], sizes = [8, 16, 8], strides = [1, 1, 1]} : vector<8x16x24xf32> to vector<8x16x8xf32>
    %87 = arith.truncf %86 : vector<8x16x8xf32> to vector<8x16x8xbf16>
    %88 = vector.extract_strided_slice %85 {offsets = [0, 0, 8], sizes = [8, 16, 8], strides = [1, 1, 1]} : vector<8x16x24xf32> to vector<8x16x8xf32>
    %89 = arith.truncf %88 : vector<8x16x8xf32> to vector<8x16x8xbf16>
    %90 = vector.extract_strided_slice %85 {offsets = [0, 0, 16], sizes = [8, 16, 8], strides = [1, 1, 1]} : vector<8x16x24xf32> to vector<8x16x8xf32>
    %91 = arith.truncf %90 : vector<8x16x8xf32> to vector<8x16x8xbf16>
    "tpu.trace_start"() <{level = 10 : i32, message = "wqd,wkd->wqk"}> : () -> ()
    %cst_26 = arith.constant dense<0.000000e+00> : vector<8x16x16xf32>
    %92 = tpu.matmul %87, %89, %cst_26 {dimension_numbers = #tpu.dot_dimension_numbers<[2], [2], [1], [1], [0, 0, 0, 1, 1, 1], [0], [0]>} : vector<8x16x8xbf16>, vector<8x16x8xbf16>, vector<8x16x16xf32> -> vector<8x16x16xf32>
    "tpu.trace_stop"() : () -> ()
    %93 = vector.extract_strided_slice %3 {offsets = [3, 0, 0], sizes = [1, 16, 16], strides = [1, 1, 1]} : vector<4x16x16xf32> to vector<1x16x16xf32>
    %94 = vector.shape_cast %93 : vector<1x16x16xf32> to vector<16x16xf32>
    %95 = vector.shape_cast %94 : vector<16x16xf32> to vector<1x16x16xf32>
    %96 = vector.broadcast %95 : vector<1x16x16xf32> to vector<8x16x16xf32>
    %97 = arith.addf %92, %96 : vector<8x16x16xf32>
    %cst_27 = arith.constant dense<0xFF800000> : vector<8x16xf32>
    %98 = vector.multi_reduction <maximumf>, %97, %cst_27 [2] : vector<8x16x16xf32> to vector<8x16xf32>
    %99 = vector.shape_cast %98 : vector<8x16xf32> to vector<8x16x1xf32>
    %100 = vector.broadcast %99 : vector<8x16x1xf32> to vector<8x16x16xf32>
    %101 = arith.subf %97, %100 : vector<8x16x16xf32>
    %102 = math.exp %101 : vector<8x16x16xf32>
    %cst_28 = arith.constant dense<0.000000e+00> : vector<8x16xf32>
    %103 = vector.multi_reduction <add>, %102, %cst_28 [2] : vector<8x16x16xf32> to vector<8x16xf32>
    %104 = vector.shape_cast %103 : vector<8x16xf32> to vector<8x16x1xf32>
    %105 = tpu.reciprocal %104 {approx = true} : vector<8x16x1xf32> -> vector<8x16x1xf32>
    %106 = vector.broadcast %105 : vector<8x16x1xf32> to vector<8x16x16xf32>
    %107 = arith.mulf %102, %106 : vector<8x16x16xf32>
    %108 = arith.truncf %107 : vector<8x16x16xf32> to vector<8x16x16xbf16>
    "tpu.trace_start"() <{level = 10 : i32, message = "wqk,wkd->wqd"}> : () -> ()
    %cst_29 = arith.constant dense<0.000000e+00> : vector<8x16x8xf32>
    %109 = tpu.matmul %108, %91, %cst_29 {dimension_numbers = #tpu.dot_dimension_numbers<[2], [1], [1], [2], [0, 0, 0, 1, 1, 2], [0], [0]>} : vector<8x16x16xbf16>, vector<8x16x8xbf16>, vector<8x16x8xf32> -> vector<8x16x8xf32>
    "tpu.trace_stop"() : () -> ()
    %110 = tpu.concatenate %34, %59, %84, %109 in 2 : vector<8x16x8xf32>, vector<8x16x8xf32>, vector<8x16x8xf32>, vector<8x16x8xf32> -> vector<8x16x32xf32>
    %111 = vector.shape_cast %110 : vector<8x16x32xf32> to vector<128x32xf32>
    %112 = arith.truncf %111 : vector<128x32xf32> to vector<128x32xbf16>
    %cst_30 = arith.constant dense<0.000000e+00> : vector<128x32xf32>
    %113 = tpu.matmul %112, %1, %cst_30 {dimension_numbers = #tpu.dot_dimension_numbers<[1], [0], [0], [1], [0, 0, 1, 1], [], []>} : vector<128x32xbf16>, vector<32x32xbf16>, vector<128x32xf32> -> vector<128x32xf32>
    %114 = vector.broadcast %2 : vector<1x32xf32> to vector<128x32xf32>
    %115 = arith.addf %113, %114 : vector<128x32xf32>
    %116 = vector.shape_cast %115 : vector<128x32xf32> to vector<8x16x32xf32>
    %117 = vector.shape_cast %116 : vector<8x16x32xf32> to vector<2x4x4x1x4x32xf32>
    %c0_31 = arith.constant 0 : index
    %c0_32 = arith.constant 0 : index
    %c0_33 = arith.constant 0 : index
    %c0_34 = arith.constant 0 : index
    %c0_35 = arith.constant 0 : index
    %c0_36 = arith.constant 0 : index
    %118 = vector.load %arg8[%c0_31, %c0_32, %c0_33, %c0_34, %c0_35, %c0_36] : memref<2x4x4x1x4x32xf32, #tpu.memory_space<vmem>>, vector<2x4x4x1x4x32xf32>
    tpu.vector_store %arg8[%c0_31, %c0_32, %c0_33, %c0_34, %c0_35, %c0_36], %117 {strides = array<i32>} : memref<2x4x4x1x4x32xf32, #tpu.memory_space<vmem>>, vector<2x4x4x1x4x32xf32>,
    return
  }
  func.func @transform_0(%arg0: i32, %arg1: i32, %arg2: i32) -> (i32, i32, i32, i32, i32, i32) {
    %c0_i32 = arith.constant 0 : i32
    %c0_i32_0 = arith.constant 0 : i32
    %c0_i32_1 = arith.constant 0 : i32
    %c0_i32_2 = arith.constant 0 : i32
    return %arg0, %arg1, %c0_i32, %arg2, %c0_i32_0, %c0_i32_1 : i32, i32, i32, i32, i32, i32
  }
  func.func @transform_1(%arg0: i32, %arg1: i32, %arg2: i32) -> (i32, i32) {
    %c0_i32 = arith.constant 0 : i32
    %c0_i32_0 = arith.constant 0 : i32
    %c0_i32_1 = arith.constant 0 : i32
    return %c0_i32, %c0_i32_0 : i32, i32
  }
  func.func @transform_2(%arg0: i32, %arg1: i32, %arg2: i32) -> (i32, i32) {
    %c0_i32 = arith.constant 0 : i32
    %c0_i32_0 = arith.constant 0 : i32
    %c0_i32_1 = arith.constant 0 : i32
    return %c0_i32, %c0_i32_0 : i32, i32
  }
  func.func @transform_3(%arg0: i32, %arg1: i32, %arg2: i32) -> (i32, i32) {
    %c0_i32 = arith.constant 0 : i32
    %c0_i32_0 = arith.constant 0 : i32
    %c0_i32_1 = arith.constant 0 : i32
    return %c0_i32, %c0_i32_0 : i32, i32
  }
  func.func @transform_4(%arg0: i32, %arg1: i32, %arg2: i32) -> (i32, i32, i32) {
    %c0_i32 = arith.constant 0 : i32
    %c0_i32_0 = arith.constant 0 : i32
    %c0_i32_1 = arith.constant 0 : i32
    %c0_i32_2 = arith.constant 0 : i32
    return %c0_i32, %c0_i32_0, %c0_i32_1 : i32, i32, i32
  }
  func.func @transform_5(%arg0: i32, %arg1: i32, %arg2: i32) -> (i32, i32, i32, i32, i32, i32) {
    %c0_i32 = arith.constant 0 : i32
    %c0_i32_0 = arith.constant 0 : i32
    %c0_i32_1 = arith.constant 0 : i32
    %c0_i32_2 = arith.constant 0 : i32
    return %arg0, %arg1, %c0_i32, %arg2, %c0_i32_0, %c0_i32_1 : i32, i32, i32, i32, i32, i32
  }
}

</mosaic_0001>

<bundles_post_ra>
// kernel: tpu_custom_call.1
= control target key start
LH: loop header
LB: loop body
LE: loop exit
PB: predicated region body
PF: predicated region fallthrough
CT: control target
= control target key end

     0   :  { %s6003_s0 = inlined_call_operand.hbm [shape: f32[2,4,4,4,4,32], index: 0, kind: input, shape index: {}]   ;;  %s6004_s1 = inlined_call_operand.hbm [shape: bf16[32,96], index: 1, kind: input, shape index: {}]   ;;  %s6005_s2 = inlined_call_operand.hbm [shape: bf16[32,32], index: 2, kind: input, shape index: {}]   ;;  %s6006_s3 = inlined_call_operand.vmem [shape: f32[1,32], index: 3, kind: input, shape index: {}]   ;;  %s6007_s4 = inlined_call_operand.hbm [shape: f32[4,16,16], index: 4, kind: input, shape index: {}]   ;;  %s6008_s5 = inlined_call_operand.hbm [shape: f32[2,4,4,4,4,32], index: 5, kind: output, shape index: {}]  }
   0x1   :  { %6013 = sst [smem:[#allocation33_spill]] %s6004_s1 }
   0x2   :  { %6014 = sst [smem:[#allocation34_spill]] %s6005_s2 }
   0x3   :  { %6015 = sst [smem:[#allocation35_spill]] %s6007_s4 }
   0x4   :  { %10 = vsyncpa [#allocation3], 0 }
   0x5   :  { %12 = vsyncpa [#allocation3 + $0x1], 0 }
   0x6   :  { %13 = vsyncpa [#allocation6], 0 }
   0x7   :  { %14 = vsyncpa [#allocation9], 0 }
   0x8   :  { %15 = vsyncpa [#allocation4], 0 }
   0x9   :  { %17 = vsyncpa [#allocation4 + $0x1], 0  ;;  %s4398_s18 = smov 0   ;;  %s4400_s19 = smov 0  }
   0xa   :  { %s4402_s20 = smov 0   ;;  %s4404_s21 = smov 0  }
   0xb   :  { %s4406_s22 = smov 0   ;;  %s4408_s23 = smov 0  }
   0xc LB: > { %s3516_s24 = sadd.s32 4294967295, %s4342_s23   ;;  %s3517_s25 = sadd.s32 4294967294, %s4342_s23   ;;  %s4342_s23 = sphi %s4408_s23, %s23_s23   ;;  %s4338_s22 = sphi %s4406_s22, %s6078_s22   ;;  %s4334_s21 = sphi %s4404_s21, %s6077_s21   ;;  %s4330_s20 = sphi %s4402_s20, %s6076_s20   ;;  %s4326_s19 = sphi %s4400_s19, %s6075_s19   ;;  %s4322_s18 = sphi %s4398_s18, %s6074_s18  }
   0xd   : > { %p66_p0 = scmp.ne.s32.totalorder %s4326_s19, %s4322_s18  ;;  %p4432_p1 = scmp.eq.s32.totalorder %s3516_s24, 0 }
   0xe   : > { %p4436_p2 = scmp.eq.s32.totalorder %s3516_s24, 3  ;;  %p184_p3 = scmp.eq.s32.totalorder %s3517_s25, 3 }
   0xf   : > { %p4442_p4 = por %p4432_p1, %p66_p0  ;;  %p3518_p5 = scmp.ge.s32.totalorder %s4342_s23, 1 }
  0x10   : > { %p4447_p6 = por %p184_p3, %p66_p0  ;;  %p191_p7 = scmp.lt.s32.totalorder %s4342_s23, 5 }
  0x11   : > { %s6020_s1 = sld [smem:[#allocation33_spill]]  ;;  %s4344_s9 = smov [#allocation5]  }
  0x12   : > { %p4455_p8 = pnand %p3518_p5, %p191_p7  ;;  %s204_s10 = sshll.u32 %s4344_s9, 4  ;;  %s205_s10 = int_to_ptr.vmem [resolvable:$true] %s204_s10 }
  0x13   : > { %s6023_s2 = sld [smem:[#allocation34_spill]]  ;;  %s6009_s15 = smov 64  }
  0x14   : > { %p3657_p9 = pneg %p4455_p8  ;;  %s6010_s16 = smov 4  }
  0x15   : > { %s4347_s17 = smov [#allocation7]   ;;  %s6024_s4 = sld [smem:[#allocation35_spill]] }
  0x16   : > { %p4463_p10 = pnand %p3657_p9, %p4432_p1  ;;  %s218_s24 = sshll.u32 %s4347_s17, 4  ;;  %s219_s24 = int_to_ptr.vmem [resolvable:$true] %s218_s24 }
  0x17   : > { %s202_s7 = sshll.u32 %s6020_s1, 4  ;;  %s4348_s9 = smov [#allocation8]   ;;  %s203_s7 = int_to_ptr.hbm [resolvable:$true] %s202_s7 }
  0x18   : > { %3660 = dma.hbm_to_vmem [thread:$0]  (!%p4463_p10), %s203_s7, 256, %s205_s10, [#allocation6], %s6009_s15, %s6009_s15, %s6010_s16  }
  0x19   : > { %s216_s14 = sshll.u32 %s6023_s2, 4  ;;  %s235_s7 = sshll.u32 %s4348_s9, 4  ;;  %s217_s14 = int_to_ptr.hbm [resolvable:$true] %s216_s14  ;;  %s236_s7 = int_to_ptr.vmem [resolvable:$true] %s235_s7 }
  0x1a   : > { %3663 = dma.hbm_to_vmem [thread:$0]  (!%p4463_p10), %s217_s14, 256, %s219_s24, [#allocation6], %s6009_s15, %s6009_s15, %s6010_s16  }
  0x1b   : > { %s233_s6 = sshll.u32 %s6024_s4, 4  ;;  %s4349_s10 = smov 128   ;;  %s234_s6 = int_to_ptr.hbm [resolvable:$true] %s233_s6 }
  0x1c   : > { %s4350_s12 = smov 8   ;;  %s53_s13 = sadd.s32 1, %s4330_s20 }
  0x1d   : > { %3666 = dma.hbm_to_vmem [thread:$0]  (!%p4463_p10), %s234_s6, 1024, %s236_s7, [#allocation9], %s4349_s10, %s4349_s10, %s4350_s12  }
  0x1e   : > { %s35_s17 = sadd.s32 1, %s4338_s22  ;;  %p60_p11 = scmp.ne.s32.totalorder %s4330_s20, %s4326_s19 }
  0x1f   : > { %p36_p12 = scmp.ge.s32.totalorder %s35_s17, 4  ;;  %p61_p13 = scmp.eq.s32.totalorder %s4342_s23, 0 }
  0x20   : > { %p4492_p0 = por %p4436_p2, %p60_p11  ;;  %p3678_p3 = scmp.lt.s32.totalorder %s4342_s23, 4 }
  0x21   : > { %s6080_s17 = smov (%p36_p12, %s35_s17), 0  ;;  %p4499_p5 = por %p61_p13, %p60_p11 }
  0x22   : > { %s249_s11 = sand.u32 1, %s4330_s20   ;;  %s49_s24 = ssub.s32 %s4338_s22, %s6080_s17 }
  0x23   : > { %p51_p7 = scmp.eq.s32.totalorder %s49_s24, 0  ;;  %s3523_s30 = sshll.u32 %s249_s11, 7 }
  0x24   : > { %s3524_s6 = sshll.u32 %s4338_s22, 2  ;;  %s253_s12 = scalar_lea.vmem [#allocation2], %s3523_s30 }
  0x25   : > { %s4508_s27 = scalar_select %p51_p7, %s4330_s20, %s53_s13  }
  0x26   : > { %s263_s10 = scalar_lea.hbm %s6003_s0, %s3524_s6  ;;  %s266_s15 = sshll.u32 %s253_s12, 4  ;;  %s267_s15 = int_to_ptr.vmem [resolvable:$true] %s266_s15 }
  0x27   : > { %s264_s16 = sshll.u32 %s263_s10, 4  ;;  %p3668_p2 = pnand %p3678_p3, %p4499_p5  ;;  %s265_s16 = int_to_ptr.hbm [resolvable:$true] %s264_s16 }
  0x28   : > { %s250_s1 = scalar_lea.sflag [#allocation3], %s249_s11  ;;  %s4351_s2 = smov 256  }
  0x29   : > { %s6027_s4 = smov 4   ;;  %s6028_s24 = smov 64  }
  0x2a   : > { %3670 = dma.hbm_to_vmem [thread:$0]  (!%p3668_p2), %s265_s16, 2048, %s267_s15, %s250_s1, %s4351_s2, %s6028_s24, %s6027_s4  }
  0x2b   : > { %278 = sbr.rel (%p4455_p8) target bundleno = 2858 (0xb2a), region = 40 }
  0x30   : > { %s4522_s13 = sand.u32 1, %s4326_s19  }
  0x31   : > { %s3526_s30 = sshll.u32 %s4522_s13, 7  ;;  %s281_s6 = scalar_lea.sflag [#allocation3], %s4522_s13 }
  0x32   : > { %s4528_s14 = scalar_lea.vmem [#allocation2], %s3526_s30 }
  0x33   : > { %4305 = dma.done.wait (%p4442_p4), %s281_s6, 2048  }
  0x34   : > { %4307 = vsyncadd (%p4442_p4), %s281_s6, 4294965248 }
  0x35   : > { %4309 = dma.done.wait (%p4432_p1), [#allocation6], 512  }
  0x36   : > { %4311 = vsyncadd (%p4432_p1), [#allocation6], 4294966784 }
  0x37   : > { %4313 = dma.done.wait (%p4432_p1), [#allocation9], 1024  }
  0x38   : > { %4315 = vsyncadd (%p4432_p1), [#allocation9], 4294966272  ;;  %v3632_v0 = vld [vmem:[#allocation5 + $0x8] sm:$0xff]  ;;  %v349_v1 = vld [vmem:[%s4528_s14] sm:$0xf]  ;;  %vm504_vm0 = vcmask 261120  }
  0x39   : > { %v350_v2 = vld [vmem:[%s4528_s14 + $0x4] sm:$0xf]  ;;  %v351_v3 = vld [vmem:[%s4528_s14 + $0x8] sm:$0xf]  ;;  %535 = vmatpush.bf16.msra.mxu0 %v3632_v0  ;;  %v352_v5 = vld [vmem:[%s4528_s14 + $0xc] sm:$0xf]  ;;  %3635 = vmatpush.bf16.msra.mxu1 %v3632_v0 }
  0x3a   : > { %v3631_v4 = vld [vmem:[#allocation5] sm:$0xff]  ;;  %413 = vst [vmem:[#allocation1] ss:$2 sm:$0xff] %v349_v1  ;;  %3636 = vmatpush.bf16.msra.mxu2 %v3632_v0  ;;  %3637 = vmatpush.bf16.msra.mxu3 %v3632_v0  ;;  %v353_v6 = vld [vmem:[%s4528_s14 + $0x10] sm:$0xf]  ;;  %s4352_s1 = smov 120  }
  0x3b   : > { %415 = vst [vmem:[#allocation1 + $0x1] ss:$2 sm:$0xff] %v350_v2  ;;  %v354_v7 = vld [vmem:[%s4528_s14 + $0x14] sm:$0xf]  ;;  %v355_v8 = vld [vmem:[%s4528_s14 + $0x18] sm:$0xf] }
  0x3c   : > { %417 = vst [vmem:[#allocation1 + $0x10] ss:$2 sm:$0xff] %v351_v3  ;;  %v356_v9 = vld [vmem:[%s4528_s14 + $0x1c] sm:$0xf]  ;;  %v357_v10 = vld [vmem:[%s4528_s14 + $0x20] sm:$0xf] }
  0x3d   : > { %419 = vst [vmem:[#allocation1 + $0x11] ss:$2 sm:$0xff] %v352_v5  ;;  %536 = vmatpush.bf16.msra.mxu0 %v3631_v4  ;;  %3638 = vmatpush.bf16.msra.mxu1 %v3631_v4  ;;  %v358_v11 = vld [vmem:[%s4528_s14 + $0x24] sm:$0xf]  ;;  %v359_v12 = vld [vmem:[%s4528_s14 + $0x28] sm:$0xf] }
  0x3e   : > { %3639 = vmatpush.bf16.msra.mxu2 %v3631_v4  ;;  %421 = vst [vmem:[#allocation1 + $0x20] ss:$2 sm:$0xff] %v353_v6  ;;  %3640 = vmatpush.bf16.msra.mxu3 %v3631_v4  ;;  %v360_v14 = vld [vmem:[%s4528_s14 + $0x2c] sm:$0xf]  ;;  %v361_v17 = vld [vmem:[%s4528_s14 + $0x30] sm:$0xf] }
  0x3f   : > { %423 = vst [vmem:[#allocation1 + $0x21] ss:$2 sm:$0xff] %v354_v7  ;;  %v362_v18 = vld [vmem:[%s4528_s14 + $0x34] sm:$0xf]  ;;  %v363_v20 = vld [vmem:[%s4528_s14 + $0x38] sm:$0xf] }
  0x40   : > { %425 = vst [vmem:[#allocation1 + $0x30] ss:$2 sm:$0xff] %v355_v8  ;;  %v365_v21 = vld [vmem:[%s4528_s14 + $0x40] sm:$0xf]  ;;  %v364_v22 = vld [vmem:[%s4528_s14 + $0x3c] sm:$0xf] }
  0x41   : > { %427 = vst [vmem:[#allocation1 + $0x31] ss:$2 sm:$0xff] %v356_v9  ;;  %v366_v24 = vld [vmem:[%s4528_s14 + $0x44] sm:$0xf]  ;;  %v367_v25 = vld [vmem:[%s4528_s14 + $0x48] sm:$0xf] }
  0x42   : > { %v428_v13 = vld.sshfl [vmem:[#allocation1] sm:$0xff pattern:$0x75316420]  ;;  %v368_v27 = vld [vmem:[%s4528_s14 + $0x4c] sm:$0xf]  ;;  %s4353_s2 = smov 112  }
  0x43   : > { %432 = vst [vmem:[#allocation1] ss:$2 sm:$0xff] %v357_v10  ;;  %v369_v30 = vld [vmem:[%s4528_s14 + $0x50] sm:$0xf]  ;;  %v370_v31 = vld [vmem:[%s4528_s14 + $0x54] sm:$0xf] }
  0x44   : > { %v429_v15 = vld.sshfl [vmem:[#allocation1 + $0x10] sm:$0xff pattern:$0x75316420]  ;;  %433 = vst [vmem:[#allocation1 + $0x1] ss:$2 sm:$0xff] %v358_v11  ;;  %s4354_s4 = smov 104  }
  0x45   : > { %v484_v16 = vpack.c.bf16 %v429_v15, %v428_v13  ;;  %434 = vst [vmem:[#allocation1 + $0x10] ss:$2 sm:$0xff] %v359_v12  ;;  %v371_v32 = vld [vmem:[%s4528_s14 + $0x58] sm:$0xf]  ;;  %v373_v34 = vld [vmem:[%s4528_s14 + $0x60] sm:$0xf] }
  0x46   : > { %435 = vst [vmem:[#allocation1 + $0x11] ss:$2 sm:$0xff] %v360_v14  ;;  %v430_v19 = vld.sshfl [vmem:[#allocation1 + $0x20] sm:$0xff pattern:$0x75316420]  ;;  %s4355_s26 = smov 96  }
  0x47   : > { %3539 = vmatmul.msk.bf16.vlgmr.msra.gmra.mxu0 %vm504_vm0, %v484_v16  ;;  %436 = vst [vmem:[#allocation1 + $0x20] ss:$2 sm:$0xff] %v361_v17  ;;  %v372_v35 = vld [vmem:[%s4528_s14 + $0x5c] sm:$0xf]  ;;  %v374_v38 = vld [vmem:[%s4528_s14 + $0x64] sm:$0xf] }
  0x48   : > { %v431_v23 = vld.sshfl [vmem:[#allocation1 + $0x30] sm:$0xff pattern:$0x75316420]  ;;  %437 = vst [vmem:[#allocation1 + $0x21] ss:$2 sm:$0xff] %v362_v18  ;;  %vm601_vm1 = vcmask 64512  }
  0x49   : > { %438 = vst [vmem:[#allocation1 + $0x30] ss:$2 sm:$0xff] %v363_v20  ;;  %v485_v37 = vpack.c.bf16 %v431_v23, %v430_v19  ;;  %v375_v39 = vld [vmem:[%s4528_s14 + $0x68] sm:$0xf]  ;;  %v376_v41 = vld [vmem:[%s4528_s14 + $0x6c] sm:$0xf] }
  0x4a   : > { %439 = vst [vmem:[#allocation1 + $0x31] ss:$2 sm:$0xff] %v364_v22  ;;  %v377_v44 = vld [vmem:[%s4528_s14 + $0x70] sm:$0xf]  ;;  %v378_v45 = vld [vmem:[%s4528_s14 + $0x74] sm:$0xf] }
  0x4b   : > { %v440_v26 = vld.sshfl [vmem:[#allocation1] sm:$0xff pattern:$0x75316420]  ;;  %vm811_vm2 = vcmask 130048   ;;  %s4356_s28 = smov 88   ;;  %s4357_s8 = smov 72  }
  0x4c   : > { %444 = vst [vmem:[#allocation1] ss:$2 sm:$0xff] %v365_v21  ;;  %v379_v46 = vld [vmem:[%s4528_s14 + $0x78] sm:$0xf]  ;;  %v380_v48 = vld [vmem:[%s4528_s14 + $0x7c] sm:$0xf] }
  0x4d   : > { %v441_v28 = vld.sshfl [vmem:[#allocation1 + $0x10] sm:$0xff pattern:$0x75316420]  ;;  %445 = vst [vmem:[#allocation1 + $0x1] ss:$2 sm:$0xff] %v366_v24  ;;  %s4358_s15 = smov 80  }
  0x4e   : > { %446 = vst [vmem:[#allocation1 + $0x10] ss:$2 sm:$0xff] %v367_v25  ;;  %v486_v29 = vpack.c.bf16 %v441_v28, %v440_v26  ;;  %s4359_s16 = smov 64   ;;  %s4360_s11 = smov 48   ;;  %vm3180_vm3 = vcmask 195584   ;;  %vm3341_vm4 = vcmask 257024  }
  0x4f   : > { %447 = vst [vmem:[#allocation1 + $0x11] ss:$2 sm:$0xff] %v368_v27  ;;  %v442_v33 = vld.sshfl [vmem:[#allocation1 + $0x20] sm:$0xff pattern:$0x75316420]  ;;  %s4361_s9 = smov 56  }
  0x50   : > { %3541 = vmatmul.msk.bf16.vlgmr.msra.gmra.mxu1 %vm504_vm0, %v486_v29  ;;  %448 = vst [vmem:[#allocation1 + $0x20] ss:$2 sm:$0xff] %v369_v30  ;;  %s4362_s7 = smov 40   ;;  %s4363_s10 = smov 8  }
  0x51   : > { %v443_v36 = vld.sshfl [vmem:[#allocation1 + $0x30] sm:$0xff pattern:$0x75316420]  ;;  %449 = vst [vmem:[#allocation1 + $0x21] ss:$2 sm:$0xff] %v370_v31  ;;  %s4364_s12 = smov 16  }
  0x52   : > { %450 = vst [vmem:[#allocation1 + $0x30] ss:$2 sm:$0xff] %v371_v32  ;;  %v487_v50 = vpack.c.bf16 %v443_v36, %v442_v33  ;;  %s4365_s24 = smov 24  }
  0x53   : > { %451 = vst [vmem:[#allocation1 + $0x31] ss:$2 sm:$0xff] %v372_v35 }
  0x54   : > { %v452_v40 = vld.sshfl [vmem:[#allocation1] sm:$0xff pattern:$0x75316420] }
  0x55   : > { %456 = vst [vmem:[#allocation1] ss:$2 sm:$0xff] %v373_v34 }
  0x56   : > { %v453_v42 = vld.sshfl [vmem:[#allocation1 + $0x10] sm:$0xff pattern:$0x75316420]  ;;  %457 = vst [vmem:[#allocation1 + $0x1] ss:$2 sm:$0xff] %v374_v38 }
  0x57   : > { %3540 = vmatmul.msk.bf16.gmra.mxu0 %vm504_vm0, %v485_v37  ;;  %458 = vst [vmem:[#allocation1 + $0x10] ss:$2 sm:$0xff] %v375_v39  ;;  %v488_v43 = vpack.c.bf16 %v453_v42, %v452_v40 }
  0x58   : > { %459 = vst [vmem:[#allocation1 + $0x11] ss:$2 sm:$0xff] %v376_v41  ;;  %v454_v47 = vld.sshfl [vmem:[#allocation1 + $0x20] sm:$0xff pattern:$0x75316420] }
  0x59   : > { %3543 = vmatmul.msk.bf16.vlgmr.msra.gmra.mxu2 %vm504_vm0, %v488_v43  ;;  %460 = vst [vmem:[#allocation1 + $0x20] ss:$2 sm:$0xff] %v377_v44 }
  0x5a   : > { %v455_v49 = vld.sshfl [vmem:[#allocation1 + $0x30] sm:$0xff pattern:$0x75316420]  ;;  %461 = vst [vmem:[#allocation1 + $0x21] ss:$2 sm:$0xff] %v378_v45 }
  0x5b   : > { %462 = vst [vmem:[#allocation1 + $0x30] ss:$2 sm:$0xff] %v379_v46  ;;  %v489_v54 = vpack.c.bf16 %v455_v49, %v454_v47 }
  0x5c   : > { %463 = vst [vmem:[#allocation1 + $0x31] ss:$2 sm:$0xff] %v380_v48 }
  0x5d   : > { %v464_v51 = vld.sshfl [vmem:[#allocation1] sm:$0xff pattern:$0x75316420] }
  0x5f   : > { %v465_v52 = vld.sshfl [vmem:[#allocation1 + $0x10] sm:$0xff pattern:$0x75316420] }
  0x60   : > { %3542 = vmatmul.msk.bf16.gmra.mxu1 %vm504_vm0, %v487_v50  ;;  %v490_v53 = vpack.c.bf16 %v465_v52, %v464_v51 }
  0x61   : > { %v466_v55 = vld.sshfl [vmem:[#allocation1 + $0x20] sm:$0xff pattern:$0x75316420] }
  0x62   : > { %3545 = vmatmul.msk.bf16.vlgmr.msra.gmra.mxu3 %vm504_vm0, %v490_v53 }
  0x63   : > { %v467_v56 = vld.sshfl [vmem:[#allocation1 + $0x30] sm:$0xff pattern:$0x75316420] }
  0x64   : > { %v491_v57 = vpack.c.bf16 %v467_v56, %v466_v55 }
  0x69   : > { %3544 = vmatmul.msk.bf16.gmra.mxu2 %vm504_vm0, %v489_v54 }
  0x72   : > { %3546 = vmatmul.msk.bf16.gmra.mxu3 %vm504_vm0, %v491_v57 }
  0xc4   : > { %v538_v58 = vpop.f32.mrf.mxu0 }
  0xc5   : > { %v578_v59 = vpack.c.bf16 %v538_v58, %v538_v58 }
  0xc7   : > { %v596_v63 = vunpack.c.l.b16 %v578_v59 }
  0xcc   : > { %v540_v60 = vpop.f32.mrf.mxu0 }
  0xcd   : > { %v579_v61 = vpack.c.bf16 %v540_v60, %v540_v60  ;;  %v548_v62 = vpop.f32.mrf.mxu1 }
  0xce   : > { %v582_v2 = vpack.c.bf16 %v548_v62, %v548_v62 }
  0xcf   : > { %v597_v0 = vunpack.c.l.b16 %v579_v61 }
  0xd0   : > { %v651_v6 = vunpack.c.l.b16 %v582_v2 }
  0xd1   : > { %v4582_v1 = vpack.c.b16 %v597_v0, %v596_v63 }
  0xd3   : > { %599 = vrot.lane.b32.xlu0 %v4582_v1, %s4352_s1 }
  0xd4   : > { %v543_v3 = vpop.f32.mrf.mxu0 }
  0xd5   : > { %v550_v4 = vpop.f32.mrf.mxu1  ;;  %v580_v9 = vpack.c.bf16 %v543_v3, %v543_v3 }
  0xd6   : > { %v583_v5 = vpack.c.bf16 %v550_v4, %v550_v4 }
  0xd7   : > { %v624_v14 = vunpack.c.l.b16 %v580_v9 }
  0xd8   : > { %v652_v7 = vunpack.c.l.b16 %v583_v5 }
  0xda   : > { %v4586_v8 = vpack.c.b16 %v652_v7, %v651_v6 }
  0xdc   : > { %v558_v10 = vpop.f32.mrf.mxu2  ;;  %654 = vrot.lane.b32.xlu0 %v4586_v8, %s4352_s1  ;;  %v545_v11 = vpop.f32.mrf.mxu0 }
  0xdd   : > { %v581_v12 = vpack.c.bf16 %v545_v11, %v545_v11  ;;  %v553_v13 = vpop.f32.mrf.mxu1  ;;  %v586_v38 = vpack.c.bf16 %v558_v10, %v558_v10  ;;  %v341_v10 = vld [vmem:[#allocation8] sm:$0xff] }
  0xde   : > { %v584_v17 = vpack.c.bf16 %v553_v13, %v553_v13 }
  0xdf   : > { %v625_v15 = vunpack.c.l.b16 %v581_v12  ;;  %v705_v42 = vunpack.c.l.b16 %v586_v38 }
  0xe0   : > { %v678_v22 = vunpack.c.l.b16 %v584_v17 }
  0xe1   : > { %v4590_v16 = vpack.c.b16 %v625_v15, %v624_v14  ;;  %v342_v14 = vld [vmem:[#allocation8 + $0x8] sm:$0xff] }
  0xe3   : > { %627 = vrot.lane.b32.xlu1 %v4590_v16, %s4352_s1 }
  0xe4   : > { %v560_v18 = vpop.f32.mrf.mxu2 }
  0xe5   : > { %v568_v19 = vpop.f32.mrf.mxu3  ;;  %v555_v20 = vpop.f32.mrf.mxu1  ;;  %v587_v39 = vpack.c.bf16 %v560_v18, %v560_v18 }
  0xe6   : > { %v585_v21 = vpack.c.bf16 %v555_v20, %v555_v20  ;;  %v590_v24 = vpack.c.bf16 %v568_v19, %v568_v19 }
  0xe7   : > { %v706_v43 = vunpack.c.l.b16 %v587_v39 }
  0xe8   : > { %v679_v23 = vunpack.c.l.b16 %v585_v21  ;;  %v759_v28 = vunpack.c.l.b16 %v590_v24 }
  0xe9   : > { %v4607_v48 = vpack.c.b16 %v706_v43, %v705_v42 }
  0xea   : > { %v4594_v25 = vpack.c.b16 %v679_v23, %v678_v22 }
  0xec   : > { %v563_v26 = vpop.f32.mrf.mxu2  ;;  %681 = vrot.lane.b32.xlu1 %v4594_v25, %s4352_s1 }
  0xed   : > { %v570_v27 = vpop.f32.mrf.mxu3  ;;  %v588_v31 = vpack.c.bf16 %v563_v26, %v563_v26 }
  0xee   : > { %v591_v29 = vpack.c.bf16 %v570_v27, %v570_v27 }
  0xef   : > { %v732_v34 = vunpack.c.l.b16 %v588_v31 }
  0xf0   : > { %v760_v30 = vunpack.c.l.b16 %v591_v29 }
  0xf2   : > { %v4598_v32 = vpack.c.b16 %v760_v30, %v759_v28 }
  0xf4   : > { %762 = vrot.lane.b32.xlu0 %v4598_v32, %s4352_s1  ;;  %v565_v33 = vpop.f32.mrf.mxu2 }
  0xf5   : > { %v589_v35 = vpack.c.bf16 %v565_v33, %v565_v33  ;;  %v573_v36 = vpop.f32.mrf.mxu3 }
  0xf6   : > { %v592_v41 = vpack.c.bf16 %v573_v36, %v573_v36 }
  0xf7   : > { %v733_v37 = vunpack.c.l.b16 %v589_v35 }
  0xf8   : > { %v786_v45 = vunpack.c.l.b16 %v592_v41 }
  0xf9   : > { %v4602_v40 = vpack.c.b16 %v733_v37, %v732_v34 }
  0xfb   : > { %735 = vrot.lane.b32.xlu2 %v4602_v40, %s4352_s1 }
  0xfc   : > { %1134 = vrot.lane.b32.xlu0 %v4602_v40, %s4353_s2 }
  0xfd   : > { %v575_v44 = vpop.f32.mrf.mxu3 }
  0xfe   : > { %v593_v46 = vpack.c.bf16 %v575_v44, %v575_v44 }
 0x100   : > { %v787_v47 = vunpack.c.l.b16 %v593_v46 }
 0x102   : > { %v4609_v49 = vpack.c.b16 %v787_v47, %v786_v45 }
 0x103   : > { %708 = vrot.lane.b32.xlu2 %v4607_v48, %s4352_s1 }
 0x104   : > { %1109 = vrot.lane.b32.xlu0 %v4607_v48, %s4353_s2  ;;  %789 = vrot.lane.b32.xlu1 %v4609_v49, %s4352_s1  ;;  %s5862_s1 = scalar_lea.vmem [#allocation10], %s3526_s30  ;;  %s3628_s30 = sshll.u32 %s4334_s21, 2 }
 0x105   : > { %s3375_s21 = scalar_lea.sflag [#allocation4], %s4522_s13 }
 0x10b   : > { %1084 = vrot.lane.b32.xlu2 %v4594_v25, %s4353_s2 }
 0x10c   : > { %1204 = vrot.lane.b32.xlu0 %v4582_v1, %s4354_s4  ;;  %1009 = vrot.lane.b32.xlu1 %v4582_v1, %s4353_s2 }
 0x113   : > { %1034 = vrot.lane.b32.xlu2 %v4590_v16, %s4353_s2 }
 0x114   : > { %1059 = vrot.lane.b32.xlu1 %v4586_v8, %s4353_s2 }
 0x11b   : > { %1206 = vrot.lane.b32.xlu2 %v4582_v1, %s4355_s26 }
 0x11c   : > { %1159 = vrot.lane.b32.xlu1 %v4598_v32, %s4353_s2 }
 0x123   : > { %1230 = vrot.lane.b32.xlu2 %v4590_v16, %s4355_s26 }
 0x124   : > { %1184 = vrot.lane.b32.xlu1 %v4609_v49, %s4353_s2 }
 0x12b   : > { %1228 = vrot.lane.b32.xlu2 %v4590_v16, %s4354_s4 }
 0x145   : > { %v600_v50 = vpop.permute.xlu0 %599 }
 0x146   : > { %v606_v51 = vsel %vm601_vm1, %v600_v50, 0 }
 0x147   : > { %615 = vmatpush.bf16.xpose.msrb.mxu1 %v606_v51 }
 0x14e   : > { %v655_v52 = vpop.permute.xlu0 %654  ;;  %3547 = vmatmul.msk.bf16.vlgmr.msrb.gmra.mxu1 %vm601_vm1, %v4582_v1 }
 0x14f   : > { %v660_v53 = vsel %vm601_vm1, %v655_v52, 0 }
 0x150   : > { %669 = vmatpush.bf16.xpose.msrb.mxu3 %v660_v53 }
 0x155   : > { %v736_v54 = vpop.permute.xlu2 %735  ;;  %v628_v55 = vpop.permute.xlu1 %627 }
 0x156   : > { %v741_v56 = vsel %vm601_vm1, %v736_v54, 0  ;;  %v633_v57 = vsel %vm601_vm1, %v628_v55, 0 }
 0x157   : > { %3549 = vmatmul.msk.bf16.vlgmr.msrb.gmra.mxu3 %vm601_vm1, %v4586_v8  ;;  %642 = vmatpush.bf16.xpose.msrb.mxu2 %v633_v57 }
 0x158   : > { %750 = vmatpush.bf16.xpose.msra.mxu3 %v741_v56 }
 0x15d   : > { %v709_v58 = vpop.permute.xlu2 %708 }
 0x15e   : > { %v714_v59 = vsel %vm601_vm1, %v709_v58, 0  ;;  %v682_v60 = vpop.permute.xlu1 %681  ;;  %3548 = vmatmul.msk.bf16.vlgmr.msrb.gmra.mxu2 %vm601_vm1, %v4590_v16 }
 0x15f   : > { %v687_v61 = vsel %vm601_vm1, %v682_v60, 0  ;;  %723 = vmatpush.bf16.xpose.msra.mxu2 %v714_v59 }
 0x160   : > { %696 = vmatpush.bf16.xpose.msra.mxu1 %v687_v61 }
 0x165   : > { %v1085_v62 = vpop.permute.xlu2 %1084 }
 0x166   : > { %v763_v63 = vpop.permute.xlu0 %762 }
 0x167   : > { %v768_v0 = vsel %vm601_vm1, %v763_v63, 0  ;;  %3550 = vmatmul.msk.bf16.vlgmr.msra.gmra.mxu1 %vm601_vm1, %v4594_v25  ;;  %3552 = vmatmul.msk.bf16.vlgmr.msra.gmra.mxu3 %vm601_vm1, %v4602_v40 }
 0x168   : > { %777 = vmatpush.bf16.xpose.msrb.mxu1 %v768_v0 }
 0x16d   : > { %v1035_v2 = vpop.permute.xlu2 %1034 }
 0x16e   : > { %v1135_v3 = vpop.permute.xlu0 %1134  ;;  %3551 = vmatmul.msk.bf16.vlgmr.msra.gmra.mxu2 %vm601_vm1, %v4607_v48 }
 0x170   : > { %1047 = vmatpush.bf16.msra.mxu1 %v1035_v2 }
 0x176   : > { %v790_v4 = vpop.permute.xlu1 %789  ;;  %v1110_v5 = vpop.permute.xlu0 %1109 }
 0x177   : > { %v795_v6 = vsel %vm601_vm1, %v790_v4, 0  ;;  %3553 = vmatmul.msk.bf16.vlgmr.msrb.gmra.mxu1 %vm601_vm1, %v4598_v32 }
 0x178   : > { %804 = vmatpush.bf16.xpose.msrb.mxu2 %v795_v6  ;;  %1122 = vmatpush.bf16.msrb.mxu1 %v1110_v5 }
 0x17e   : > { %v1010_v7 = vpop.permute.xlu1 %1009 }
 0x17f   : > { %1022 = vmatpush.bf16.msrb.mxu3 %v1010_v7  ;;  %3554 = vmatmul.msk.bf16.vlgmr.msrb.gmra.mxu2 %vm601_vm1, %v4609_v49  ;;  %v4726_v7 = vpop.permute.xlu0 %1204 }
 0x183   : > { %1097 = vmatpush.bf16.msra.mxu3 %v1085_v62 }
 0x186   : > { %v1060_v9 = vpop.permute.xlu1 %1059 }
 0x187   : > { %1072 = vmatpush.bf16.msra.mxu2 %v1060_v9 }
 0x18b   : > { %1147 = vmatpush.bf16.msrb.mxu2 %v1135_v3  ;;  %v4718_v3 = vpop.permute.xlu2 %1206 }
 0x18e   : > { %v4724_v6 = vpop.permute.xlu1 %1159 }
 0x193   : > { %v4720_v4 = vpop.permute.xlu2 %1230 }
 0x19b   : > { %v4722_v5 = vpop.permute.xlu2 %1228 }
 0x1cb   : > { %v617_v11 = vpop.f32.mrf.mxu1 }
 0x1cc   : > { %v4654_v12 = vadd.f32 %v617_v11, %v341_v10 }
 0x1ce   : > { %v812_v13 = vsel %vm811_vm2, %v4654_v12, -inf }
 0x1cf   : > { %813 = vmax.xlane.f32.xlu2 %v812_v13  ;;  %v4729_v13 = vpop.permute.xlu1 %1184 }
 0x1d3   : > { %v619_v15 = vpop.f32.mrf.mxu1 }
 0x1d4   : > { %v4658_v17 = vadd.f32 %v619_v15, %v342_v14 }
 0x1d6   : > { %v815_v18 = vsel %vm811_vm2, %v4658_v17, -inf }
 0x1d7   : > { %816 = vmax.xlane.f32.xlu0 %v815_v18 }
 0x1da   : > { %v671_v19 = vpop.f32.mrf.mxu3 }
 0x1db   : > { %v4662_v20 = vadd.f32 %v671_v19, %v341_v10 }
 0x1dd   : > { %v824_v21 = vsel %vm811_vm2, %v4662_v20, -inf }
 0x1de   : > { %825 = vmax.xlane.f32.xlu1 %v824_v21 }
 0x1e1   : > { %v644_v22 = vpop.f32.mrf.mxu2 }
 0x1e2   : > { %v4666_v23 = vadd.f32 %v644_v22, %v341_v10  ;;  %v673_v24 = vpop.f32.mrf.mxu3 }
 0x1e3   : > { %v4668_v26 = vadd.f32 %v673_v24, %v342_v14 }
 0x1e4   : > { %v698_v27 = vpop.f32.mrf.mxu1  ;;  %v818_v28 = vsel %vm811_vm2, %v4666_v23, -inf }
 0x1e5   : > { %v827_v29 = vsel %vm811_vm2, %v4668_v26, -inf  ;;  %v4674_v30 = vadd.f32 %v698_v27, %v341_v10 }
 0x1e6   : > { %828 = vmax.xlane.f32.xlu2 %v827_v29  ;;  %819 = vmax.xlane.f32.xlu1 %v818_v28 }
 0x1e7   : > { %v830_v36 = vsel %vm811_vm2, %v4674_v30, -inf }
 0x1e9   : > { %v646_v31 = vpop.f32.mrf.mxu2 }
 0x1ea   : > { %v752_v33 = vpop.f32.mrf.mxu3  ;;  %v4682_v38 = vadd.f32 %v646_v31, %v342_v14 }
 0x1eb   : > { %v4686_v42 = vadd.f32 %v752_v33, %v341_v10 }
 0x1ec   : > { %v700_v34 = vpop.f32.mrf.mxu1  ;;  %v821_v46 = vsel %vm811_vm2, %v4682_v38, -inf }
 0x1ed   : > { %v4676_v35 = vadd.f32 %v700_v34, %v342_v14  ;;  %v842_v47 = vsel %vm811_vm2, %v4686_v42, -inf }
 0x1ee   : > { %831 = vmax.xlane.f32.xlu2 %v830_v36 }
 0x1ef   : > { %v833_v37 = vsel %vm811_vm2, %v4676_v35, -inf }
 0x1f0   : > { %834 = vmax.xlane.f32.xlu0 %v833_v37 }
 0x1f1   : > { %v725_v39 = vpop.f32.mrf.mxu2 }
 0x1f2   : > { %v4684_v41 = vadd.f32 %v725_v39, %v341_v10  ;;  %v754_v45 = vpop.f32.mrf.mxu3 }
 0x1f3   : > { %v4694_v50 = vadd.f32 %v754_v45, %v342_v14 }
 0x1f4   : > { %v779_v43 = vpop.f32.mrf.mxu1  ;;  %v836_v44 = vsel %vm811_vm2, %v4684_v41, -inf }
 0x1f5   : > { %837 = vmax.xlane.f32.xlu1 %v836_v44  ;;  %v4696_v51 = vadd.f32 %v779_v43, %v341_v10  ;;  %v845_v54 = vsel %vm811_vm2, %v4694_v50, -inf }
 0x1f6   : > { %822 = vmax.xlane.f32.xlu2 %v821_v46 }
 0x1f7   : > { %v848_v56 = vsel %vm811_vm2, %v4696_v51, -inf }
 0x1f8   : > { %843 = vmax.xlane.f32.xlu0 %v842_v47 }
 0x1f9   : > { %v727_v52 = vpop.f32.mrf.mxu2 }
 0x1fa   : > { %v4706_v58 = vadd.f32 %v727_v52, %v342_v14 }
 0x1fc   : > { %v781_v53 = vpop.f32.mrf.mxu1  ;;  %v839_v61 = vsel %vm811_vm2, %v4706_v58, -inf }
 0x1fd   : > { %v4700_v55 = vadd.f32 %v781_v53, %v342_v14  ;;  %846 = vmax.xlane.f32.xlu1 %v845_v54 }
 0x1fe   : > { %849 = vmax.xlane.f32.xlu2 %v848_v56 }
 0x1ff   : > { %v851_v57 = vsel %vm811_vm2, %v4700_v55, -inf }
 0x200   : > { %852 = vmax.xlane.f32.xlu0 %v851_v57 }
 0x202   : > { %v806_v59 = vpop.f32.mrf.mxu2 }
 0x203   : > { %v4708_v60 = vadd.f32 %v806_v59, %v341_v10 }
 0x205   : > { %v854_v62 = vsel %vm811_vm2, %v4708_v60, -inf }
 0x206   : > { %840 = vmax.xlane.f32.xlu2 %v839_v61 }
 0x208   : > { %855 = vmax.xlane.f32.xlu0 %v854_v62 }
 0x20a   : > { %v808_v63 = vpop.f32.mrf.mxu2 }
 0x20b   : > { %v4714_v0 = vadd.f32 %v808_v63, %v342_v14 }
 0x20d   : > { %v857_v2 = vsel %vm811_vm2, %v4714_v0, -inf }
 0x20e   : > { %858 = vmax.xlane.f32.xlu1 %v857_v2 }
 0x242   : > { %v814_v9 = vpop.xlane.xlu2 %813 }
 0x243   : > { %v860_v10 = vsub.f32 %v4654_v12, %v814_v9 }
 0x245   : > { %v876_v11 = vmul.f32 1.442695, %v860_v10 }
 0x247   : > { %3876 = vpow2.f32 %v876_v11 }
 0x24a   : > { %v817_v14 = vpop.xlane.xlu0 %816 }
 0x24b   : > { %v861_v15 = vsub.f32 %v4658_v17, %v817_v14 }
 0x24d   : > { %v4732_v18 = vpop.eup %3876  ;;  %v878_v19 = vmul.f32 1.442695, %v861_v15 }
 0x24e   : > { %v908_v21 = vsel %vm811_vm2, %v4732_v18, 0.0 }
 0x24f   : > { %3878 = vpow2.f32 %v878_v19  ;;  %909 = vadd.xlane.f32.xlu2 %v908_v21 }
 0x251   : > { %v826_v22 = vpop.xlane.xlu1 %825 }
 0x252   : > { %v864_v24 = vsub.f32 %v4662_v20, %v826_v22 }
 0x254   : > { %v884_v27 = vmul.f32 1.442695, %v864_v24 }
 0x255   : > { %v4737_v12 = vpop.eup %3878 }
 0x256   : > { %3880 = vpow2.f32 %v884_v27  ;;  %v911_v28 = vsel %vm811_vm2, %v4737_v12, 0.0 }
 0x257   : > { %912 = vadd.xlane.f32.xlu0 %v911_v28 }
 0x259   : > { %v829_v17 = vpop.xlane.xlu2 %828  ;;  %v820_v29 = vpop.xlane.xlu1 %819 }
 0x25a   : > { %v865_v31 = vsub.f32 %v4668_v26, %v829_v17  ;;  %v862_v33 = vsub.f32 %v4666_v23, %v820_v29 }
 0x25c   : > { %v4743_v34 = vpop.eup %3880  ;;  %v886_v36 = vmul.f32 1.442695, %v865_v31  ;;  %v880_v37 = vmul.f32 1.442695, %v862_v33 }
 0x25d   : > { %v920_v20 = vsel %vm811_vm2, %v4743_v34, 0.0 }
 0x25e   : > { %3882 = vpow2.f32 %v886_v36  ;;  %921 = vadd.xlane.f32.xlu2 %v920_v20 }
 0x25f   : > { %3884 = vpow2.f32 %v880_v37 }
 0x261   : > { %v832_v39 = vpop.xlane.xlu2 %831 }
 0x262   : > { %v866_v43 = vsub.f32 %v4674_v30, %v832_v39 }
 0x263   : > { %v835_v52 = vpop.xlane.xlu0 %834 }
 0x264   : > { %v4748_v44 = vpop.eup %3882  ;;  %v888_v45 = vmul.f32 1.442695, %v866_v43  ;;  %v867_v56 = vsub.f32 %v4676_v35, %v835_v52 }
 0x265   : > { %v4750_v46 = vpop.eup %3884  ;;  %v923_v23 = vsel %vm811_vm2, %v4748_v44, 0.0 }
 0x266   : > { %3886 = vpow2.f32 %v888_v45  ;;  %924 = vadd.xlane.f32.xlu0 %v923_v23  ;;  %v914_v26 = vsel %vm811_vm2, %v4750_v46, 0.0  ;;  %v890_v61 = vmul.f32 1.442695, %v867_v56 }
 0x267   : > { %915 = vadd.xlane.f32.xlu2 %v914_v26 }
 0x268   : > { %v838_v47 = vpop.xlane.xlu1 %837 }
 0x269   : > { %v823_v53 = vpop.xlane.xlu2 %822 }
 0x26a   : > { %v863_v54 = vsub.f32 %v4682_v38, %v823_v53  ;;  %v868_v38 = vsub.f32 %v4684_v41, %v838_v47 }
 0x26b   : > { %v844_v22 = vpop.xlane.xlu0 %843 }
 0x26c   : > { %v4757_v30 = vpop.eup %3886  ;;  %v882_v57 = vmul.f32 1.442695, %v863_v54  ;;  %v892_v10 = vmul.f32 1.442695, %v868_v38  ;;  %v870_v27 = vsub.f32 %v4686_v42, %v844_v22 }
 0x26d   : > { %v926_v59 = vsel %vm811_vm2, %v4757_v30, 0.0 }
 0x26e   : > { %3888 = vpow2.f32 %v882_v57 }
 0x26f   : > { %927 = vadd.xlane.f32.xlu2 %v926_v59  ;;  %3890 = vpow2.f32 %v890_v61 }
 0x270   : > { %v847_v62 = vpop.xlane.xlu1 %846 }
 0x271   : > { %v871_v63 = vsub.f32 %v4694_v50, %v847_v62  ;;  %v850_v11 = vpop.xlane.xlu2 %849 }
 0x272   : > { %v872_v50 = vsub.f32 %v4696_v51, %v850_v11  ;;  %v896_v51 = vmul.f32 1.442695, %v870_v27 }
 0x273   : > { %v898_v2 = vmul.f32 1.442695, %v871_v63  ;;  %v853_v26 = vpop.xlane.xlu0 %852 }
 0x274   : > { %v4763_v9 = vpop.eup %3888  ;;  %v900_v21 = vmul.f32 1.442695, %v872_v50  ;;  %v873_v52 = vsub.f32 %v4700_v55, %v853_v26 }
 0x275   : > { %3892 = vpow2.f32 %v898_v2  ;;  %v917_v35 = vsel %vm811_vm2, %v4763_v9, 0.0  ;;  %v4768_v14 = vpop.eup %3890 }
 0x276   : > { %918 = vadd.xlane.f32.xlu0 %v917_v35  ;;  %3894 = vpow2.f32 %v892_v10  ;;  %v929_v41 = vsel %vm811_vm2, %v4768_v14, 0.0 }
 0x277   : > { %3896 = vpow2.f32 %v900_v21 }
 0x278   : > { %3898 = vpow2.f32 %v896_v51 }
 0x279   : > { %v841_v33 = vpop.xlane.xlu2 %840 }
 0x27a   : > { %v869_v36 = vsub.f32 %v4706_v58, %v841_v33 }
 0x27b   : > { %v4770_v15 = vpop.eup %3892  ;;  %v4807_v53 = vpop.xlane.xlu0 %855 }
 0x27c   : > { %v941_v19 = vsel %vm811_vm2, %v4770_v15, 0.0  ;;  %v4777_v24 = vpop.eup %3894  ;;  %v894_v37 = vmul.f32 1.442695, %v869_v36 }
 0x27d   : > { %942 = vadd.xlane.f32.xlu1 %v941_v19  ;;  %v932_v28 = vsel %vm811_vm2, %v4777_v24, 0.0  ;;  %v4784_v17 = vpop.eup %3896 }
 0x27e   : > { %930 = vadd.xlane.f32.xlu0 %v929_v41  ;;  %v944_v29 = vsel %vm811_vm2, %v4784_v17, 0.0  ;;  %v4788_v31 = vpop.eup %3898  ;;  %3900 = vpow2.f32 %v894_v37 }
 0x27f   : > { %v938_v42 = vsel %vm811_vm2, %v4788_v31, 0.0 }
 0x281   : > { %v859_v20 = vpop.xlane.xlu1 %858 }
 0x282   : > { %v875_v43 = vsub.f32 %v4714_v0, %v859_v20  ;;  %v902_v0 = vmul.f32 1.442695, %v873_v52 }
 0x284   : > { %v4797_v39 = vpop.eup %3900  ;;  %v906_v23 = vmul.f32 1.442695, %v875_v43 }
 0x285   : > { %v935_v45 = vsel %vm811_vm2, %v4797_v39, 0.0 }
 0x286   : > { %933 = vadd.xlane.f32.xlu0 %v932_v28  ;;  %3902 = vpow2.f32 %v906_v23 }
 0x287   : > { %1278 = vrot.lane.b32.xlu2 %v4594_v25, %s4355_s26 }
 0x28c   : > { %v4802_v47 = vpop.eup %3902 }
 0x28d   : > { %v953_v58 = vsel %vm811_vm2, %v4802_v47, 0.0 }
 0x28e   : > { %945 = vadd.xlane.f32.xlu0 %v944_v29 }
 0x296   : > { %939 = vadd.xlane.f32.xlu0 %v938_v42  ;;  %1252 = vrot.lane.b32.xlu1 %v4586_v8, %s4354_s4 }
 0x2aa   : > { %1254 = vrot.lane.b32.xlu0 %v4586_v8, %s4355_s26 }
 0x2b0   : > { %936 = vadd.xlane.f32.xlu2 %v935_v45 }
 0x2c0   : > { %954 = vadd.xlane.f32.xlu1 %v953_v58 }
 0x2c2   : > { %v910_v54 = vpop.xlane.xlu2 %909 }
 0x2c3   : > { %3904 = vrcp.f32 %v910_v54 }
 0x2c4   : > { %3906 = vpow2.f32 %v902_v0 }
 0x2c8   : > { %1302 = vrot.lane.b32.xlu2 %v4607_v48, %s4355_s26 }
 0x2c9   : > { %v3905_v57 = vpop.eup %3904 }
 0x2ca   : > { %v913_v56 = vpop.xlane.xlu0 %912  ;;  %v972_v59 = vmul.f32 %v3905_v57, %v4732_v18  ;;  %v4812_v61 = vpop.eup %3906 }
 0x2cb   : > { %3908 = vrcp.f32 %v913_v56  ;;  %v947_v38 = vsel %vm811_vm2, %v4812_v61, 0.0 }
 0x2cc   : > { %v988_v63 = vpack.c.bf16 %v972_v59, %v972_v59 }
 0x2ce   : > { %v1006_v10 = vunpack.c.l.b16 %v988_v63  ;;  %v1236_v63 = vsel %vm601_vm1, %v4720_v4, 0 }
 0x2d0   : > { %1276 = vrot.lane.b32.xlu2 %v4594_v25, %s4354_s4 }
 0x2d1   : > { %v3909_v55 = vpop.eup %3908  ;;  %v922_v62 = vpop.xlane.xlu2 %921 }
 0x2d2   : > { %v973_v2 = vmul.f32 %v3909_v55, %v4737_v12  ;;  %3910 = vrcp.f32 %v922_v62 }
 0x2d4   : > { %v989_v35 = vpack.c.bf16 %v973_v2, %v973_v2  ;;  %948 = vadd.xlane.f32.xlu0 %v947_v38 }
 0x2d6   : > { %v1007_v11 = vunpack.c.l.b16 %v989_v35 }
 0x2d8   : > { %v1008_v50 = vpack.c.b16 %v1007_v11, %v1006_v10  ;;  %1350 = vrot.lane.b32.xlu2 %v4598_v32, %s4355_s26  ;;  %v3911_v19 = vpop.eup %3910 }
 0x2d9   : > { %v925_v18 = vpop.xlane.xlu0 %924  ;;  %1348 = vrot.lane.b32.xlu1 %v4598_v32, %s4354_s4  ;;  %v976_v12 = vmul.f32 %v3911_v19, %v4743_v34 }
 0x2da   : > { %3912 = vrcp.f32 %v925_v18  ;;  %3555 = vmatmul.msk.bf16.vlgmr.msrb.gmra.mxu3 %vm811_vm2, %v1008_v50  ;;  %v916_v41 = vpop.xlane.xlu2 %915 }
 0x2db   : > { %1172 = vmatpush.bf16.msrb.mxu3 %v4724_v6  ;;  %v992_v22 = vpack.c.bf16 %v976_v12, %v976_v12  ;;  %3914 = vrcp.f32 %v916_v41  ;;  %v1212_v6 = vsel %vm601_vm1, %v4718_v3, 0 }
 0x2dd   : > { %v1056_v51 = vunpack.c.l.b16 %v992_v22 }
 0x2e0   : > { %v3913_v21 = vpop.eup %3912  ;;  %1324 = vrot.lane.b32.xlu2 %v4602_v40, %s4354_s4 }
 0x2e1   : > { %v977_v27 = vmul.f32 %v3913_v21, %v4748_v44  ;;  %1372 = vrot.lane.b32.xlu1 %v4609_v49, %s4354_s4  ;;  %v3915_v33 = vpop.eup %3914 }
 0x2e2   : > { %v928_v34 = vpop.xlane.xlu2 %927  ;;  %v974_v36 = vmul.f32 %v3915_v33, %v4750_v46 }
 0x2e3   : > { %v993_v28 = vpack.c.bf16 %v977_v27, %v977_v27 }
 0x2e4   : > { %v990_v20 = vpack.c.bf16 %v974_v36, %v974_v36 }
 0x2e5   : > { %v1057_v29 = vunpack.c.l.b16 %v993_v28 }
 0x2e6   : > { %v1031_v26 = vunpack.c.l.b16 %v990_v20 }
 0x2e7   : > { %v1058_v42 = vpack.c.b16 %v1057_v29, %v1056_v51 }
 0x2e8   : > { %1593 = vrot.lane.b32.xlu2 %v4582_v1, %s4356_s28  ;;  %1300 = vrot.lane.b32.xlu0 %v4607_v48, %s4354_s4 }
 0x2e9   : > { %v919_v44 = vpop.xlane.xlu0 %918  ;;  %3557 = vmatmul.msk.bf16.vlgmr.msra.gmra.mxu2 %vm811_vm2, %v1058_v42  ;;  %1693 = vrot.lane.b32.xlu1 %v4607_v48, %s4356_s28 }
 0x2ea   : > { %3916 = vrcp.f32 %v919_v44  ;;  %1221 = vmatpush.bf16.xpose.msra.mxu2 %v1212_v6  ;;  %v1279_v41 = vpop.permute.xlu2 %1278 }
 0x2eb   : > { %3918 = vrcp.f32 %v928_v34  ;;  %v1284_v22 = vsel %vm601_vm1, %v1279_v41, 0 }
 0x2f0   : > { %v3917_v37 = vpop.eup %3916  ;;  %1643 = vrot.lane.b32.xlu2 %v4586_v8, %s4356_s28  ;;  %v943_v2 = vpop.xlane.xlu1 %942 }
 0x2f1   : > { %v975_v3 = vmul.f32 %v3917_v37, %v4763_v9  ;;  %v931_v43 = vpop.xlane.xlu0 %930  ;;  %1743 = vrot.lane.b32.xlu1 %v4598_v32, %s4356_s28  ;;  %v3919_v45 = vpop.eup %3918 }
 0x2f2   : > { %3920 = vrcp.f32 %v931_v43  ;;  %v978_v58 = vmul.f32 %v3919_v45, %v4757_v30  ;;  %v874_v30 = vsub.f32 %v4708_v60, %v4807_v53 }
 0x2f3   : > { %v991_v23 = vpack.c.bf16 %v975_v3, %v975_v3  ;;  %3922 = vrcp.f32 %v943_v2 }
 0x2f4   : > { %v994_v0 = vpack.c.bf16 %v978_v58, %v978_v58 }
 0x2f5   : > { %v1032_v52 = vunpack.c.l.b16 %v991_v23 }
 0x2f6   : > { %v1081_v59 = vunpack.c.l.b16 %v994_v0 }
 0x2f7   : > { %v1033_v54 = vpack.c.b16 %v1032_v52, %v1031_v26 }
 0x2f8   : > { %v3921_v46 = vpop.eup %3920  ;;  %1790 = vrot.lane.b32.xlu2 %v4582_v1, %s4357_s8 }
 0x2f9   : > { %v979_v9 = vmul.f32 %v3921_v46, %v4768_v14  ;;  %3556 = vmatmul.msk.bf16.vlgmr.msra.gmra.mxu1 %vm811_vm2, %v1033_v54  ;;  %v934_v56 = vpop.xlane.xlu0 %933  ;;  %v904_v14 = vmul.f32 1.442695, %v874_v30 }
 0x2fa   : > { %1197 = vmatpush.bf16.msra.mxu1 %v4729_v13  ;;  %v3923_v13 = vpop.eup %3922 }
 0x2fb   : > { %v995_v57 = vpack.c.bf16 %v979_v9, %v979_v9  ;;  %3924 = vpow2.f32 %v904_v14  ;;  %v983_v10 = vmul.f32 %v3923_v13, %v4770_v15 }
 0x2fd   : > { %v1082_v55 = vunpack.c.l.b16 %v995_v57  ;;  %v999_v60 = vpack.c.bf16 %v983_v10, %v983_v10 }
 0x2ff   : > { %v1083_v62 = vpack.c.b16 %v1082_v55, %v1081_v59  ;;  %v1132_v19 = vunpack.c.l.b16 %v999_v60 }
 0x301   : > { %3558 = vmatmul.msk.bf16.vlgmr.msra.gmra.mxu3 %vm811_vm2, %v1083_v62  ;;  %v946_v38 = vpop.xlane.xlu0 %945  ;;  %v4858_v11 = vpop.eup %3924 }
 0x302   : > { %1245 = vmatpush.bf16.xpose.msra.mxu3 %v1236_v63  ;;  %v950_v4 = vsel %vm811_vm2, %v4858_v11, 0.0 }
 0x309   : > { %v940_v35 = vpop.xlane.xlu0 %939 }
 0x30a   : > { %3926 = vrcp.f32 %v940_v35 }
 0x30b   : > { %3928 = vrcp.f32 %v934_v56 }
 0x310   : > { %v3927_v50 = vpop.eup %3926 }
 0x311   : > { %v982_v53 = vmul.f32 %v3927_v50, %v4788_v31  ;;  %v3929_v27 = vpop.eup %3928 }
 0x312   : > { %951 = vadd.xlane.f32.xlu0 %v950_v4  ;;  %v980_v31 = vmul.f32 %v3929_v27, %v4777_v24 }
 0x313   : > { %v998_v18 = vpack.c.bf16 %v982_v53, %v982_v53 }
 0x314   : > { %v996_v51 = vpack.c.bf16 %v980_v31, %v980_v31 }
 0x315   : > { %v1131_v12 = vunpack.c.l.b16 %v998_v18 }
 0x316   : > { %v1106_v34 = vunpack.c.l.b16 %v996_v51 }
 0x317   : > { %v1133_v21 = vpack.c.b16 %v1132_v19, %v1131_v12 }
 0x319   : > { %3560 = vmatmul.msk.bf16.vlgmr.msrb.gmra.mxu2 %vm811_vm2, %v1133_v21 }
 0x31a   : > { %1293 = vmatpush.bf16.xpose.msrb.mxu2 %v1284_v22 }
 0x31c   : > { %v1255_v33 = vpop.permute.xlu0 %1254 }
 0x31d   : > { %v1260_v37 = vsel %vm601_vm1, %v1255_v33, 0 }
 0x323   : > { %v937_v15 = vpop.xlane.xlu2 %936 }
 0x324   : > { %3930 = vrcp.f32 %v937_v15  ;;  %v4906_v15 = vld [vmem:[#allocation8 + $0x10] sm:$0xff] }
 0x325   : > { %3932 = vrcp.f32 %v946_v38 }
 0x326   : > { %1326 = vrot.lane.b32.xlu0 %v4602_v40, %s4355_s26 }
 0x329   : > { %3563 = vmatmul.msk.bf16.vlgmr.msra.gmra.mxu2 %vm601_vm1, %v4726_v7  ;;  %v1253_v7 = vpop.permute.xlu1 %1252 }
 0x32a   : > { %v3931_v28 = vpop.eup %3930 }
 0x32b   : > { %v981_v29 = vmul.f32 %v3931_v28, %v4797_v39  ;;  %v1303_v42 = vpop.permute.xlu2 %1302  ;;  %v3933_v23 = vpop.eup %3932 }
 0x32c   : > { %v984_v26 = vmul.f32 %v3933_v23, %v4784_v17  ;;  %v1308_v30 = vsel %vm601_vm1, %v1303_v42, 0 }
 0x32d   : > { %v997_v6 = vpack.c.bf16 %v981_v29, %v981_v29 }
 0x32e   : > { %1374 = vrot.lane.b32.xlu0 %v4609_v49, %s4355_s26  ;;  %v1000_v46 = vpack.c.bf16 %v984_v26, %v984_v26  ;;  %s3391_s26 = scalar_lea.hbm %s6008_s5, %s3628_s30 }
 0x32f   : > { %v1107_v44 = vunpack.c.l.b16 %v997_v6 }
 0x330   : > { %v1156_v56 = vunpack.c.l.b16 %v1000_v46 }
 0x331   : > { %v1108_v36 = vpack.c.b16 %v1107_v44, %v1106_v34 }
 0x333   : > { %v1277_v20 = vpop.permute.xlu2 %1276  ;;  %3559 = vmatmul.msk.bf16.vlgmr.msrb.gmra.mxu1 %vm811_vm2, %v1108_v36  ;;  %v955_v3 = vpop.xlane.xlu1 %954 }
 0x334   : > { %1269 = vmatpush.bf16.xpose.msrb.mxu1 %v1260_v37 }
 0x336   : > { %1618 = vrot.lane.b32.xlu0 %v4590_v16, %s4356_s28 }
 0x339   : > { %3566 = vmatmul.msk.bf16.vlgmr.msrb.gmra.mxu2 %vm601_vm1, %v1277_v20 }
 0x33b   : > { %v1351_v24 = vpop.permute.xlu2 %1350 }
 0x33c   : > { %v1356_v39 = vsel %vm601_vm1, %v1351_v24, 0  ;;  %v4934_v24 = vld [vmem:[#allocation8 + $0x18] sm:$0xff] }
 0x33d   : > { %1365 = vmatpush.bf16.xpose.msra.mxu2 %v1356_v39 }
 0x33e   : > { %1668 = vrot.lane.b32.xlu0 %v4594_v25, %s4356_s28 }
 0x343   : > { %v4881_v43 = vpop.permute.xlu2 %1324 }
 0x347   : > { %v949_v45 = vpop.xlane.xlu0 %948 }
 0x348   : > { %3934 = vrcp.f32 %v949_v45 }
 0x349   : > { %3936 = vrcp.f32 %v955_v3 }
 0x34b   : > { %v1594_v58 = vpop.permute.xlu2 %1593  ;;  %v1349_v52 = vpop.permute.xlu1 %1348 }
 0x34c   : > { %1606 = vmatpush.bf16.msrb.mxu0 %v1594_v58  ;;  %3569 = vmatmul.msk.bf16.vlgmr.msra.gmra.mxu2 %vm601_vm1, %v1349_v52 }
 0x34e   : > { %v3935_v54 = vpop.eup %3934 }
 0x34f   : > { %v985_v0 = vmul.f32 %v3935_v54, %v4812_v61  ;;  %v3937_v38 = vpop.eup %3936 }
 0x350   : > { %v987_v14 = vmul.f32 %v3937_v38, %v4802_v47 }
 0x351   : > { %v1001_v9 = vpack.c.bf16 %v985_v0, %v985_v0 }
 0x352   : > { %v1003_v10 = vpack.c.bf16 %v987_v14, %v987_v14 }
 0x353   : > { %v1157_v57 = vunpack.c.l.b16 %v1001_v9  ;;  %v1644_v59 = vpop.permute.xlu2 %1643  ;;  %v1373_v55 = vpop.permute.xlu1 %1372 }
 0x354   : > { %1656 = vmatpush.bf16.msrb.mxu2 %v1644_v59  ;;  %v1182_v53 = vunpack.c.l.b16 %v1003_v10 }
 0x355   : > { %v1158_v62 = vpack.c.b16 %v1157_v57, %v1156_v56 }
 0x357   : > { %3561 = vmatmul.msk.bf16.vlgmr.msrb.gmra.mxu3 %vm811_vm2, %v1158_v62 }
 0x358   : > { %1317 = vmatpush.bf16.xpose.msrb.mxu3 %v1308_v30 }
 0x35a   : > { %v1301_v61 = vpop.permute.xlu0 %1300 }
 0x35b   : > { %v1694_v17 = vpop.permute.xlu1 %1693 }
 0x35c   : > { %1706 = vmatpush.bf16.msra.mxu0 %v1694_v17 }
 0x35d   : > { %v4915_v29 = vpop.f32.mrf.mxu3 }
 0x35e   : > { %6033 = vst [vmem:[#allocation19_spill] sm:$0xff] %v4915_v29 }
 0x363   : > { %v1744_v63 = vpop.permute.xlu1 %1743 }
 0x364   : > { %1756 = vmatpush.bf16.msra.mxu2 %v1744_v63 }
 0x365   : > { %v4917_v42 = vpop.f32.mrf.mxu3 }
 0x366   : > { %6034 = vst [vmem:[#allocation20_spill] sm:$0xff] %v4917_v42 }
 0x367   : > { %3564 = vmatmul.msk.bf16.vlgmr.msra.gmra.mxu3 %vm601_vm1, %v4722_v5 }
 0x36c   : > { %v4892_v35 = vpop.f32.mrf.mxu2 }
 0x36d   : > { %6029 = vst [vmem:[#allocation15_spill] sm:$0xff] %v4892_v35 }
 0x374   : > { %v4895_v5 = vpop.f32.mrf.mxu2 }
 0x375   : > { %6030 = vst [vmem:[#allocation16_spill] sm:$0xff] %v4895_v5 }
 0x377   : > { %3567 = vmatmul.msk.bf16.vlgmr.msrb.gmra.mxu3 %vm601_vm1, %v1301_v61 }
 0x384   : > { %v4919_v6 = vpop.f32.mrf.mxu3 }
 0x385   : > { %v952_v2 = vpop.xlane.xlu0 %951  ;;  %6035 = vst [vmem:[#allocation21_spill] sm:$0xff] %v4919_v6 }
 0x386   : > { %3938 = vrcp.f32 %v952_v2 }
 0x38c   : > { %v3939_v13 = vpop.eup %3938  ;;  %v4921_v34 = vpop.f32.mrf.mxu3 }
 0x38d   : > { %v986_v50 = vmul.f32 %v3939_v13, %v4858_v11  ;;  %6036 = vst [vmem:[#allocation22_spill] sm:$0xff] %v4921_v34 }
 0x38f   : > { %v1002_v60 = vpack.c.bf16 %v986_v50, %v986_v50 }
 0x391   : > { %v1181_v4 = vunpack.c.l.b16 %v1002_v60 }
 0x393   : > { %v1183_v18 = vpack.c.b16 %v1182_v53, %v1181_v4 }
 0x395   : > { %3562 = vmatmul.msk.bf16.vlgmr.msra.gmra.mxu1 %vm811_vm2, %v1183_v18 }
 0x398   : > { %v1327_v19 = vpop.permute.xlu0 %1326 }
 0x399   : > { %v1332_v12 = vsel %vm601_vm1, %v1327_v19, 0 }
 0x39a   : > { %1341 = vmatpush.bf16.xpose.msra.mxu1 %v1332_v12 }
 0x39c   : > { %v4899_v41 = vpop.f32.mrf.mxu2 }
 0x39d   : > { %6031 = vst [vmem:[#allocation17_spill] sm:$0xff] %v4899_v41 }
 0x3a0   : > { %v1375_v47 = vpop.permute.xlu0 %1374 }
 0x3a1   : > { %v1380_v21 = vsel %vm601_vm1, %v1375_v47, 0 }
 0x3a2   : > { %1389 = vmatpush.bf16.xpose.msra.mxu3 %v1380_v21 }
 0x3a4   : > { %v4902_v22 = vpop.f32.mrf.mxu2 }
 0x3a5   : > { %6032 = vst [vmem:[#allocation18_spill] sm:$0xff] %v4902_v22  ;;  %3565 = vmatmul.msk.bf16.vlgmr.msrb.gmra.mxu1 %vm601_vm1, %v1253_v7  ;;  %v4932_v7 = vpop.f32.mrf.mxu1 }
 0x3a6   : > { %6039 = vst [vmem:[#allocation25_spill] sm:$0xff] %v4932_v7 }
 0x3a8   : > { %v1619_v11 = vpop.permute.xlu0 %1618 }
 0x3a9   : > { %3570 = vmatmul.msk.bf16.vlgmr.msra.gmra.mxu3 %vm601_vm1, %v1373_v55  ;;  %1631 = vmatpush.bf16.msrb.mxu1 %v1619_v11 }
 0x3ac   : > { %v1223_v27 = vpop.f32.mrf.mxu2 }
 0x3ad   : > { %v4909_v31 = vadd.f32 %v1223_v27, %v4906_v15  ;;  %v4941_v23 = vpop.f32.mrf.mxu1 }
 0x3ae   : > { %6040 = vst [vmem:[#allocation26_spill] sm:$0xff] %v4941_v23 }
 0x3af   : > { %v1396_v28 = vsel %vm811_vm2, %v4909_v31, -inf }
 0x3b0   : > { %v1669_v51 = vpop.permute.xlu0 %1668  ;;  %1397 = vmax.xlane.f32.xlu2 %v1396_v28 }
 0x3b1   : > { %1681 = vmatpush.bf16.msrb.mxu3 %v1669_v51  ;;  %v5007_v51 = vpop.permute.xlu2 %1790 }
 0x3b4   : > { %v1225_v39 = vpop.f32.mrf.mxu2 }
 0x3b5   : > { %3568 = vmatmul.msk.bf16.vlgmr.msra.gmra.mxu1 %vm601_vm1, %v4881_v43  ;;  %v4937_v3 = vadd.f32 %v1225_v39, %v4934_v24  ;;  %v4943_v58 = vpop.f32.mrf.mxu1 }
 0x3b6   : > { %6041 = vst [vmem:[#allocation27_spill] sm:$0xff] %v4943_v58 }
 0x3b7   : > { %v1399_v45 = vsel %vm811_vm2, %v4937_v3, -inf }
 0x3bc   : > { %v1295_v2 = vpop.f32.mrf.mxu2 }
 0x3bd   : > { %v4950_v0 = vpop.f32.mrf.mxu1  ;;  %v4974_v38 = vadd.f32 %v1295_v2, %v4906_v15 }
 0x3be   : > { %6042 = vst [vmem:[#allocation28_spill] sm:$0xff] %v4950_v0 }
 0x3bf   : > { %v1414_v50 = vsel %vm811_vm2, %v4974_v38, -inf }
 0x3c4   : > { %v1297_v53 = vpop.f32.mrf.mxu2 }
 0x3c5   : > { %v4992_v12 = vadd.f32 %v1297_v53, %v4934_v24 }
 0x3c7   : > { %v1417_v11 = vsel %vm811_vm2, %v4992_v12, -inf }
 0x3cf   : > { %v1367_v21 = vpop.f32.mrf.mxu2 }
 0x3d0   : > { %v4999_v27 = vadd.f32 %v1367_v21, %v4906_v15 }
 0x3d2   : > { %v1432_v28 = vsel %vm811_vm2, %v4999_v27, -inf }
 0x3da   : > { %v4923_v44 = vpop.f32.mrf.mxu3 }
 0x3db   : > { %6037 = vst [vmem:[#allocation23_spill] sm:$0xff] %v4923_v44 }
 0x3e2   : > { %v4925_v33 = vpop.f32.mrf.mxu3 }
 0x3e3   : > { %6038 = vst [vmem:[#allocation24_spill] sm:$0xff] %v4925_v33 }
 0x3ea   : > { %v1247_v36 = vpop.f32.mrf.mxu3 }
 0x3eb   : > { %v4928_v37 = vadd.f32 %v1247_v36, %v4906_v15 }
 0x3ed   : > { %v1402_v20 = vsel %vm811_vm2, %v4928_v37, -inf }
 0x3ee   : > { %1403 = vmax.xlane.f32.xlu0 %v1402_v20 }
 0x3f2   : > { %v1249_v43 = vpop.f32.mrf.mxu3 }
 0x3f3   : > { %v4964_v62 = vadd.f32 %v1249_v43, %v4934_v24 }
 0x3f5   : > { %v1405_v61 = vsel %vm811_vm2, %v4964_v62, -inf }
 0x3f6   : > { %1400 = vmax.xlane.f32.xlu0 %v1399_v45 }
 0x3fa   : > { %v1319_v26 = vpop.f32.mrf.mxu3 }
 0x3fb   : > { %v4977_v14 = vadd.f32 %v1319_v26, %v4906_v15 }
 0x3fd   : > { %v1420_v10 = vsel %vm811_vm2, %v4977_v14, -inf }
 0x402   : > { %v1321_v52 = vpop.f32.mrf.mxu3 }
 0x403   : > { %v4946_v54 = vadd.f32 %v1321_v52, %v4934_v24 }
 0x405   : > { %v1423_v46 = vsel %vm811_vm2, %v4946_v54, -inf }
 0x406   : > { %1424 = vmax.xlane.f32.xlu0 %v1423_v46 }
 0x412   : > { %v4952_v9 = vpop.f32.mrf.mxu1 }
 0x413   : > { %6043 = vst [vmem:[#allocation29_spill] sm:$0xff] %v4952_v9 }
 0x41a   : > { %1836 = vrot.lane.b32.xlu0 %v4586_v8, %s4358_s15  ;;  %v4956_v56 = vpop.f32.mrf.mxu1 }
 0x41b   : > { %6044 = vst [vmem:[#allocation30_spill] sm:$0xff] %v4956_v56 }
 0x422   : > { %v1271_v57 = vpop.f32.mrf.mxu1 }
 0x423   : > { %v4959_v59 = vadd.f32 %v1271_v57, %v4906_v15  ;;  %v1398_v36 = vpop.xlane.xlu2 %1397 }
 0x424   : > { %v1444_v43 = vsub.f32 %v4909_v31, %v1398_v36 }
 0x425   : > { %v1408_v55 = vsel %vm811_vm2, %v4959_v59, -inf }
 0x426   : > { %1409 = vmax.xlane.f32.xlu1 %v1408_v55  ;;  %v1460_v26 = vmul.f32 1.442695, %v1444_v43 }
 0x42a   : > { %v1273_v30 = vpop.f32.mrf.mxu1 }
 0x42b   : > { %v4967_v17 = vadd.f32 %v1273_v30, %v4934_v24 }
 0x42d   : > { %v1411_v63 = vsel %vm811_vm2, %v4967_v17, -inf }
 0x42e   : > { %1412 = vmax.xlane.f32.xlu2 %v1411_v63  ;;  %1406 = vmax.xlane.f32.xlu1 %v1405_v61 }
 0x432   : > { %v1343_v13 = vpop.f32.mrf.mxu1 }
 0x433   : > { %v4984_v60 = vadd.f32 %v1343_v13, %v4906_v15  ;;  %v1369_v13 = vpop.f32.mrf.mxu2 }
 0x434   : > { %v5039_v53 = vadd.f32 %v1369_v13, %v4934_v24 }
 0x435   : > { %v1426_v18 = vsel %vm811_vm2, %v4984_v60, -inf }
 0x436   : > { %1421 = vmax.xlane.f32.xlu2 %v1420_v10  ;;  %1415 = vmax.xlane.f32.xlu1 %v1414_v50 }
 0x43a   : > { %v1345_v4 = vpop.f32.mrf.mxu1 }
 0x43b   : > { %v4989_v19 = vadd.f32 %v1345_v4, %v4934_v24 }
 0x43d   : > { %v1429_v47 = vsel %vm811_vm2, %v4989_v19, -inf }
 0x43e   : > { %1427 = vmax.xlane.f32.xlu2 %v1426_v18 }
 0x444   : > { %1430 = vmax.xlane.f32.xlu0 %v1429_v47  ;;  %v1435_v47 = vsel %vm811_vm2, %v5039_v53, -inf }
 0x446   : > { %1418 = vmax.xlane.f32.xlu2 %v1417_v11 }
 0x44c   : > { %1433 = vmax.xlane.f32.xlu0 %v1432_v28 }
 0x44f   : > { %1788 = vrot.lane.b32.xlu1 %v4582_v1, %s4358_s15 }
 0x457   : > { %1838 = vrot.lane.b32.xlu1 %v4586_v8, %s4357_s8 }
 0x45e   : > { %1718 = vrot.lane.b32.xlu2 %v4602_v40, %s4356_s28 }
 0x45f   : > { %1814 = vrot.lane.b32.xlu1 %v4590_v16, %s4357_s8 }
 0x461   : > { %v1404_v20 = vpop.xlane.xlu0 %1403 }
 0x462   : > { %v1446_v39 = vsub.f32 %v4928_v37, %v1404_v20  ;;  %v1391_v37 = vpop.f32.mrf.mxu3 }
 0x463   : > { %v5033_v61 = vadd.f32 %v1391_v37, %v4906_v15 }
 0x464   : > { %v1464_v45 = vmul.f32 1.442695, %v1446_v39 }
 0x465   : > { %v1438_v2 = vsel %vm811_vm2, %v5033_v61, -inf }
 0x466   : > { %3940 = vpow2.f32 %v1464_v45 }
 0x467   : > { %1886 = vrot.lane.b32.xlu1 %v4607_v48, %s4357_s8  ;;  %3942 = vpow2.f32 %v1460_v26 }
 0x469   : > { %v1401_v18 = vpop.xlane.xlu0 %1400 }
 0x46a   : > { %v1393_v55 = vpop.f32.mrf.mxu3  ;;  %v1445_v20 = vsub.f32 %v4937_v3, %v1401_v18 }
 0x46b   : > { %v5028_v30 = vadd.f32 %v1393_v55, %v4934_v24 }
 0x46c   : > { %v5017_v52 = vpop.eup %3940  ;;  %v1462_v39 = vmul.f32 1.442695, %v1445_v20 }
 0x46d   : > { %v1498_v46 = vsel %vm811_vm2, %v5017_v52, 0.0  ;;  %v5023_v57 = vpop.eup %3942  ;;  %v1441_v63 = vsel %vm811_vm2, %v5028_v30, -inf }
 0x46e   : > { %1499 = vadd.xlane.f32.xlu0 %v1498_v46  ;;  %v1492_v31 = vsel %vm811_vm2, %v5023_v57, 0.0 }
 0x46f   : > { %1768 = vrot.lane.b32.xlu1 %v4609_v49, %s4356_s28  ;;  %s3392_s28 = sshll.u32 %s5862_s1, 4  ;;  %s3393_s28 = int_to_ptr.vmem [resolvable:$true] %s3392_s28 }
 0x476   : > { %1493 = vadd.xlane.f32.xlu0 %v1492_v31 }
 0x487   : > { %1442 = vmax.xlane.f32.xlu2 %v1441_v63 }
 0x499   : > { %1439 = vmax.xlane.f32.xlu1 %v1438_v2  ;;  %v1410_v10 = vpop.xlane.xlu1 %1409 }
 0x49a   : > { %v1448_v50 = vsub.f32 %v4959_v59, %v1410_v10  ;;  %v1425_v59 = vpop.xlane.xlu0 %1424 }
 0x49c   : > { %v1468_v4 = vmul.f32 1.442695, %v1448_v50 }
 0x49e   : > { %3944 = vpow2.f32 %v1468_v4 }
 0x4a1   : > { %v1413_v21 = vpop.xlane.xlu2 %1412  ;;  %1436 = vmax.xlane.f32.xlu1 %v1435_v47  ;;  %v1407_v15 = vpop.xlane.xlu1 %1406 }
 0x4a2   : > { %v1447_v11 = vsub.f32 %v4964_v62, %v1407_v15  ;;  %v1449_v3 = vsub.f32 %v4967_v17, %v1413_v21  ;;  %v5056_v63 = vpop.permute.xlu0 %1836  ;;  %v1453_v17 = vsub.f32 %v4946_v54, %v1425_v59 }
 0x4a4   : > { %v5044_v28 = vpop.eup %3944  ;;  %v1466_v36 = vmul.f32 1.442695, %v1447_v11  ;;  %v1470_v2 = vmul.f32 1.442695, %v1449_v3  ;;  %v1478_v15 = vmul.f32 1.442695, %v1453_v17 }
 0x4a5   : > { %v1504_v24 = vsel %vm811_vm2, %v5044_v28, 0.0 }
 0x4a6   : > { %1505 = vadd.xlane.f32.xlu0 %v1504_v24  ;;  %3946 = vpow2.f32 %v1466_v36 }
 0x4a7   : > { %3948 = vpow2.f32 %v1462_v39 }
 0x4a9   : > { %v1422_v43 = vpop.xlane.xlu2 %1421  ;;  %v1416_v45 = vpop.xlane.xlu1 %1415 }
 0x4aa   : > { %v1452_v26 = vsub.f32 %v4977_v14, %v1422_v43  ;;  %v1450_v46 = vsub.f32 %v4974_v38, %v1416_v45 }
 0x4ac   : > { %v1476_v37 = vmul.f32 1.442695, %v1452_v26  ;;  %v1472_v62 = vmul.f32 1.442695, %v1450_v46  ;;  %v5051_v31 = vpop.eup %3946 }
 0x4ad   : > { %v1501_v55 = vsel %vm811_vm2, %v5051_v31, 0.0  ;;  %v5059_v38 = vpop.eup %3948 }
 0x4ae   : > { %3950 = vpow2.f32 %v1476_v37  ;;  %1502 = vadd.xlane.f32.xlu1 %v1501_v55  ;;  %v1495_v47 = vsel %vm811_vm2, %v5059_v38, 0.0 }
 0x4af   : > { %3952 = vpow2.f32 %v1472_v62 }
 0x4b0   : > { %3954 = vpow2.f32 %v1470_v2 }
 0x4b1   : > { %v1428_v13 = vpop.xlane.xlu2 %1427 }
 0x4b2   : > { %v1454_v14 = vsub.f32 %v4984_v60, %v1428_v13 }
 0x4b4   : > { %v5061_v10 = vpop.eup %3950  ;;  %v1480_v50 = vmul.f32 1.442695, %v1454_v14 }
 0x4b5   : > { %v5063_v4 = vpop.eup %3952  ;;  %v1516_v18 = vsel %vm811_vm2, %v5061_v10, 0.0 }
 0x4b6   : > { %3956 = vpow2.f32 %v1480_v50  ;;  %1517 = vadd.xlane.f32.xlu0 %v1516_v18  ;;  %v1510_v60 = vsel %vm811_vm2, %v5063_v4, 0.0  ;;  %1496 = vadd.xlane.f32.xlu1 %v1495_v47  ;;  %v5073_v54 = vpop.eup %3954 }
 0x4b7   : > { %1511 = vadd.xlane.f32.xlu2 %v1510_v60  ;;  %v1431_v21 = vpop.xlane.xlu0 %1430  ;;  %3958 = vpow2.f32 %v1478_v15  ;;  %v1507_v43 = vsel %vm811_vm2, %v5073_v54, 0.0 }
 0x4b8   : > { %v1455_v24 = vsub.f32 %v4989_v19, %v1431_v21 }
 0x4b9   : > { %v1419_v11 = vpop.xlane.xlu2 %1418 }
 0x4ba   : > { %v1451_v36 = vsub.f32 %v4992_v12, %v1419_v11  ;;  %v1482_v26 = vmul.f32 1.442695, %v1455_v24 }
 0x4bc   : > { %v5075_v20 = vpop.eup %3956  ;;  %v1474_v59 = vmul.f32 1.442695, %v1451_v36 }
 0x4bd   : > { %v1522_v39 = vsel %vm811_vm2, %v5075_v20, 0.0  ;;  %v5085_v19 = vpop.eup %3958 }
 0x4be   : > { %3960 = vpow2.f32 %v1474_v59  ;;  %1508 = vadd.xlane.f32.xlu1 %v1507_v43  ;;  %v1519_v2 = vsel %vm811_vm2, %v5085_v19, 0.0 }
 0x4bf   : > { %1523 = vadd.xlane.f32.xlu2 %v1522_v39  ;;  %v1434_v45 = vpop.xlane.xlu0 %1433  ;;  %3962 = vpow2.f32 %v1482_v26 }
 0x4c0   : > { %v1456_v12 = vsub.f32 %v4999_v27, %v1434_v45 }
 0x4c1   : > { %v1719_v46 = vpop.permute.xlu2 %1718  ;;  %v5083_v37 = vpop.permute.xlu1 %1788 }
 0x4c2   : > { %v1484_v62 = vmul.f32 1.442695, %v1456_v12  ;;  %1731 = vmatpush.bf16.msra.mxu1 %v1719_v46 }
 0x4c4   : > { %v5087_v3 = vpop.eup %3960  ;;  %3964 = vpow2.f32 %v1484_v62 }
 0x4c5   : > { %v1513_v55 = vsel %vm811_vm2, %v5087_v3, 0.0  ;;  %v5095_v13 = vpop.eup %3962 }
 0x4c6   : > { %1514 = vadd.xlane.f32.xlu0 %v1513_v55  ;;  %1520 = vadd.xlane.f32.xlu1 %v1519_v2  ;;  %v1525_v50 = vsel %vm811_vm2, %v5095_v13, 0.0 }
 0x4c9   : > { %v5093_v27 = vpop.permute.xlu1 %1838 }
 0x4ca   : > { %v5097_v14 = vpop.eup %3964 }
 0x4cb   : > { %v1528_v17 = vsel %vm811_vm2, %v5097_v14, 0.0 }
 0x4ce   : > { %1526 = vadd.xlane.f32.xlu0 %v1525_v50  ;;  %1529 = vadd.xlane.f32.xlu1 %v1528_v17 }
 0x4d1   : > { %v1815_v18 = vpop.permute.xlu1 %1814 }
 0x4d9   : > { %v5103_v47 = vpop.permute.xlu1 %1886 }
 0x4e1   : > { %v1769_v60 = vpop.permute.xlu1 %1768  ;;  %v1500_v12 = vpop.xlane.xlu0 %1499 }
 0x4e2   : > { %1781 = vmatpush.bf16.msra.mxu3 %v1769_v60 }
 0x4e7   : > { %1884 = vrot.lane.b32.xlu1 %v4607_v48, %s4358_s15 }
 0x4ef   : > { %1862 = vrot.lane.b32.xlu1 %v4594_v25, %s4357_s8 }
 0x4f7   : > { %1910 = vrot.lane.b32.xlu1 %v4602_v40, %s4357_s8 }
 0x4fa   : > { %v1443_v21 = vpop.xlane.xlu2 %1442 }
 0x4fb   : > { %v1459_v15 = vsub.f32 %v5028_v30, %v1443_v21 }
 0x4fd   : > { %v1490_v11 = vmul.f32 1.442695, %v1459_v15 }
 0x4ff   : > { %3966 = vpow2.f32 %v1490_v11  ;;  %1908 = vrot.lane.b32.xlu1 %v4602_v40, %s4358_s15 }
 0x505   : > { %v5114_v36 = vpop.eup %3966 }
 0x506   : > { %v1537_v24 = vsel %vm811_vm2, %v5114_v36, 0.0 }
 0x507   : > { %1538 = vadd.xlane.f32.xlu2 %v1537_v24  ;;  %2177 = vrot.lane.b32.xlu1 %v4582_v1, %s4359_s16 }
 0x50c   : > { %v1440_v59 = vpop.xlane.xlu1 %1439 }
 0x50d   : > { %v1458_v39 = vsub.f32 %v5033_v61, %v1440_v59 }
 0x50f   : > { %v1488_v43 = vmul.f32 1.442695, %v1458_v39  ;;  %2202 = vrot.lane.b32.xlu1 %v4590_v16, %s4359_s16 }
 0x511   : > { %3968 = vpow2.f32 %v1488_v43 }
 0x514   : > { %v1437_v30 = vpop.xlane.xlu1 %1436 }
 0x515   : > { %v1457_v45 = vsub.f32 %v5039_v53, %v1437_v30  ;;  %v1494_v53 = vpop.xlane.xlu0 %1493 }
 0x517   : > { %v5124_v26 = vpop.eup %3968  ;;  %v1486_v46 = vmul.f32 1.442695, %v1457_v45  ;;  %2374 = vrot.lane.b32.xlu1 %v4582_v1, %s4360_s11 }
 0x518   : > { %v1534_v62 = vsel %vm811_vm2, %v5124_v26, 0.0 }
 0x519   : > { %3970 = vpow2.f32 %v1486_v46  ;;  %1535 = vadd.xlane.f32.xlu0 %v1534_v62 }
 0x51a   : > { %3972 = vrcp.f32 %v1500_v12 }
 0x51d   : > { %v1506_v21 = vpop.xlane.xlu0 %1505 }
 0x51f   : > { %v5130_v61 = vpop.eup %3970 }
 0x520   : > { %v1531_v55 = vsel %vm811_vm2, %v5130_v61, 0.0  ;;  %v3973_v50 = vpop.eup %3972 }
 0x521   : > { %1532 = vadd.xlane.f32.xlu2 %v1531_v55  ;;  %v1503_v2 = vpop.xlane.xlu1 %1502  ;;  %v1558_v17 = vmul.f32 %v3973_v50, %v5017_v52  ;;  %v1820_v55 = vsel %vm601_vm1, %v1815_v18, 0 }
 0x522   : > { %3974 = vrcp.f32 %v1503_v2 }
 0x523   : > { %3976 = vrcp.f32 %v1494_v53  ;;  %v1574_v15 = vpack.c.bf16 %v1558_v17, %v1558_v17 }
 0x525   : > { %v1615_v43 = vunpack.c.l.b16 %v1574_v15 }
 0x528   : > { %v3975_v60 = vpop.eup %3974 }
 0x529   : > { %v1559_v11 = vmul.f32 %v3975_v60, %v5051_v31  ;;  %v1497_v24 = vpop.xlane.xlu1 %1496  ;;  %v3977_v59 = vpop.eup %3976 }
 0x52a   : > { %3978 = vrcp.f32 %v1497_v24  ;;  %v1556_v45 = vmul.f32 %v3977_v59, %v5023_v57  ;;  %v1512_v12 = vpop.xlane.xlu2 %1511  ;;  %v1518_v46 = vpop.xlane.xlu0 %1517 }
 0x52b   : > { %v1575_v39 = vpack.c.bf16 %v1559_v11, %v1559_v11  ;;  %3980 = vrcp.f32 %v1506_v21 }
 0x52c   : > { %v1572_v53 = vpack.c.bf16 %v1556_v45, %v1556_v45  ;;  %3982 = vrcp.f32 %v1512_v12 }
 0x52d   : > { %1934 = vrot.lane.b32.xlu0 %v4598_v32, %s4357_s8  ;;  %v1616_v30 = vunpack.c.l.b16 %v1575_v39 }
 0x52e   : > { %v1590_v57 = vunpack.c.l.b16 %v1572_v53 }
 0x52f   : > { %v1617_v52 = vpack.c.b16 %v1616_v30, %v1615_v43  ;;  %v1796_v43 = vsel %vm601_vm1, %v5007_v51, 0 }
 0x530   : > { %v3979_v62 = vpop.eup %3978 }
 0x531   : > { %3572 = vmatmul.msk.bf16.vlgmr.msrb.gmra.mxu1 %vm811_vm2, %v1617_v52  ;;  %v1509_v31 = vpop.xlane.xlu1 %1508  ;;  %v1557_v2 = vmul.f32 %v3979_v62, %v5059_v38  ;;  %v3981_v50 = vpop.eup %3980 }
 0x532   : > { %1829 = vmatpush.bf16.xpose.msrb.mxu1 %v1820_v55  ;;  %3984 = vrcp.f32 %v1509_v31  ;;  %v1560_v60 = vmul.f32 %v3981_v50, %v5044_v28  ;;  %v3983_v18 = vpop.eup %3982  ;;  %v1524_v15 = vpop.xlane.xlu2 %1523 }
 0x533   : > { %3986 = vrcp.f32 %v1518_v46  ;;  %v1573_v17 = vpack.c.bf16 %v1557_v2, %v1557_v2  ;;  %v1562_v28 = vmul.f32 %v3983_v18, %v5063_v4 }
 0x534   : > { %v1576_v30 = vpack.c.bf16 %v1560_v60, %v1560_v60 }
 0x535   : > { %1932 = vrot.lane.b32.xlu0 %v4598_v32, %s4358_s15  ;;  %v1591_v21 = vunpack.c.l.b16 %v1573_v17  ;;  %v1578_v31 = vpack.c.bf16 %v1562_v28, %v1562_v28 }
 0x536   : > { %v1640_v46 = vunpack.c.l.b16 %v1576_v30 }
 0x537   : > { %v1592_v24 = vpack.c.b16 %v1591_v21, %v1590_v57  ;;  %v1665_v21 = vunpack.c.l.b16 %v1578_v31 }
 0x538   : > { %v3985_v38 = vpop.eup %3984 }
 0x539   : > { %v1515_v11 = vpop.xlane.xlu0 %1514  ;;  %1812 = vrot.lane.b32.xlu2 %v4590_v16, %s4358_s15  ;;  %v1521_v59 = vpop.xlane.xlu1 %1520  ;;  %v1561_v45 = vmul.f32 %v3985_v38, %v5073_v54  ;;  %3571 = vmatmul.msk.bf16.vlgmr.msrb.gmra.mxu0 %vm811_vm2, %v1592_v24 }
 0x53a   : > { %3988 = vrcp.f32 %v1515_v11  ;;  %v3987_v39 = vpop.eup %3986  ;;  %1805 = vmatpush.bf16.xpose.msrb.mxu0 %v1796_v43 }
 0x53b   : > { %3990 = vrcp.f32 %v1521_v59  ;;  %v1577_v12 = vpack.c.bf16 %v1561_v45, %v1561_v45  ;;  %v1564_v52 = vmul.f32 %v3987_v39, %v5061_v10  ;;  %v1844_v10 = vsel %vm601_vm1, %v5093_v27, 0 }
 0x53c   : > { %3992 = vrcp.f32 %v1524_v15 }
 0x53d   : > { %1956 = vrot.lane.b32.xlu0 %v4609_v49, %s4358_s15  ;;  %v1641_v62 = vunpack.c.l.b16 %v1577_v12  ;;  %v1580_v4 = vpack.c.bf16 %v1564_v52, %v1564_v52 }
 0x53f   : > { %v1642_v53 = vpack.c.b16 %v1641_v62, %v1640_v46  ;;  %v1690_v15 = vunpack.c.l.b16 %v1580_v4 }
 0x540   : > { %v3989_v55 = vpop.eup %3988 }
 0x541   : > { %v3991_v51 = vpop.eup %3990  ;;  %v1563_v54 = vmul.f32 %v3989_v55, %v5087_v3  ;;  %v1527_v2 = vpop.xlane.xlu0 %1526  ;;  %1860 = vrot.lane.b32.xlu2 %v4594_v25, %s4358_s15  ;;  %3573 = vmatmul.msk.bf16.vlgmr.msrb.gmra.mxu2 %vm811_vm2, %v1642_v53 }
 0x542   : > { %v3993_v50 = vpop.eup %3992  ;;  %v1565_v17 = vmul.f32 %v3991_v51, %v5085_v19  ;;  %3994 = vrcp.f32 %v1527_v2  ;;  %1853 = vmatpush.bf16.xpose.msrb.mxu2 %v1844_v10 }
 0x543   : > { %v1579_v57 = vpack.c.bf16 %v1563_v54, %v1563_v54  ;;  %v1566_v3 = vmul.f32 %v3993_v50, %v5075_v20  ;;  %v1892_v20 = vsel %vm601_vm1, %v5103_v47, 0 }
 0x544   : > { %v1581_v60 = vpack.c.bf16 %v1565_v17, %v1565_v17 }
 0x545   : > { %v1666_v18 = vunpack.c.l.b16 %v1579_v57  ;;  %2227 = vrot.lane.b32.xlu0 %v4586_v8, %s4359_s16  ;;  %v1582_v59 = vpack.c.bf16 %v1566_v3, %v1566_v3 }
 0x546   : > { %v1691_v11 = vunpack.c.l.b16 %v1581_v60 }
 0x547   : > { %v1667_v24 = vpack.c.b16 %v1666_v18, %v1665_v21  ;;  %v1715_v43 = vunpack.c.l.b16 %v1582_v59 }
 0x548   : > { %v3995_v19 = vpop.eup %3994  ;;  %v1692_v38 = vpack.c.b16 %v1691_v11, %v1690_v15 }
 0x549   : > { %v1567_v27 = vmul.f32 %v3995_v19, %v5095_v13  ;;  %3574 = vmatmul.msk.bf16.vlgmr.msrb.gmra.mxu3 %vm811_vm2, %v1667_v24  ;;  %1958 = vrot.lane.b32.xlu2 %v4609_v49, %s4357_s8  ;;  %v1530_v13 = vpop.xlane.xlu1 %1529  ;;  %s3394_s8 = sshll.u32 %s3391_s26, 4  ;;  %s3395_s8 = int_to_ptr.hbm [resolvable:$true] %s3394_s8 }
 0x54a   : > { %3575 = vmatmul.msk.bf16.vlgmr.msra.gmra.mxu0 %vm811_vm2, %v1692_v38  ;;  %s4266_s15 = sshra.s32 %s3395_s8, 4  ;;  %s4267_s15 = int_to_ptr.hbm [resolvable:$true] %s4266_s15 }
 0x54b   : > { %v1583_v39 = vpack.c.bf16 %v1567_v27, %v1567_v27  ;;  %1901 = vmatpush.bf16.xpose.msra.mxu0 %v1892_v20  ;;  %p4273_p9 = scmp.lt.s32.totalorder %s4267_s15, %s6008_s5 }
 0x54d   : > { %v1716_v30 = vunpack.c.l.b16 %v1583_v39  ;;  %2372 = vrot.lane.b32.xlu0 %v4582_v1, %s4361_s9 }
 0x54f   : > { %v1717_v45 = vpack.c.b16 %v1716_v30, %v1715_v43 }
 0x551   : > { %2277 = vrot.lane.b32.xlu2 %v4607_v48, %s4359_s16  ;;  %3576 = vmatmul.msk.bf16.vlgmr.msra.gmra.mxu1 %vm811_vm2, %v1717_v45 }
 0x559   : > { %2302 = vrot.lane.b32.xlu2 %v4602_v40, %s4359_s16  ;;  %v1885_v47 = vpop.permute.xlu1 %1884 }
 0x55a   : > { %3579 = vmatmul.msk.bf16.vlgmr.msrb.gmra.mxu0 %vm601_vm1, %v5083_v37 }
 0x561   : > { %v1863_v28 = vpop.permute.xlu1 %1862 }
 0x562   : > { %v1868_v12 = vsel %vm601_vm1, %v1863_v28, 0 }
 0x563   : > { %1877 = vmatpush.bf16.xpose.msrb.mxu3 %v1868_v12 }
 0x569   : > { %v1911_v52 = vpop.permute.xlu1 %1910 }
 0x56a   : > { %3583 = vmatmul.msk.bf16.vlgmr.msra.gmra.mxu0 %vm601_vm1, %v1885_v47  ;;  %v1916_v46 = vsel %vm601_vm1, %v1911_v52, 0 }
 0x56b   : > { %1925 = vmatpush.bf16.xpose.msra.mxu1 %v1916_v46 }
 0x571   : > { %v1909_v62 = vpop.permute.xlu1 %1908 }
 0x579   : > { %v2178_v55 = vpop.permute.xlu1 %2177 }
 0x57a   : > { %2190 = vmatpush.bf16.msrb.mxu0 %v2178_v55  ;;  %v1539_v51 = vpop.xlane.xlu2 %1538 }
 0x57b   : > { %3996 = vrcp.f32 %v1539_v51  ;;  %v5213_v51 = vld [vmem:[#allocation8 + $0x20] sm:$0xff] }
 0x581   : > { %v3997_v53 = vpop.eup %3996  ;;  %v2203_v24 = vpop.permute.xlu1 %2202 }
 0x582   : > { %v1571_v37 = vmul.f32 %v3997_v53, %v5114_v36 }
 0x584   : > { %v1587_v2 = vpack.c.bf16 %v1571_v37, %v1571_v37 }
 0x586   : > { %v1766_v60 = vunpack.c.l.b16 %v1587_v2 }
 0x58c   : > { %v1536_v31 = vpop.xlane.xlu0 %1535 }
 0x58d   : > { %3998 = vrcp.f32 %v1536_v31 }
 0x58e   : > { %4000 = vrcp.f32 %v1530_v13 }
 0x593   : > { %v3999_v54 = vpop.eup %3998 }
 0x594   : > { %v1570_v50 = vmul.f32 %v3999_v54, %v5124_v26  ;;  %v1533_v4 = vpop.xlane.xlu2 %1532  ;;  %v4001_v17 = vpop.eup %4000  ;;  %v5220_v54 = vld [vmem:[#allocation8 + $0x28] sm:$0xff] }
 0x595   : > { %4002 = vrcp.f32 %v1533_v4  ;;  %v1568_v57 = vmul.f32 %v4001_v17, %v5097_v14 }
 0x596   : > { %v1586_v10 = vpack.c.bf16 %v1570_v50, %v1570_v50 }
 0x597   : > { %v1584_v15 = vpack.c.bf16 %v1568_v57, %v1568_v57 }
 0x598   : > { %v1765_v21 = vunpack.c.l.b16 %v1586_v10 }
 0x599   : > { %v1740_v38 = vunpack.c.l.b16 %v1584_v15 }
 0x59a   : > { %v1767_v3 = vpack.c.b16 %v1766_v60, %v1765_v21 }
 0x59b   : > { %v4003_v18 = vpop.eup %4002 }
 0x59c   : > { %v1569_v11 = vmul.f32 %v4003_v18, %v5130_v61  ;;  %3578 = vmatmul.msk.bf16.vlgmr.msra.gmra.mxu3 %vm811_vm2, %v1767_v3  ;;  %v1813_v36 = vpop.permute.xlu2 %1812 }
 0x59d   : > { %3580 = vmatmul.msk.bf16.vlgmr.msrb.gmra.mxu1 %vm601_vm1, %v1813_v36 }
 0x59e   : > { %v1585_v26 = vpack.c.bf16 %v1569_v11, %v1569_v11  ;;  %2215 = vmatpush.bf16.msrb.mxu1 %v2203_v24 }
 0x59f   : > { %v1935_v19 = vpop.permute.xlu0 %1934 }
 0x5a0   : > { %v1741_v59 = vunpack.c.l.b16 %v1585_v26  ;;  %v1940_v14 = vsel %vm601_vm1, %v1935_v19, 0 }
 0x5a2   : > { %v1742_v27 = vpack.c.b16 %v1741_v59, %v1740_v38 }
 0x5a4   : > { %v1861_v20 = vpop.permute.xlu2 %1860  ;;  %3577 = vmatmul.msk.bf16.vlgmr.msra.gmra.mxu2 %vm811_vm2, %v1742_v27 }
 0x5a5   : > { %1949 = vmatpush.bf16.xpose.msra.mxu2 %v1940_v14 }
 0x5a7   : > { %v1933_v39 = vpop.permute.xlu0 %1932 }
 0x5ac   : > { %v1959_v61 = vpop.permute.xlu2 %1958  ;;  %3582 = vmatmul.msk.bf16.vlgmr.msrb.gmra.mxu3 %vm601_vm1, %v1861_v20 }
 0x5ad   : > { %v1964_v43 = vsel %vm601_vm1, %v1959_v61, 0  ;;  %3584 = vmatmul.msk.bf16.vlgmr.msra.gmra.mxu1 %vm601_vm1, %v1909_v62 }
 0x5ae   : > { %1973 = vmatpush.bf16.xpose.msra.mxu3 %v1964_v43  ;;  %v5195_v30 = vpop.f32.mrf.mxu1 }
 0x5af   : > { %v1957_v45 = vpop.permute.xlu0 %1956 }
 0x5b4   : > { %v2278_v13 = vpop.permute.xlu2 %2277  ;;  %3581 = vmatmul.msk.bf16.vlgmr.msrb.gmra.mxu2 %vm601_vm1, %v5056_v63 }
 0x5b5   : > { %2290 = vmatpush.bf16.msra.mxu0 %v2278_v13 }
 0x5b6   : > { %v5199_v47 = vpop.f32.mrf.mxu1  ;;  %v5201_v12 = vpop.f32.mrf.mxu0 }
 0x5b7   : > { %v2228_v28 = vpop.permute.xlu0 %2227 }
 0x5b8   : > { %2240 = vmatpush.bf16.msrb.mxu2 %v2228_v28 }
 0x5bc   : > { %v2303_v46 = vpop.permute.xlu2 %2302  ;;  %3586 = vmatmul.msk.bf16.vlgmr.msra.gmra.mxu3 %vm601_vm1, %v1957_v45 }
 0x5bd   : > { %2315 = vmatpush.bf16.msra.mxu1 %v2303_v46 }
 0x5be   : > { %v5206_v62 = vpop.f32.mrf.mxu0 }
 0x5c4   : > { %3585 = vmatmul.msk.bf16.vlgmr.msra.gmra.mxu2 %vm601_vm1, %v1933_v39  ;;  %v5238_v18 = vpop.f32.mrf.mxu2 }
 0x5c7   : > { %v5209_v55 = vpop.f32.mrf.mxu0 }
 0x5cc   : > { %v5234_v21 = vpop.f32.mrf.mxu3  ;;  %v5247_v26 = vpop.f32.mrf.mxu2 }
 0x5ce   : > { %v5232_v60 = vpop.f32.mrf.mxu1 }
 0x5cf   : > { %v5211_v63 = vpop.f32.mrf.mxu0 }
 0x5d4   : > { %v5240_v15 = vpop.f32.mrf.mxu3 }
 0x5d6   : > { %v5236_v3 = vpop.f32.mrf.mxu1 }
 0x5d7   : > { %v1807_v31 = vpop.f32.mrf.mxu0 }
 0x5d8   : > { %v5216_v53 = vadd.f32 %v1807_v31, %v5213_v51 }
 0x5da   : > { %v1980_v37 = vsel %vm811_vm2, %v5216_v53, -inf }
 0x5db   : > { %1981 = vmax.xlane.f32.xlu1 %v1980_v37 }
 0x5df   : > { %v1809_v2 = vpop.f32.mrf.mxu0 }
 0x5e0   : > { %v5223_v50 = vadd.f32 %v1809_v2, %v5220_v54 }
 0x5e2   : > { %v1983_v4 = vsel %vm811_vm2, %v5223_v50, -inf }
 0x5e3   : > { %1984 = vmax.xlane.f32.xlu2 %v1983_v4 }
 0x5e7   : > { %v1903_v17 = vpop.f32.mrf.mxu0 }
 0x5e8   : > { %v5228_v10 = vadd.f32 %v1903_v17, %v5213_v51 }
 0x5ea   : > { %v2004_v57 = vsel %vm811_vm2, %v5228_v10, -inf }
 0x5eb   : > { %2005 = vmax.xlane.f32.xlu2 %v2004_v57 }
 0x5ef   : > { %v1905_v13 = vpop.f32.mrf.mxu0 }
 0x5f0   : > { %v5275_v2 = vadd.f32 %v1905_v13, %v5220_v54 }
 0x5f2   : > { %v2007_v17 = vsel %vm811_vm2, %v5275_v2, -inf }
 0x61a   : > { %v1831_v11 = vpop.f32.mrf.mxu1 }
 0x61b   : > { %v5243_v36 = vadd.f32 %v1831_v11, %v5213_v51 }
 0x61d   : > { %v1986_v24 = vsel %vm811_vm2, %v5243_v36, -inf }
 0x61e   : > { %1987 = vmax.xlane.f32.xlu0 %v1986_v24 }
 0x61f   : > { %v5249_v19 = vpop.f32.mrf.mxu3 }
 0x622   : > { %v1833_v38 = vpop.f32.mrf.mxu1 }
 0x623   : > { %v5252_v59 = vadd.f32 %v1833_v38, %v5220_v54 }
 0x625   : > { %v1989_v27 = vsel %vm811_vm2, %v5252_v59, -inf }
 0x626   : > { %1990 = vmax.xlane.f32.xlu1 %v1989_v27 }
 0x627   : > { %v5256_v14 = vpop.f32.mrf.mxu2  ;;  %v5258_v20 = vpop.f32.mrf.mxu3 }
 0x62a   : > { %v1927_v61 = vpop.f32.mrf.mxu1 }
 0x62b   : > { %v5263_v43 = vadd.f32 %v1927_v61, %v5213_v51 }
 0x62d   : > { %v2010_v45 = vsel %vm811_vm2, %v5263_v43, -inf }
 0x62e   : > { %2011 = vmax.xlane.f32.xlu0 %v2010_v45 }
 0x62f   : > { %v5267_v28 = vpop.f32.mrf.mxu2  ;;  %v1879_v46 = vpop.f32.mrf.mxu3 }
 0x630   : > { %v5272_v37 = vadd.f32 %v1879_v46, %v5213_v51 }
 0x632   : > { %v1998_v4 = vsel %vm811_vm2, %v5272_v37, -inf  ;;  %v1929_v61 = vpop.f32.mrf.mxu1 }
 0x633   : > { %1999 = vmax.xlane.f32.xlu2 %v1998_v4  ;;  %v5292_v13 = vadd.f32 %v1929_v61, %v5220_v54 }
 0x636   : > { %2008 = vmax.xlane.f32.xlu0 %v2007_v17 }
 0x637   : > { %v1855_v57 = vpop.f32.mrf.mxu2  ;;  %v1881_v11 = vpop.f32.mrf.mxu3 }
 0x638   : > { %v5282_v24 = vadd.f32 %v1855_v57, %v5213_v51  ;;  %v5285_v38 = vadd.f32 %v1881_v11, %v5220_v54 }
 0x63a   : > { %v1992_v27 = vsel %vm811_vm2, %v5282_v24, -inf  ;;  %v2001_v45 = vsel %vm811_vm2, %v5285_v38, -inf }
 0x63b   : > { %1993 = vmax.xlane.f32.xlu1 %v1992_v27  ;;  %v2013_v27 = vsel %vm811_vm2, %v5292_v13, -inf }
 0x63e   : > { %2002 = vmax.xlane.f32.xlu0 %v2001_v45 }
 0x63f   : > { %v1857_v46 = vpop.f32.mrf.mxu2  ;;  %v1975_v4 = vpop.f32.mrf.mxu3 }
 0x640   : > { %v5295_v17 = vadd.f32 %v1857_v46, %v5220_v54  ;;  %v5298_v57 = vadd.f32 %v1975_v4, %v5213_v51 }
 0x642   : > { %v1995_v11 = vsel %vm811_vm2, %v5295_v17, -inf  ;;  %v2022_v61 = vsel %vm811_vm2, %v5298_v57, -inf }
 0x643   : > { %1996 = vmax.xlane.f32.xlu2 %v1995_v11  ;;  %2014 = vmax.xlane.f32.xlu1 %v2013_v27 }
 0x646   : > { %2023 = vmax.xlane.f32.xlu0 %v2022_v61 }
 0x647   : > { %v1951_v45 = vpop.f32.mrf.mxu2  ;;  %v1977_v4 = vpop.f32.mrf.mxu3 }
 0x648   : > { %v5307_v39 = vadd.f32 %v1951_v45, %v5213_v51  ;;  %v5312_v31 = vadd.f32 %v1977_v4, %v5220_v54 }
 0x64a   : > { %v2016_v46 = vsel %vm811_vm2, %v5307_v39, -inf  ;;  %v2025_v61 = vsel %vm811_vm2, %v5312_v31, -inf }
 0x64b   : > { %2017 = vmax.xlane.f32.xlu1 %v2016_v46 }
 0x64f   : > { %v1953_v52 = vpop.f32.mrf.mxu2 }
 0x650   : > { %v5315_v11 = vadd.f32 %v1953_v52, %v5220_v54  ;;  %v5340_v52 = vpop.permute.xlu0 %2372 }
 0x652   : > { %v2019_v27 = vsel %vm811_vm2, %v5315_v11, -inf }
 0x653   : > { %2020 = vmax.xlane.f32.xlu2 %v2019_v27  ;;  %2026 = vmax.xlane.f32.xlu1 %v2025_v61 }
 0x656   : > { %v1985_v51 = vpop.xlane.xlu2 %1984 }
 0x657   : > { %v2029_v45 = vsub.f32 %v5223_v50, %v1985_v51 }
 0x659   : > { %v2046_v9 = vmul.f32 1.442695, %v2029_v45 }
 0x65b   : > { %4004 = vpow2.f32 %v2046_v9  ;;  %v5336_v9 = vpop.permute.xlu1 %2374 }
 0x65e   : > { %v2006_v58 = vpop.xlane.xlu2 %2005 }
 0x661   : > { %v5322_v46 = vpop.eup %4004 }
 0x662   : > { %v2079_v4 = vsel %vm811_vm2, %v5322_v46, 0.0 }
 0x663   : > { %2080 = vadd.xlane.f32.xlu0 %v2079_v4  ;;  %v1982_v54 = vpop.xlane.xlu1 %1981 }
 0x664   : > { %v2028_v4 = vsub.f32 %v5216_v53, %v1982_v54 }
 0x666   : > { %v2044_v22 = vmul.f32 1.442695, %v2028_v4 }
 0x66b   : > { %2327 = vrot.lane.b32.xlu2 %v4598_v32, %s4359_s16 }
 0x66c   : > { %2252 = vrot.lane.b32.xlu1 %v4594_v25, %s4359_s16 }
 0x673   : > { %2398 = vrot.lane.b32.xlu2 %v4590_v16, %s4360_s11 }
 0x67b   : > { %2422 = vrot.lane.b32.xlu2 %v4586_v8, %s4360_s11 }
 0x683   : > { %2396 = vrot.lane.b32.xlu2 %v4590_v16, %s4361_s9 }
 0x68b   : > { %2352 = vrot.lane.b32.xlu2 %v4609_v49, %s4359_s16 }
 0x691   : > { %v1988_v50 = vpop.xlane.xlu0 %1987 }
 0x699   : > { %v1991_v27 = vpop.xlane.xlu1 %1990 }
 0x69a   : > { %v2031_v61 = vsub.f32 %v5252_v59, %v1991_v27  ;;  %v2030_v59 = vsub.f32 %v5243_v36, %v1988_v50 }
 0x69c   : > { %v2050_v51 = vmul.f32 1.442695, %v2031_v61 }
 0x69e   : > { %4006 = vpow2.f32 %v2050_v51 }
 0x6a1   : > { %v2012_v45 = vpop.xlane.xlu0 %2011 }
 0x6a2   : > { %v2038_v56 = vsub.f32 %v5263_v43, %v2012_v45 }
 0x6a4   : > { %v5345_v44 = vpop.eup %4006  ;;  %v2064_v33 = vmul.f32 1.442695, %v2038_v56  ;;  %v2048_v56 = vmul.f32 1.442695, %v2030_v59 }
 0x6a5   : > { %v2085_v41 = vsel %vm811_vm2, %v5345_v44, 0.0 }
 0x6a6   : > { %4008 = vpow2.f32 %v2064_v33  ;;  %2086 = vadd.xlane.f32.xlu0 %v2085_v41  ;;  %v2000_v54 = vpop.xlane.xlu2 %1999  ;;  %v2036_v41 = vsub.f32 %v5228_v10, %v2006_v58 }
 0x6a7   : > { %4010 = vpow2.f32 %v2044_v22 }
 0x6a9   : > { %v2009_v0 = vpop.xlane.xlu0 %2008 }
 0x6aa   : > { %v2037_v27 = vsub.f32 %v5275_v2, %v2009_v0  ;;  %v2060_v2 = vmul.f32 1.442695, %v2036_v41 }
 0x6ac   : > { %v5351_v61 = vpop.eup %4008  ;;  %v2062_v53 = vmul.f32 1.442695, %v2037_v27 }
 0x6ad   : > { %v2106_v43 = vsel %vm811_vm2, %v5351_v61, 0.0  ;;  %v5355_v45 = vpop.eup %4010 }
 0x6ae   : > { %4012 = vpow2.f32 %v2062_v53  ;;  %2107 = vadd.xlane.f32.xlu0 %v2106_v43  ;;  %v1994_v51 = vpop.xlane.xlu1 %1993  ;;  %v2076_v22 = vsel %vm811_vm2, %v5355_v45, 0.0 }
 0x6af   : > { %4014 = vpow2.f32 %v2048_v56  ;;  %v2032_v56 = vsub.f32 %v5282_v24, %v1994_v51 }
 0x6b0   : > { %4016 = vpow2.f32 %v2060_v2  ;;  %v2034_v2 = vsub.f32 %v5272_v37, %v2000_v54 }
 0x6b1   : > { %v2003_v0 = vpop.xlane.xlu0 %2002 }
 0x6b2   : > { %v2035_v10 = vsub.f32 %v5285_v38, %v2003_v0 }
 0x6b4   : > { %v5360_v33 = vpop.eup %4012  ;;  %2077 = vadd.xlane.f32.xlu2 %v2076_v22  ;;  %v2058_v22 = vmul.f32 1.442695, %v2035_v10  ;;  %v2056_v10 = vmul.f32 1.442695, %v2034_v2 }
 0x6b5   : > { %v2103_v36 = vsel %vm811_vm2, %v5360_v33, 0.0  ;;  %v5366_v58 = vpop.eup %4014 }
 0x6b6   : > { %v1997_v50 = vpop.xlane.xlu2 %1996  ;;  %2104 = vadd.xlane.f32.xlu0 %v2103_v36  ;;  %v2015_v4 = vpop.xlane.xlu1 %2014  ;;  %v2082_v41 = vsel %vm811_vm2, %v5366_v58, 0.0  ;;  %v2052_v36 = vmul.f32 1.442695, %v2032_v56 }
 0x6b7   : > { %v2033_v59 = vsub.f32 %v5295_v17, %v1997_v50  ;;  %v2039_v27 = vsub.f32 %v5292_v13, %v2015_v4  ;;  %v5373_v4 = vpop.eup %4016 }
 0x6b9   : > { %v2054_v53 = vmul.f32 1.442695, %v2033_v59  ;;  %v2066_v43 = vmul.f32 1.442695, %v2039_v27  ;;  %v2024_v17 = vpop.xlane.xlu0 %2023  ;;  %v2100_v27 = vsel %vm811_vm2, %v5373_v4, 0.0 }
 0x6ba   : > { %v2042_v0 = vsub.f32 %v5298_v57, %v2024_v17 }
 0x6bb   : > { %4018 = vpow2.f32 %v2054_v53 }
 0x6bc   : > { %4020 = vpow2.f32 %v2066_v43  ;;  %2083 = vadd.xlane.f32.xlu2 %v2082_v41  ;;  %v2072_v57 = vmul.f32 1.442695, %v2042_v0 }
 0x6bd   : > { %4022 = vpow2.f32 %v2058_v22 }
 0x6be   : > { %v2018_v50 = vpop.xlane.xlu1 %2017  ;;  %4024 = vpow2.f32 %v2052_v36 }
 0x6bf   : > { %v2040_v13 = vsub.f32 %v5307_v39, %v2018_v50 }
 0x6c1   : > { %v5375_v38 = vpop.eup %4018  ;;  %v2068_v24 = vmul.f32 1.442695, %v2040_v13 }
 0x6c2   : > { %v5378_v51 = vpop.eup %4020  ;;  %v2091_v59 = vsel %vm811_vm2, %v5375_v38, 0.0 }
 0x6c3   : > { %4026 = vpow2.f32 %v2068_v24  ;;  %2092 = vadd.xlane.f32.xlu0 %v2091_v59  ;;  %v2109_v39 = vsel %vm811_vm2, %v5378_v51, 0.0  ;;  %v5387_v43 = vpop.eup %4022 }
 0x6c4   : > { %2110 = vadd.xlane.f32.xlu1 %v2109_v39  ;;  %2101 = vadd.xlane.f32.xlu2 %v2100_v27  ;;  %v5390_v56 = vpop.eup %4024  ;;  %4028 = vpow2.f32 %v2072_v57  ;;  %v2097_v17 = vsel %vm811_vm2, %v5387_v43, 0.0 }
 0x6c5   : > { %4030 = vpow2.f32 %v2056_v10 }
 0x6c6   : > { %v2021_v53 = vpop.xlane.xlu2 %2020  ;;  %v2027_v54 = vpop.xlane.xlu1 %2026 }
 0x6c7   : > { %v2041_v37 = vsub.f32 %v5315_v11, %v2021_v53  ;;  %v2043_v36 = vsub.f32 %v5312_v31, %v2027_v54  ;;  %v2088_v11 = vsel %vm811_vm2, %v5390_v56, 0.0 }
 0x6c9   : > { %v5392_v41 = vpop.eup %4026  ;;  %v2070_v22 = vmul.f32 1.442695, %v2041_v37  ;;  %v2074_v13 = vmul.f32 1.442695, %v2043_v36 }
 0x6ca   : > { %v2112_v50 = vsel %vm811_vm2, %v5392_v41, 0.0  ;;  %v5401_v24 = vpop.eup %4028 }
 0x6cb   : > { %4032 = vpow2.f32 %v2070_v22  ;;  %2098 = vadd.xlane.f32.xlu0 %v2097_v17  ;;  %v5403_v2 = vpop.eup %4030  ;;  %v2118_v59 = vsel %vm811_vm2, %v5401_v24, 0.0 }
 0x6cc   : > { %2113 = vadd.xlane.f32.xlu1 %v2112_v50  ;;  %2089 = vadd.xlane.f32.xlu2 %v2088_v11  ;;  %4034 = vpow2.f32 %v2074_v13  ;;  %v2094_v27 = vsel %vm811_vm2, %v5403_v2, 0.0 }
 0x6ce   : > { %v2328_v0 = vpop.permute.xlu2 %2327 }
 0x6cf   : > { %2340 = vmatpush.bf16.msra.mxu2 %v2328_v0 }
 0x6d1   : > { %v5405_v31 = vpop.eup %4032 }
 0x6d2   : > { %v2115_v39 = vsel %vm811_vm2, %v5405_v31, 0.0  ;;  %v5415_v10 = vpop.eup %4034 }
 0x6d3   : > { %2119 = vadd.xlane.f32.xlu0 %v2118_v59  ;;  %v2121_v53 = vsel %vm811_vm2, %v5415_v10, 0.0 }
 0x6d4   : > { %2116 = vadd.xlane.f32.xlu1 %v2115_v39  ;;  %2095 = vadd.xlane.f32.xlu2 %v2094_v27 }
 0x6d6   : > { %v5413_v57 = vpop.permute.xlu2 %2398  ;;  %v2081_v17 = vpop.xlane.xlu0 %2080 }
 0x6d7   : > { %4036 = vrcp.f32 %v2081_v17 }
 0x6dc   : > { %2122 = vadd.xlane.f32.xlu1 %v2121_v53 }
 0x6dd   : > { %v4037_v0 = vpop.eup %4036 }
 0x6de   : > { %v5419_v37 = vpop.permute.xlu2 %2422  ;;  %v2253_v54 = vpop.permute.xlu1 %2252  ;;  %v2141_v59 = vmul.f32 %v4037_v0, %v5322_v46  ;;  %v2380_v46 = vsel %vm601_vm1, %v5336_v9, 0 }
 0x6df   : > { %2265 = vmatpush.bf16.msrb.mxu3 %v2253_v54 }
 0x6e0   : > { %v2157_v27 = vpack.c.bf16 %v2141_v59, %v2141_v59 }
 0x6e2   : > { %v2175_v34 = vunpack.c.l.b16 %v2157_v27 }
 0x6e6   : > { %v5421_v22 = vpop.permute.xlu2 %2396 }
 0x6e7   : > { %2446 = vrot.lane.b32.xlu0 %v4594_v25, %s4360_s11 }
 0x6ec   : > { %2420 = vrot.lane.b32.xlu2 %v4586_v8, %s4361_s9 }
 0x6ee   : > { %v2353_v36 = vpop.permute.xlu2 %2352 }
 0x6ef   : > { %2518 = vrot.lane.b32.xlu0 %v4598_v32, %s4360_s11  ;;  %2365 = vmatpush.bf16.msra.mxu3 %v2353_v36 }
 0x6f4   : > { %2470 = vrot.lane.b32.xlu2 %v4607_v48, %s4360_s11 }
 0x6f5   : > { %2444 = vrot.lane.b32.xlu1 %v4594_v25, %s4361_s9 }
 0x6f7   : > { %2516 = vrot.lane.b32.xlu0 %v4598_v32, %s4361_s9 }
 0x6fc   : > { %2468 = vrot.lane.b32.xlu2 %v4607_v48, %s4361_s9 }
 0x6fd   : > { %2542 = vrot.lane.b32.xlu1 %v4609_v49, %s4360_s11 }
 0x6ff   : > { %2761 = vrot.lane.b32.xlu0 %v4582_v1, %s4362_s7 }
 0x704   : > { %2494 = vrot.lane.b32.xlu2 %v4602_v40, %s4360_s11  ;;  %s4268_s11 = scalar_lea.hbm %s4267_s15, 128 }
 0x705   : > { %p4269_p1 = scmp.ne.s32.totalorder %s4267_s15, %s4268_s11 }
 0x707   : > { %p4270_p4 = pnand %p4269_p1, %p4492_p0 }
 0x709   : > { %p4271_p8 = pneg %p4270_p4 }
 0x70c   : > { %2492 = vrot.lane.b32.xlu2 %v4602_v40, %s4361_s9 }
 0x714   : > { %2540 = vrot.lane.b32.xlu2 %v4609_v49, %s4361_s9 }
 0x719   : > { %v2087_v50 = vpop.xlane.xlu0 %2086 }
 0x721   : > { %v2108_v11 = vpop.xlane.xlu0 %2107 }
 0x727   : > { %v2078_v13 = vpop.xlane.xlu2 %2077 }
 0x728   : > { %4038 = vrcp.f32 %v2078_v13 }
 0x729   : > { %4040 = vrcp.f32 %v2087_v50  ;;  %v2105_v39 = vpop.xlane.xlu0 %2104 }
 0x72e   : > { %v4039_v1 = vpop.eup %4038 }
 0x72f   : > { %v2140_v53 = vmul.f32 %v4039_v1, %v5355_v45  ;;  %v2084_v54 = vpop.xlane.xlu2 %2083  ;;  %v4041_v36 = vpop.eup %4040 }
 0x730   : > { %4042 = vrcp.f32 %v2084_v54  ;;  %v2143_v35 = vmul.f32 %v4041_v36, %v5345_v44 }
 0x731   : > { %v2156_v6 = vpack.c.bf16 %v2140_v53, %v2140_v53  ;;  %4044 = vrcp.f32 %v2105_v39 }
 0x732   : > { %v2159_v50 = vpack.c.bf16 %v2143_v35, %v2143_v35 }
 0x733   : > { %v2174_v17 = vunpack.c.l.b16 %v2156_v6 }
 0x734   : > { %v2200_v6 = vunpack.c.l.b16 %v2159_v50 }
 0x735   : > { %v2176_v5 = vpack.c.b16 %v2175_v34, %v2174_v17 }
 0x736   : > { %v4043_v7 = vpop.eup %4042  ;;  %v2093_v13 = vpop.xlane.xlu0 %2092 }
 0x737   : > { %v2142_v0 = vmul.f32 %v4043_v7, %v5366_v58  ;;  %v2111_v59 = vpop.xlane.xlu1 %2110  ;;  %3587 = vmatmul.msk.bf16.vlgmr.msrb.gmra.mxu0 %vm811_vm2, %v2176_v5  ;;  %v2102_v45 = vpop.xlane.xlu2 %2101  ;;  %v2404_v7 = vsel %vm601_vm1, %v5413_v57, 0 }
 0x738   : > { %4046 = vrcp.f32 %v2111_v59  ;;  %2389 = vmatpush.bf16.xpose.msrb.mxu0 %v2380_v46  ;;  %v4045_v1 = vpop.eup %4044 }
 0x739   : > { %v2158_v27 = vpack.c.bf16 %v2142_v0, %v2142_v0  ;;  %4048 = vrcp.f32 %v2102_v45  ;;  %v2149_v44 = vmul.f32 %v4045_v1, %v5360_v33 }
 0x73a   : > { %4050 = vrcp.f32 %v2108_v11 }
 0x73b   : > { %v2199_v34 = vunpack.c.l.b16 %v2158_v27  ;;  %4052 = vrcp.f32 %v2093_v13  ;;  %v2165_v54 = vpack.c.bf16 %v2149_v44, %v2149_v44 }
 0x73d   : > { %v2201_v39 = vpack.c.b16 %v2200_v6, %v2199_v34  ;;  %v2275_v50 = vunpack.c.l.b16 %v2165_v54 }
 0x73e   : > { %v4047_v9 = vpop.eup %4046  ;;  %v2099_v11 = vpop.xlane.xlu0 %2098 }
 0x73f   : > { %v4049_v35 = vpop.eup %4048  ;;  %v2114_v58 = vpop.xlane.xlu1 %2113  ;;  %3588 = vmatmul.msk.bf16.vlgmr.msrb.gmra.mxu1 %vm811_vm2, %v2201_v39  ;;  %v2151_v13 = vmul.f32 %v4047_v9, %v5378_v51 }
 0x740   : > { %v2090_v5 = vpop.xlane.xlu2 %2089  ;;  %v4051_v53 = vpop.eup %4050  ;;  %v2148_v36 = vmul.f32 %v4049_v35, %v5373_v4  ;;  %2413 = vmatpush.bf16.xpose.msrb.mxu1 %v2404_v7 }
 0x741   : > { %v4053_v17 = vpop.eup %4052  ;;  %4054 = vrcp.f32 %v2090_v5  ;;  %v2150_v46 = vmul.f32 %v4051_v53, %v5351_v61  ;;  %v2167_v59 = vpack.c.bf16 %v2151_v13, %v2151_v13 }
 0x742   : > { %v2164_v33 = vpack.c.bf16 %v2148_v36, %v2148_v36  ;;  %4056 = vrcp.f32 %v2099_v11  ;;  %v2145_v57 = vmul.f32 %v4053_v17, %v5375_v38 }
 0x743   : > { %v2166_v27 = vpack.c.bf16 %v2150_v46, %v2150_v46  ;;  %v2300_v39 = vunpack.c.l.b16 %v2167_v59 }
 0x744   : > { %v2274_v0 = vunpack.c.l.b16 %v2164_v33  ;;  %v2161_v34 = vpack.c.bf16 %v2145_v57, %v2145_v57 }
 0x745   : > { %v2299_v9 = vunpack.c.l.b16 %v2166_v27 }
 0x746   : > { %v2276_v45 = vpack.c.b16 %v2275_v50, %v2274_v0  ;;  %v2225_v38 = vunpack.c.l.b16 %v2161_v34  ;;  %v2120_v33 = vpop.xlane.xlu0 %2119 }
 0x747   : > { %v4055_v1 = vpop.eup %4054  ;;  %v2117_v6 = vpop.xlane.xlu1 %2116  ;;  %v2301_v5 = vpack.c.b16 %v2300_v39, %v2299_v9 }
 0x748   : > { %v2096_v4 = vpop.xlane.xlu2 %2095  ;;  %v2144_v44 = vmul.f32 %v4055_v1, %v5390_v56  ;;  %4058 = vrcp.f32 %v2117_v6  ;;  %3591 = vmatmul.msk.bf16.vlgmr.msra.gmra.mxu0 %vm811_vm2, %v2276_v45  ;;  %v4057_v51 = vpop.eup %4056  ;;  %v2428_v56 = vsel %vm601_vm1, %v5419_v37, 0 }
 0x749   : > { %4060 = vrcp.f32 %v2096_v4  ;;  %v2147_v35 = vmul.f32 %v4057_v51, %v5387_v43 }
 0x74a   : > { %v2160_v61 = vpack.c.bf16 %v2144_v44, %v2144_v44  ;;  %4062 = vrcp.f32 %v2114_v58 }
 0x74b   : > { %v2163_v13 = vpack.c.bf16 %v2147_v35, %v2147_v35 }
 0x74c   : > { %v2224_v7 = vunpack.c.l.b16 %v2160_v61 }
 0x74d   : > { %v2250_v57 = vunpack.c.l.b16 %v2163_v13 }
 0x74e   : > { %v4059_v53 = vpop.eup %4058  ;;  %v2226_v54 = vpack.c.b16 %v2225_v38, %v2224_v7 }
 0x74f   : > { %v4061_v36 = vpop.eup %4060  ;;  %v2123_v11 = vpop.xlane.xlu1 %2122  ;;  %3592 = vmatmul.msk.bf16.vlgmr.msra.gmra.mxu1 %vm811_vm2, %v2301_v5  ;;  %v2153_v43 = vmul.f32 %v4059_v53, %v5405_v31 }
 0x750   : > { %v2421_v17 = vpop.permute.xlu2 %2420  ;;  %v2146_v46 = vmul.f32 %v4061_v36, %v5403_v2  ;;  %3589 = vmatmul.msk.bf16.vlgmr.msrb.gmra.mxu2 %vm811_vm2, %v2226_v54  ;;  %v4063_v58 = vpop.eup %4062  ;;  %4064 = vrcp.f32 %v2123_v11 }
 0x751   : > { %2437 = vmatpush.bf16.xpose.msrb.mxu2 %v2428_v56  ;;  %4066 = vrcp.f32 %v2120_v33  ;;  %v2152_v0 = vmul.f32 %v4063_v58, %v5392_v41  ;;  %v2169_v45 = vpack.c.bf16 %v2153_v43, %v2153_v43 }
 0x752   : > { %v2162_v50 = vpack.c.bf16 %v2146_v46, %v2146_v46 }
 0x753   : > { %v2168_v6 = vpack.c.bf16 %v2152_v0, %v2152_v0  ;;  %v2325_v34 = vunpack.c.l.b16 %v2169_v45 }
 0x754   : > { %v2249_v59 = vunpack.c.l.b16 %v2162_v50 }
 0x755   : > { %v2324_v51 = vunpack.c.l.b16 %v2168_v6 }
 0x756   : > { %v2251_v1 = vpack.c.b16 %v2250_v57, %v2249_v59  ;;  %v4065_v37 = vpop.eup %4064 }
 0x757   : > { %v4067_v4 = vpop.eup %4066  ;;  %v2155_v44 = vmul.f32 %v4065_v37, %v5415_v10  ;;  %v2326_v61 = vpack.c.b16 %v2325_v34, %v2324_v51  ;;  %v5510_v37 = vld [vmem:[#allocation8 + $0x30] sm:$0xff] }
 0x758   : > { %v2471_v27 = vpop.permute.xlu2 %2470  ;;  %3595 = vmatmul.msk.bf16.vlgmr.msrb.gmra.mxu0 %vm601_vm1, %v5340_v52  ;;  %3590 = vmatmul.msk.bf16.vlgmr.msrb.gmra.mxu3 %vm811_vm2, %v2251_v1  ;;  %v2154_v39 = vmul.f32 %v4067_v4, %v5401_v24 }
 0x759   : > { %v2476_v2 = vsel %vm601_vm1, %v2471_v27, 0  ;;  %v2447_v31 = vpop.permute.xlu0 %2446  ;;  %v2171_v9 = vpack.c.bf16 %v2155_v44, %v2155_v44 }
 0x75a   : > { %2485 = vmatpush.bf16.xpose.msra.mxu0 %v2476_v2  ;;  %v2452_v41 = vsel %vm601_vm1, %v2447_v31, 0  ;;  %v2170_v52 = vpack.c.bf16 %v2154_v39, %v2154_v39 }
 0x75b   : > { %2461 = vmatpush.bf16.xpose.msrb.mxu3 %v2452_v41  ;;  %v2350_v7 = vunpack.c.l.b16 %v2171_v9  ;;  %v5525_v41 = vld [vmem:[#allocation8 + $0x38] sm:$0xff] }
 0x75c   : > { %v2349_v10 = vunpack.c.l.b16 %v2170_v52 }
 0x75e   : > { %v2351_v53 = vpack.c.b16 %v2350_v7, %v2349_v10 }
 0x75f   : > { %3596 = vmatmul.msk.bf16.vlgmr.msrb.gmra.mxu1 %vm601_vm1, %v5421_v22 }
 0x760   : > { %v2469_v38 = vpop.permute.xlu2 %2468  ;;  %3593 = vmatmul.msk.bf16.vlgmr.msra.gmra.mxu2 %vm811_vm2, %v2326_v61 }
 0x761   : > { %v2519_v35 = vpop.permute.xlu0 %2518 }
 0x762   : > { %v2524_v5 = vsel %vm601_vm1, %v2519_v35, 0 }
 0x763   : > { %2533 = vmatpush.bf16.xpose.msra.mxu2 %v2524_v5 }
 0x767   : > { %v2445_v54 = vpop.permute.xlu1 %2444 }
 0x768   : > { %v2495_v36 = vpop.permute.xlu2 %2494  ;;  %3599 = vmatmul.msk.bf16.vlgmr.msra.gmra.mxu0 %vm601_vm1, %v2469_v38  ;;  %3594 = vmatmul.msk.bf16.vlgmr.msra.gmra.mxu3 %vm811_vm2, %v2351_v53 }
 0x769   : > { %v2500_v24 = vsel %vm601_vm1, %v2495_v36, 0  ;;  %v2517_v11 = vpop.permute.xlu0 %2516 }
 0x76a   : > { %2509 = vmatpush.bf16.xpose.msra.mxu1 %v2500_v24 }
 0x76f   : > { %v2543_v22 = vpop.permute.xlu1 %2542 }
 0x770   : > { %v2493_v56 = vpop.permute.xlu2 %2492  ;;  %v2548_v13 = vsel %vm601_vm1, %v2543_v22, 0  ;;  %3597 = vmatmul.msk.bf16.vlgmr.msrb.gmra.mxu2 %vm601_vm1, %v2421_v17 }
 0x771   : > { %3600 = vmatmul.msk.bf16.vlgmr.msra.gmra.mxu1 %vm601_vm1, %v2493_v56  ;;  %2557 = vmatpush.bf16.xpose.msra.mxu3 %v2548_v13  ;;  %v2762_v33 = vpop.permute.xlu0 %2761 }
 0x772   : > { %2774 = vmatpush.bf16.msrb.mxu0 %v2762_v33 }
 0x778   : > { %3598 = vmatmul.msk.bf16.vlgmr.msrb.gmra.mxu3 %vm601_vm1, %v2445_v54  ;;  %v2541_v46 = vpop.permute.xlu2 %2540 }
 0x780   : > { %3601 = vmatmul.msk.bf16.vlgmr.msra.gmra.mxu2 %vm601_vm1, %v2517_v11 }
 0x788   : > { %3602 = vmatmul.msk.bf16.vlgmr.msra.gmra.mxu3 %vm601_vm1, %v2541_v46 }
 0x7b4   : > { %v5492_v58 = vpop.f32.mrf.mxu0 }
 0x7bc   : > { %v5494_v43 = vpop.f32.mrf.mxu0  ;;  %v5496_v50 = vpop.f32.mrf.mxu1 }
 0x7c4   : > { %v5498_v57 = vpop.f32.mrf.mxu1 }
 0x7c5   : > { %v5502_v0 = vpop.f32.mrf.mxu0 }
 0x7cc   : > { %v5504_v59 = vpop.f32.mrf.mxu1 }
 0x7cd   : > { %v5506_v45 = vpop.f32.mrf.mxu0 }
 0x7d3   : > { %v5508_v1 = vpop.f32.mrf.mxu2 }
 0x7d4   : > { %v5512_v27 = vpop.f32.mrf.mxu1 }
 0x7d5   : > { %v2391_v2 = vpop.f32.mrf.mxu0 }
 0x7d6   : > { %v5517_v4 = vadd.f32 %v2391_v2, %v5510_v37 }
 0x7d8   : > { %v2564_v31 = vsel %vm811_vm2, %v5517_v4, -inf }
 0x7d9   : > { %2565 = vmax.xlane.f32.xlu0 %v2564_v31 }
 0x7db   : > { %v5521_v34 = vpop.f32.mrf.mxu2  ;;  %v5523_v44 = vpop.f32.mrf.mxu3 }
 0x7dc   : > { %v2415_v39 = vpop.f32.mrf.mxu1 }
 0x7dd   : > { %v2393_v61 = vpop.f32.mrf.mxu0  ;;  %v5530_v9 = vadd.f32 %v2415_v39, %v5510_v37 }
 0x7de   : > { %v5533_v38 = vadd.f32 %v2393_v61, %v5525_v41 }
 0x7df   : > { %v2570_v52 = vsel %vm811_vm2, %v5530_v9, -inf }
 0x7e0   : > { %v2567_v35 = vsel %vm811_vm2, %v5533_v38, -inf  ;;  %2571 = vmax.xlane.f32.xlu2 %v2570_v52 }
 0x7e1   : > { %2568 = vmax.xlane.f32.xlu1 %v2567_v35 }
 0x7e3   : > { %v5539_v7 = vpop.f32.mrf.mxu3  ;;  %v5541_v5 = vpop.f32.mrf.mxu2 }
 0x7e4   : > { %v2417_v53 = vpop.f32.mrf.mxu1 }
 0x7e5   : > { %v5546_v54 = vadd.f32 %v2417_v53, %v5525_v41  ;;  %v2487_v36 = vpop.f32.mrf.mxu0 }
 0x7e6   : > { %v5549_v24 = vadd.f32 %v2487_v36, %v5510_v37 }
 0x7e7   : > { %v2573_v11 = vsel %vm811_vm2, %v5546_v54, -inf }
 0x7e8   : > { %v2588_v22 = vsel %vm811_vm2, %v5549_v24, -inf  ;;  %2574 = vmax.xlane.f32.xlu0 %v2573_v11 }
 0x7e9   : > { %2589 = vmax.xlane.f32.xlu1 %v2588_v22 }
 0x7eb   : > { %v5555_v56 = vpop.f32.mrf.mxu2  ;;  %v5557_v13 = vpop.f32.mrf.mxu3 }
 0x7ec   : > { %6045 = vst [vmem:[#allocation31_spill] sm:$0xff] %v5557_v13 }
 0x7ed   : > { %v2489_v46 = vpop.f32.mrf.mxu0 }
 0x7ee   : > { %v2511_v2 = vpop.f32.mrf.mxu1  ;;  %v5562_v31 = vadd.f32 %v2489_v46, %v5525_v41 }
 0x7ef   : > { %v5565_v39 = vadd.f32 %v2511_v2, %v5510_v37 }
 0x7f0   : > { %v2591_v61 = vsel %vm811_vm2, %v5562_v31, -inf }
 0x7f1   : > { %v2594_v52 = vsel %vm811_vm2, %v5565_v39, -inf  ;;  %2592 = vmax.xlane.f32.xlu2 %v2591_v61 }
 0x7f2   : > { %2595 = vmax.xlane.f32.xlu1 %v2594_v52 }
 0x7f3   : > { %v5571_v35 = vpop.f32.mrf.mxu3  ;;  %v2439_v53 = vpop.f32.mrf.mxu2 }
 0x7f4   : > { %6046 = vst [vmem:[#allocation32_spill] sm:$0xff] %v5571_v35  ;;  %v5576_v11 = vadd.f32 %v2439_v53, %v5510_v37 }
 0x7f6   : > { %v2576_v22 = vsel %vm811_vm2, %v5576_v11, -inf  ;;  %v2513_v53 = vpop.f32.mrf.mxu1 }
 0x7f7   : > { %v5591_v6 = vadd.f32 %v2513_v53, %v5525_v41 }
 0x7fa   : > { %2577 = vmax.xlane.f32.xlu1 %v2576_v22 }
 0x7fb   : > { %v2441_v46 = vpop.f32.mrf.mxu2  ;;  %v2463_v2 = vpop.f32.mrf.mxu3 }
 0x7fc   : > { %v5581_v33 = vadd.f32 %v2441_v46, %v5525_v41  ;;  %v5584_v61 = vadd.f32 %v2463_v2, %v5510_v37  ;;  %v2597_v2 = vsel %vm811_vm2, %v5591_v6, -inf }
 0x7fe   : > { %v2579_v52 = vsel %vm811_vm2, %v5581_v33, -inf  ;;  %v2582_v36 = vsel %vm811_vm2, %v5584_v61, -inf }
 0x7ff   : > { %2580 = vmax.xlane.f32.xlu2 %v2579_v52  ;;  %2583 = vmax.xlane.f32.xlu0 %v2582_v36 }
 0x803   : > { %v2465_v22 = vpop.f32.mrf.mxu3  ;;  %v2535_v36 = vpop.f32.mrf.mxu2 }
 0x804   : > { %v5594_v10 = vadd.f32 %v2465_v22, %v5525_v41  ;;  %v5605_v52 = vadd.f32 %v2535_v36, %v5510_v37 }
 0x806   : > { %v2585_v46 = vsel %vm811_vm2, %v5594_v10, -inf  ;;  %v2600_v53 = vsel %vm811_vm2, %v5605_v52, -inf }
 0x807   : > { %2586 = vmax.xlane.f32.xlu1 %v2585_v46  ;;  %2598 = vmax.xlane.f32.xlu0 %v2597_v2 }
 0x80b   : > { %v2537_v22 = vpop.f32.mrf.mxu2  ;;  %v2559_v13 = vpop.f32.mrf.mxu3 }
 0x80c   : > { %v5610_v17 = vadd.f32 %v2537_v22, %v5525_v41 }
 0x817   : > { %2786 = vrot.lane.b32.xlu2 %v4590_v16, %s4362_s7 }
 0x820   : > { %2811 = vrot.lane.b32.xlu1 %v4586_v8, %s4362_s7  ;;  %v2603_v8 = vsel %vm811_vm2, %v5610_v17, -inf }
 0x84a   : > { %2601 = vmax.xlane.f32.xlu1 %v2600_v53 }
 0x84c   : > { %v2566_v51 = vpop.xlane.xlu0 %2565 }
 0x84d   : > { %v2612_v46 = vsub.f32 %v5517_v4, %v2566_v51 }
 0x84f   : > { %v2628_v2 = vmul.f32 1.442695, %v2612_v46 }
 0x851   : > { %4068 = vpow2.f32 %v2628_v2 }
 0x852   : > { %2604 = vmax.xlane.f32.xlu1 %v2603_v8 }
 0x853   : > { %v2572_v16 = vpop.xlane.xlu2 %2571 }
 0x854   : > { %v2614_v36 = vsub.f32 %v5530_v9, %v2572_v16  ;;  %v2569_v23 = vpop.xlane.xlu1 %2568  ;;  %v2561_v16 = vpop.f32.mrf.mxu3 }
 0x855   : > { %v2613_v29 = vsub.f32 %v5533_v38, %v2569_v23 }
 0x856   : > { %v2632_v42 = vmul.f32 1.442695, %v2614_v36 }
 0x857   : > { %v5617_v53 = vpop.eup %4068  ;;  %v2630_v22 = vmul.f32 1.442695, %v2613_v29 }
 0x858   : > { %4070 = vpow2.f32 %v2632_v42  ;;  %v2660_v4 = vsel %vm811_vm2, %v5617_v53, 0.0 }
 0x859   : > { %4072 = vpow2.f32 %v2630_v22  ;;  %2661 = vadd.xlane.f32.xlu2 %v2660_v4 }
 0x85b   : > { %v2575_v51 = vpop.xlane.xlu0 %2574 }
 0x85c   : > { %v2615_v46 = vsub.f32 %v5546_v54, %v2575_v51  ;;  %v2590_v2 = vpop.xlane.xlu1 %2589  ;;  %v5632_v54 = vadd.f32 %v2561_v16, %v5525_v41 }
 0x85d   : > { %v2620_v23 = vsub.f32 %v5549_v24, %v2590_v2 }
 0x85e   : > { %v5622_v8 = vpop.eup %4070  ;;  %v2634_v9 = vmul.f32 1.442695, %v2615_v46  ;;  %v2609_v2 = vsel %vm811_vm2, %v5632_v54, -inf }
 0x85f   : > { %v5625_v38 = vpop.eup %4072  ;;  %v2666_v29 = vsel %vm811_vm2, %v5622_v8, 0.0  ;;  %v2644_v36 = vmul.f32 1.442695, %v2620_v23 }
 0x860   : > { %4074 = vpow2.f32 %v2634_v9  ;;  %2667 = vadd.xlane.f32.xlu1 %v2666_v29  ;;  %v2663_v42 = vsel %vm811_vm2, %v5625_v38, 0.0 }
 0x861   : > { %2664 = vadd.xlane.f32.xlu0 %v2663_v42  ;;  %4076 = vpow2.f32 %v2644_v36 }
 0x864   : > { %v2593_v22 = vpop.xlane.xlu2 %2592 }
 0x865   : > { %v2596_v4 = vpop.xlane.xlu1 %2595  ;;  %v2621_v24 = vsub.f32 %v5562_v31, %v2593_v22 }
 0x866   : > { %v5634_v51 = vpop.eup %4074 }
 0x867   : > { %v2669_v46 = vsel %vm811_vm2, %v5634_v51, 0.0  ;;  %v2646_v9 = vmul.f32 1.442695, %v2621_v24  ;;  %v5641_v23 = vpop.eup %4076 }
 0x868   : > { %2670 = vadd.xlane.f32.xlu2 %v2669_v46  ;;  %v2684_v16 = vsel %vm811_vm2, %v5641_v23, 0.0 }
 0x869   : > { %2610 = vmax.xlane.f32.xlu0 %v2609_v2  ;;  %4078 = vpow2.f32 %v2646_v9 }
 0x86d   : > { %v2578_v41 = vpop.xlane.xlu1 %2577 }
 0x86e   : > { %v2616_v29 = vsub.f32 %v5576_v11, %v2578_v41 }
 0x86f   : > { %v5647_v46 = vpop.eup %4078 }
 0x870   : > { %v2636_v42 = vmul.f32 1.442695, %v2616_v29  ;;  %2685 = vadd.xlane.f32.xlu2 %v2684_v16  ;;  %v2687_v11 = vsel %vm811_vm2, %v5647_v46, 0.0 }
 0x872   : > { %4080 = vpow2.f32 %v2636_v42  ;;  %v2581_v31 = vpop.xlane.xlu2 %2580  ;;  %v2584_v36 = vpop.xlane.xlu0 %2583  ;;  %v2622_v42 = vsub.f32 %v5565_v39, %v2596_v4 }
 0x873   : > { %v2618_v22 = vsub.f32 %v5584_v61, %v2584_v36  ;;  %v2617_v24 = vsub.f32 %v5581_v33, %v2581_v31  ;;  %v5657_v61 = vadd.f32 %v2559_v13, %v5510_v37 }
 0x874   : > { %v2648_v36 = vmul.f32 1.442695, %v2622_v42 }
 0x875   : > { %v2640_v2 = vmul.f32 1.442695, %v2618_v22  ;;  %v2638_v41 = vmul.f32 1.442695, %v2617_v24  ;;  %v2606_v31 = vsel %vm811_vm2, %v5657_v61, -inf }
 0x877   : > { %4082 = vpow2.f32 %v2640_v2 }
 0x878   : > { %v5650_v35 = vpop.eup %4080  ;;  %2688 = vadd.xlane.f32.xlu2 %v2687_v11  ;;  %4084 = vpow2.f32 %v2638_v41 }
 0x879   : > { %v2672_v9 = vsel %vm811_vm2, %v5650_v35, 0.0  ;;  %4086 = vpow2.f32 %v2648_v36 }
 0x87a   : > { %2673 = vadd.xlane.f32.xlu1 %v2672_v9  ;;  %v2787_v29 = vpop.permute.xlu2 %2786  ;;  %v2587_v37 = vpop.xlane.xlu1 %2586 }
 0x87b   : > { %2799 = vmatpush.bf16.msrb.mxu1 %v2787_v29  ;;  %v2619_v2 = vsub.f32 %v5594_v10, %v2587_v37  ;;  %v2599_v37 = vpop.xlane.xlu0 %2598 }
 0x87d   : > { %2836 = vrot.lane.b32.xlu0 %v4594_v25, %s4362_s7  ;;  %v5661_v33 = vpop.eup %4082  ;;  %v2642_v24 = vmul.f32 1.442695, %v2619_v2 }
 0x87e   : > { %v2678_v16 = vsel %vm811_vm2, %v5661_v33, 0.0  ;;  %v5668_v22 = vpop.eup %4084 }
 0x87f   : > { %v2675_v25 = vsel %vm811_vm2, %v5668_v22, 0.0  ;;  %v5672_v13 = vpop.eup %4086  ;;  %4088 = vpow2.f32 %v2642_v24 }
 0x880   : > { %2679 = vadd.xlane.f32.xlu2 %v2678_v16  ;;  %v2690_v39 = vsel %vm811_vm2, %v5672_v13, 0.0 }
 0x882   : > { %2607 = vmax.xlane.f32.xlu1 %v2606_v31 }
 0x885   : > { %v5677_v11 = vpop.eup %4088 }
 0x886   : > { %v2681_v9 = vsel %vm811_vm2, %v5677_v11, 0.0 }
 0x888   : > { %2676 = vadd.xlane.f32.xlu2 %v2675_v25 }
 0x890   : > { %2691 = vadd.xlane.f32.xlu2 %v2690_v39 }
 0x892   : > { %v2812_v4 = vpop.permute.xlu1 %2811 }
 0x893   : > { %2824 = vmatpush.bf16.msrb.mxu2 %v2812_v4  ;;  %v2623_v4 = vsub.f32 %v5591_v6, %v2599_v37 }
 0x8a7   : > { %2682 = vadd.xlane.f32.xlu0 %v2681_v9  ;;  %v2650_v9 = vmul.f32 1.442695, %v2623_v4 }
 0x8bb   : > { %2861 = vrot.lane.b32.xlu0 %v4607_v48, %s4362_s7 }
 0x8bd   : > { %v2602_v41 = vpop.xlane.xlu1 %2601 }
 0x8be   : > { %v2624_v29 = vsub.f32 %v5605_v52, %v2602_v41 }
 0x8c0   : > { %v2652_v42 = vmul.f32 1.442695, %v2624_v29 }
 0x8c2   : > { %4090 = vpow2.f32 %v2652_v42 }
 0x8c5   : > { %v2605_v16 = vpop.xlane.xlu1 %2604 }
 0x8c6   : > { %v2625_v31 = vsub.f32 %v5610_v17, %v2605_v16 }
 0x8c8   : > { %v5685_v10 = vpop.eup %4090  ;;  %v2654_v36 = vmul.f32 1.442695, %v2625_v31 }
 0x8c9   : > { %v2696_v25 = vsel %vm811_vm2, %v5685_v10, 0.0 }
 0x8ca   : > { %4092 = vpow2.f32 %v2654_v36  ;;  %2697 = vadd.xlane.f32.xlu1 %v2696_v25 }
 0x8cc   : > { %v2662_v39 = vpop.xlane.xlu2 %2661 }
 0x8cd   : > { %4094 = vrcp.f32 %v2662_v39 }
 0x8d0   : > { %v5689_v48 = vpop.eup %4092 }
 0x8d1   : > { %v2699_v52 = vsel %vm811_vm2, %v5689_v48, 0.0 }
 0x8d2   : > { %2700 = vadd.xlane.f32.xlu2 %v2699_v52 }
 0x8d3   : > { %v2668_v17 = vpop.xlane.xlu1 %2667  ;;  %v4095_v24 = vpop.eup %4094 }
 0x8d4   : > { %v2665_v2 = vpop.xlane.xlu0 %2664  ;;  %v2724_v41 = vmul.f32 %v4095_v24, %v5617_v53 }
 0x8d5   : > { %4096 = vrcp.f32 %v2665_v2 }
 0x8d6   : > { %4098 = vrcp.f32 %v2668_v17  ;;  %v2740_v31 = vpack.c.bf16 %v2724_v41, %v2724_v41 }
 0x8d7   : > { %4100 = vpow2.f32 %v2650_v9 }
 0x8d8   : > { %v2758_v6 = vunpack.c.l.b16 %v2740_v31 }
 0x8db   : > { %v4097_v29 = vpop.eup %4096  ;;  %v2671_v42 = vpop.xlane.xlu2 %2670 }
 0x8dc   : > { %v4099_v16 = vpop.eup %4098  ;;  %v2725_v36 = vmul.f32 %v4097_v29, %v5625_v38  ;;  %4102 = vrcp.f32 %v2671_v42  ;;  %v2611_v29 = vpop.xlane.xlu0 %2610 }
 0x8dd   : > { %v2726_v39 = vmul.f32 %v4099_v16, %v5622_v8  ;;  %v5697_v52 = vpop.eup %4100 }
 0x8de   : > { %v2741_v25 = vpack.c.bf16 %v2725_v36, %v2725_v36  ;;  %v2693_v38 = vsel %vm811_vm2, %v5697_v52, 0.0 }
 0x8df   : > { %v2742_v4 = vpack.c.bf16 %v2726_v39, %v2726_v39 }
 0x8e0   : > { %v2759_v37 = vunpack.c.l.b16 %v2741_v25 }
 0x8e1   : > { %v2783_v8 = vunpack.c.l.b16 %v2742_v4 }
 0x8e2   : > { %v4103_v2 = vpop.eup %4102  ;;  %v2760_v17 = vpack.c.b16 %v2759_v37, %v2758_v6 }
 0x8e3   : > { %v2727_v53 = vmul.f32 %v4103_v2, %v5634_v51  ;;  %2886 = vrot.lane.b32.xlu1 %v4602_v40, %s4362_s7  ;;  %v2686_v24 = vpop.xlane.xlu2 %2685 }
 0x8e4   : > { %3603 = vmatmul.msk.bf16.vlgmr.msrb.gmra.mxu0 %vm811_vm2, %v2760_v17  ;;  %v2627_v17 = vsub.f32 %v5632_v54, %v2611_v29 }
 0x8e5   : > { %v2743_v9 = vpack.c.bf16 %v2727_v53, %v2727_v53  ;;  %2694 = vadd.xlane.f32.xlu0 %v2693_v38 }
 0x8e7   : > { %v2784_v41 = vunpack.c.l.b16 %v2743_v9  ;;  %v3760_v9 = vpack.i.bf16 %v5494_v43, %v5492_v58  ;;  %v6047_v58 = vpack.i.bf16 %v5199_v47, %v5195_v30 }
 0x8e9   : > { %v2785_v42 = vpack.c.b16 %v2784_v41, %v2783_v8 }
 0x8ea   : > { %2911 = vrot.lane.b32.xlu2 %v4598_v32, %s4362_s7  ;;  %v3755_v32 = vpack.i.bf16 %v5206_v62, %v5201_v12 }
 0x8eb   : > { %v2689_v16 = vpop.xlane.xlu2 %2688  ;;  %3604 = vmatmul.msk.bf16.vlgmr.msrb.gmra.mxu1 %vm811_vm2, %v2785_v42 }
 0x8ed   : > { %v2674_v51 = vpop.xlane.xlu1 %2673 }
 0x8ee   : > { %4104 = vrcp.f32 %v2674_v51 }
 0x8ef   : > { %v2837_v40 = vpop.permute.xlu0 %2836 }
 0x8f0   : > { %2849 = vmatpush.bf16.msrb.mxu3 %v2837_v40 }
 0x8f3   : > { %v2680_v31 = vpop.xlane.xlu2 %2679 }
 0x8f4   : > { %v4105_v6 = vpop.eup %4104 }
 0x8f5   : > { %v2608_v36 = vpop.xlane.xlu1 %2607  ;;  %v2728_v37 = vmul.f32 %v4105_v6, %v5650_v35 }
 0x8f6   : > { %v2626_v25 = vsub.f32 %v5657_v61, %v2608_v36  ;;  %v2658_v61 = vmul.f32 1.442695, %v2627_v17 }
 0x8f7   : > { %v2744_v53 = vpack.c.bf16 %v2728_v37, %v2728_v37 }
 0x8f8   : > { %v2656_v2 = vmul.f32 1.442695, %v2626_v25 }
 0x8f9   : > { %2936 = vrot.lane.b32.xlu0 %v4609_v49, %s4362_s7  ;;  %v2808_v8 = vunpack.c.l.b16 %v2744_v53 }
 0x8fb   : > { %v2677_v39 = vpop.xlane.xlu2 %2676 }
 0x8fc   : > { %4106 = vrcp.f32 %v2677_v39 }
 0x8fd   : > { %4108 = vpow2.f32 %v2656_v2 }
 0x8fe   : > { %4110 = vpow2.f32 %v2658_v61 }
 0x8ff   : > { %4112 = vrcp.f32 %v2680_v31 }
 0x900   : > { %4114 = vrcp.f32 %v2689_v16 }
 0x901   : > { %3756 = vrot.lane.b32.xlu0 %v3755_v32, %s4363_s10 }
 0x902   : > { %v4107_v4 = vpop.eup %4106 }
 0x903   : > { %v2729_v49 = vmul.f32 %v4107_v4, %v5668_v22  ;;  %v5719_v62 = vpop.eup %4108  ;;  %v3815_v4 = vpack.i.bf16 %v5211_v63, %v5209_v55  ;;  %v2692_v53 = vpop.xlane.xlu2 %2691 }
 0x904   : > { %v2702_v54 = vsel %vm811_vm2, %v5719_v62, 0.0  ;;  %v5725_v22 = vpop.eup %4110 }
 0x905   : > { %v2745_v38 = vpack.c.bf16 %v2729_v49, %v2729_v49  ;;  %v2705_v43 = vsel %vm811_vm2, %v5725_v22, 0.0  ;;  %v4113_v29 = vpop.eup %4112 }
 0x906   : > { %v2730_v42 = vmul.f32 %v4113_v29, %v5661_v33  ;;  %v4115_v51 = vpop.eup %4114  ;;  %v6048_v33 = vpack.i.bf16 %v5498_v57, %v5496_v50  ;;  %v3830_v50 = vpack.i.bf16 %v5236_v3, %v5232_v60 }
 0x907   : > { %v2809_v12 = vunpack.c.l.b16 %v2745_v38  ;;  %v2733_v30 = vmul.f32 %v4115_v51, %v5647_v46 }
 0x908   : > { %v2746_v25 = vpack.c.bf16 %v2730_v42, %v2730_v42 }
 0x909   : > { %v2810_v35 = vpack.c.b16 %v2809_v12, %v2808_v8  ;;  %3761 = vrot.lane.b32.xlu0 %v3760_v9, %s4364_s12  ;;  %v2749_v16 = vpack.c.bf16 %v2733_v30, %v2733_v30  ;;  %v3785_v30 = vpack.i.bf16 %v5247_v26, %v5238_v18  ;;  %v6053_v18 = vpack.i.bf16 %v5512_v27, %v5504_v59  ;;  %v6055_v59 = vld [vmem:[#allocation32_spill] sm:$0xff]  ;;  %v6056_v27 = vld [vmem:[#allocation31_spill] sm:$0xff] }
 0x90a   : > { %v2833_v32 = vunpack.c.l.b16 %v2746_v25 }
 0x90b   : > { %3605 = vmatmul.msk.bf16.vlgmr.msrb.gmra.mxu2 %vm811_vm2, %v2810_v35 }
 0x90d   : > { %2703 = vadd.xlane.f32.xlu1 %v2702_v54 }
 0x911   : > { %3771 = vrot.lane.b32.xlu0 %v6047_v58, %s4363_s10 }
 0x913   : > { %2706 = vadd.xlane.f32.xlu2 %v2705_v43 }
 0x91a   : > { %v2683_v41 = vpop.xlane.xlu0 %2682 }
 0x91b   : > { %4116 = vrcp.f32 %v2683_v41 }
 0x91c   : > { %4118 = vrcp.f32 %v2686_v24  ;;  %v2859_v24 = vunpack.c.l.b16 %v2749_v16 }
 0x921   : > { %v4117_v40 = vpop.eup %4116 }
 0x922   : > { %v4119_v36 = vpop.eup %4118  ;;  %v2731_v39 = vmul.f32 %v4117_v40, %v5677_v11 }
 0x923   : > { %v2732_v6 = vmul.f32 %v4119_v36, %v5641_v23  ;;  %v3800_v23 = vpack.i.bf16 %v5240_v15, %v5234_v21  ;;  %v6049_v15 = vpack.i.bf16 %v5267_v28, %v5256_v14 }
 0x924   : > { %v2747_v47 = vpack.c.bf16 %v2731_v39, %v2731_v39 }
 0x925   : > { %v2748_v2 = vpack.c.bf16 %v2732_v6, %v2732_v6 }
 0x926   : > { %v2834_v31 = vunpack.c.l.b16 %v2747_v47  ;;  %v6052_v47 = vpack.i.bf16 %v5539_v7, %v5523_v44 }
 0x927   : > { %v2858_v17 = vunpack.c.l.b16 %v2748_v2 }
 0x928   : > { %v2835_v37 = vpack.c.b16 %v2834_v31, %v2833_v32  ;;  %v3820_v32 = vpack.i.bf16 %v5506_v45, %v5502_v0 }
 0x929   : > { %v2860_v46 = vpack.c.b16 %v2859_v24, %v2858_v17  ;;  %v6054_v24 = vpack.i.bf16 %v5555_v56, %v5541_v5 }
 0x92a   : > { %3606 = vmatmul.msk.bf16.vlgmr.msrb.gmra.mxu3 %vm811_vm2, %v2835_v37 }
 0x92b   : > { %3776 = vrot.lane.b32.xlu2 %v6048_v33, %s4364_s12 }
 0x92d   : > { %v2862_v11 = vpop.permute.xlu0 %2861 }
 0x92e   : > { %2874 = vmatpush.bf16.msra.mxu0 %v2862_v11 }
 0x931   : > { %3607 = vmatmul.msk.bf16.vlgmr.msra.gmra.mxu0 %vm811_vm2, %v2860_v46 }
 0x933   : > { %3801 = vrot.lane.b32.xlu2 %v3800_v23, %s4363_s10 }
 0x93b   : > { %3816 = vrot.lane.b32.xlu2 %v3815_v4, %s4363_s10  ;;  %v3634_v4 = vld [vmem:[#allocation7 + $0x8] sm:$0xff] }
 0x93c   : > { %3250 = vmatpush.bf16.msrb.mxu0 %v3634_v4 }
 0x93d   : > { %v2698_v49 = vpop.xlane.xlu1 %2697 }
 0x93e   : > { %4120 = vrcp.f32 %v2698_v49 }
 0x943   : > { %3831 = vrot.lane.b32.xlu2 %v3830_v50, %s4363_s10 }
 0x944   : > { %v4121_v61 = vpop.eup %4120 }
 0x945   : > { %v2701_v57 = vpop.xlane.xlu2 %2700  ;;  %v2736_v21 = vmul.f32 %v4121_v61, %v5685_v10  ;;  %v6050_v10 = vpack.i.bf16 %v5258_v20, %v5249_v19 }
 0x946   : > { %4122 = vrcp.f32 %v2701_v57 }
 0x947   : > { %v2752_v63 = vpack.c.bf16 %v2736_v21, %v2736_v21  ;;  %4124 = vrcp.f32 %v2692_v53  ;;  %v3633_v53 = vld [vmem:[#allocation7] sm:$0xff] }
 0x948   : > { %3251 = vmatpush.bf16.msrb.mxu0 %v3633_v53 }
 0x949   : > { %v2908_v60 = vunpack.c.l.b16 %v2752_v63  ;;  %v6058_v63 = vld [vmem:[#allocation20_spill] sm:$0xff] }
 0x94b   : > { %3846 = vrot.lane.b32.xlu2 %v6049_v15, %s4363_s10 }
 0x94c   : > { %v4123_v55 = vpop.eup %4122 }
 0x94d   : > { %v2737_v38 = vmul.f32 %v4123_v55, %v5689_v48  ;;  %v2912_v9 = vpop.permute.xlu2 %2911  ;;  %v4125_v35 = vpop.eup %4124 }
 0x94e   : > { %2924 = vmatpush.bf16.msra.mxu2 %v2912_v9  ;;  %v2734_v48 = vmul.f32 %v4125_v35, %v5672_v13  ;;  %v6059_v9 = vld [vmem:[#allocation19_spill] sm:$0xff] }
 0x94f   : > { %v2753_v8 = vpack.c.bf16 %v2737_v38, %v2737_v38 }
 0x950   : > { %v2750_v58 = vpack.c.bf16 %v2734_v48, %v2734_v48 }
 0x951   : > { %v2909_v3 = vunpack.c.l.b16 %v2753_v8 }
 0x952   : > { %v2883_v42 = vunpack.c.l.b16 %v2750_v58 }
 0x953   : > { %v2910_v12 = vpack.c.b16 %v2909_v3, %v2908_v60  ;;  %3861 = vrot.lane.b32.xlu2 %v6050_v10, %s4363_s10 }
 0x955   : > { %3609 = vmatmul.msk.bf16.vlgmr.msra.gmra.mxu2 %vm811_vm2, %v2910_v12  ;;  %v2887_v14 = vpop.permute.xlu1 %2886 }
 0x956   : > { %2899 = vmatpush.bf16.msra.mxu1 %v2887_v14 }
 0x958   : > { %v2695_v28 = vpop.xlane.xlu0 %2694 }
 0x959   : > { %4126 = vrcp.f32 %v2695_v28 }
 0x95f   : > { %v4127_v54 = vpop.eup %4126 }
 0x960   : > { %v2735_v43 = vmul.f32 %v4127_v54, %v5697_v52  ;;  %v6051_v52 = vpack.i.bf16 %v5521_v34, %v5508_v1 }
 0x961   : > { %v2776_v41 = vpop.f32.mrf.mxu0 }
 0x962   : > { %v2751_v29 = vpack.c.bf16 %v2735_v43, %v2735_v43 }
 0x964   : > { %v2884_v51 = vunpack.c.l.b16 %v2751_v29 }
 0x966   : > { %v2885_v40 = vpack.c.b16 %v2884_v51, %v2883_v42 }
 0x968   : > { %3608 = vmatmul.msk.bf16.vlgmr.msra.gmra.mxu1 %vm811_vm2, %v2885_v40  ;;  %v2801_v19 = vpop.f32.mrf.mxu1 }
 0x969   : > { %v2778_v20 = vpop.f32.mrf.mxu0 }
 0x96a   : > { %v3765_v36 = vpack.i.bf16 %v2778_v20, %v2776_v41 }
 0x96b   : > { %v2937_v25 = vpop.permute.xlu0 %2936 }
 0x96c   : > { %2949 = vmatpush.bf16.msra.mxu3 %v2937_v25  ;;  %3766 = vrot.lane.b32.xlu1 %v3765_v36, %s4365_s24  ;;  %v6060_v36 = vld [vmem:[#allocation26_spill] sm:$0xff] }
 0x970   : > { %v2803_v13 = vpop.f32.mrf.mxu1 }
 0x971   : > { %v3780_v39 = vpack.i.bf16 %v2803_v13, %v2801_v19  ;;  %v6061_v13 = vld [vmem:[#allocation25_spill] sm:$0xff] }
 0x973   : > { %3781 = vrot.lane.b32.xlu0 %v3780_v39, %s4365_s24  ;;  %v3757_v49 = vpop.permute.xlu0 %3756 }
 0x974   : > { %3791 = vrot.lane.b32.xlu1 %v6051_v52, %s4364_s12  ;;  %v3759_v57 = vunpack.i.h.bf16 %v3757_v49  ;;  %v3758_v61 = vunpack.i.l.bf16 %v3757_v49 }
 0x976   : > { %v3149_v38 = vsel %vm601_vm1, %v6058_v63, %v3759_v57  ;;  %v3148_v8 = vsel %vm601_vm1, %v6059_v9, %v3758_v61 }
 0x97b   : > { %3786 = vrot.lane.b32.xlu0 %v3785_v30, %s4363_s10  ;;  %v3762_v50 = vpop.permute.xlu0 %3761  ;;  %s4272_s10 = scalar_lea.hbm %s6008_s5, 512 }
 0x97c   : > { %3806 = vrot.lane.b32.xlu1 %v6052_v47, %s4364_s12  ;;  %v3764_v21 = vunpack.i.h.bf16 %v3762_v50  ;;  %v3763_v15 = vunpack.i.l.bf16 %v3762_v50  ;;  %p4274_p10 = scmp.lt.s32.totalorder %s4272_s10, %s4268_s11 }
 0x97e   : > { %v3164_v12 = vsel %vm811_vm2, %v3148_v8, %v3763_v15  ;;  %v3165_v10 = vsel %vm811_vm2, %v3149_v38, %v3764_v21  ;;  %v6065_v38 = vld [vmem:[#allocation21_spill] sm:$0xff]  ;;  %p4275_p11 = por %p4274_p10, %p4273_p9 }
 0x980   : > { %v2704_v6 = vpop.xlane.xlu1 %2703  ;;  %p4276_p12 = pnand %p4275_p11, %p4271_p8 }
 0x981   : > { %4128 = vrcp.f32 %v2704_v6 }
 0x983   : > { %v3772_v14 = vpop.permute.xlu0 %3771 }
 0x984   : > { %3821 = vrot.lane.b32.xlu1 %v3820_v32, %s4364_s12  ;;  %v3774_v41 = vunpack.i.h.bf16 %v3772_v14  ;;  %v3773_v29 = vunpack.i.l.bf16 %v3772_v14 }
 0x986   : > { %v2707_v31 = vpop.xlane.xlu2 %2706  ;;  %v3151_v25 = vsel %vm601_vm1, %v6060_v36, %v3774_v41  ;;  %v3150_v39 = vsel %vm601_vm1, %v6061_v13, %v3773_v29 }
 0x987   : > { %v4129_v1 = vpop.eup %4128  ;;  %4130 = vrcp.f32 %v2707_v31 }
 0x988   : > { %v2738_v34 = vmul.f32 %v4129_v1, %v5719_v62 }
 0x98a   : > { %v2754_v44 = vpack.c.bf16 %v2738_v34, %v2738_v34 }
 0x98c   : > { %3836 = vrot.lane.b32.xlu1 %v6053_v18, %s4364_s12  ;;  %v2933_v2 = vunpack.c.l.b16 %v2754_v44 }
 0x98d   : > { %v4131_v26 = vpop.eup %4130 }
 0x98e   : > { %v2739_v7 = vmul.f32 %v4131_v26, %v5725_v22  ;;  %v2826_v16 = vpop.f32.mrf.mxu2  ;;  %v6057_v22 = vpack.i.bf16 %v6055_v59, %v6056_v27  ;;  %v3777_v58 = vpop.permute.xlu2 %3776 }
 0x98f   : > { %v3779_v51 = vunpack.i.h.bf16 %v3777_v58  ;;  %v3778_v40 = vunpack.i.l.bf16 %v3777_v58 }
 0x990   : > { %v2755_v37 = vpack.c.bf16 %v2739_v7, %v2739_v7 }
 0x991   : > { %v3167_v30 = vsel %vm811_vm2, %v3151_v25, %v3779_v51  ;;  %v3166_v47 = vsel %vm811_vm2, %v3150_v39, %v3778_v40  ;;  %v6066_v40 = vld [vmem:[#allocation28_spill] sm:$0xff] }
 0x992   : > { %v2934_v0 = vunpack.c.l.b16 %v2755_v37  ;;  %v6062_v37 = vld [vmem:[#allocation16_spill] sm:$0xff] }
 0x994   : > { %v2935_v45 = vpack.c.b16 %v2934_v0, %v2933_v2  ;;  %3851 = vrot.lane.b32.xlu1 %v6054_v24, %s4364_s12  ;;  %v6063_v0 = vld [vmem:[#allocation15_spill] sm:$0xff] }
 0x996   : > { %3610 = vmatmul.msk.bf16.vlgmr.msra.gmra.mxu3 %vm811_vm2, %v2935_v45  ;;  %v2828_v62 = vpop.f32.mrf.mxu2  ;;  %v3802_v53 = vpop.permute.xlu2 %3801 }
 0x997   : > { %v3795_v33 = vpack.i.bf16 %v2828_v62, %v2826_v16  ;;  %v3804_v50 = vunpack.i.h.bf16 %v3802_v53  ;;  %v3803_v57 = vunpack.i.l.bf16 %v3802_v53 }
 0x999   : > { %3796 = vrot.lane.b32.xlu0 %v3795_v33, %s4365_s24  ;;  %v3154_v9 = vsel %vm601_vm1, %v6065_v38, %v3803_v57 }
 0x99c   : > { %3866 = vrot.lane.b32.xlu1 %v6057_v22, %s4364_s12 }
 0x9ad   : > { %v2851_v17 = vpop.f32.mrf.mxu3 }
 0x9ae   : > { %v2876_v11 = vpop.f32.mrf.mxu0 }
 0x9b5   : > { %v2853_v46 = vpop.f32.mrf.mxu3 }
 0x9b6   : > { %v3810_v23 = vpack.i.bf16 %v2853_v46, %v2851_v17  ;;  %v2878_v5 = vpop.f32.mrf.mxu0 }
 0x9b7   : > { %v3825_v56 = vpack.i.bf16 %v2878_v5, %v2876_v11 }
 0x9b8   : > { %3811 = vrot.lane.b32.xlu0 %v3810_v23, %s4365_s24 }
 0x9c0   : > { %3826 = vrot.lane.b32.xlu0 %v3825_v56, %s4365_s24 }
 0x9d8   : > { %v2926_v42 = vpop.f32.mrf.mxu2 }
 0x9de   : > { %v3767_v55 = vpop.permute.xlu1 %3766 }
 0x9df   : > { %v3769_v60 = vunpack.i.h.bf16 %v3767_v55  ;;  %v3768_v3 = vunpack.i.l.bf16 %v3767_v55  ;;  %v6064_v55 = vld [vmem:[#allocation22_spill] sm:$0xff] }
 0x9e0   : > { %v2928_v34 = vpop.f32.mrf.mxu2  ;;  %v3155_v63 = vsel %vm601_vm1, %v6064_v55, %v3804_v50 }
 0x9e1   : > { %v3182_v28 = vsel %vm3180_vm3, %v3165_v10, %v3769_v60  ;;  %v3181_v35 = vsel %vm3180_vm3, %v3164_v12, %v3768_v3  ;;  %v3855_v18 = vpack.i.bf16 %v2928_v34, %v2926_v42 }
 0x9e2   : > { %v3197_v48 = vpack.c.bf16 %v3182_v28, %v3181_v35  ;;  %v3817_v35 = vpop.permute.xlu2 %3816 }
 0x9e3   : > { %v3819_v58 = vunpack.i.h.bf16 %v3817_v35 }
 0x9e4   : > { %3619 = vmatmul.msk.bf16.vlgmr.msrb.gmra.mxu0 %vm504_vm0, %v3197_v48 }
 0x9e5   : > { %v2901_v54 = vpop.f32.mrf.mxu1  ;;  %v3782_v43 = vpop.permute.xlu0 %3781 }
 0x9e6   : > { %v3784_v19 = vunpack.i.h.bf16 %v3782_v43  ;;  %v3783_v20 = vunpack.i.l.bf16 %v3782_v43  ;;  %v3792_v16 = vpop.permute.xlu1 %3791  ;;  %v3818_v43 = vunpack.i.l.bf16 %v3817_v35 }
 0x9e7   : > { %v3794_v24 = vunpack.i.h.bf16 %v3792_v16  ;;  %v3793_v62 = vunpack.i.l.bf16 %v3792_v16  ;;  %v6068_v16 = vld [vmem:[#allocation18_spill] sm:$0xff] }
 0x9e8   : > { %v3184_v32 = vsel %vm3180_vm3, %v3167_v30, %v3784_v19  ;;  %v3183_v31 = vsel %vm3180_vm3, %v3166_v47, %v3783_v20  ;;  %v3157_v19 = vsel %vm601_vm1, %v6066_v40, %v3819_v58  ;;  %v6067_v20 = vld [vmem:[#allocation27_spill] sm:$0xff] }
 0x9e9   : > { %v3198_v1 = vpack.c.bf16 %v3184_v32, %v3183_v31  ;;  %v3156_v36 = vsel %vm601_vm1, %v6067_v20, %v3818_v43  ;;  %v5851_v32 = vld [vmem:[%s6006_s3] ss:$0 sm:$0xff] }
 0x9ea   : > { %v3832_v47 = vpop.permute.xlu2 %3831 }
 0x9eb   : > { %v3834_v31 = vunpack.i.h.bf16 %v3832_v47 }
 0x9ed   : > { %v2903_v52 = vpop.f32.mrf.mxu1  ;;  %v3787_v26 = vpop.permute.xlu0 %3786 }
 0x9ee   : > { %v3840_v6 = vpack.i.bf16 %v2903_v52, %v2901_v54  ;;  %v3789_v44 = vunpack.i.h.bf16 %v3787_v26  ;;  %v3788_v7 = vunpack.i.l.bf16 %v3787_v26  ;;  %v3807_v49 = vpop.permute.xlu1 %3806 }
 0x9ef   : > { %v3809_v61 = vunpack.i.h.bf16 %v3807_v49  ;;  %v3808_v21 = vunpack.i.l.bf16 %v3807_v49 }
 0x9f0   : > { %3841 = vrot.lane.b32.xlu0 %v3840_v6, %s4365_s24  ;;  %v3153_v2 = vsel %vm601_vm1, %v6062_v37, %v3789_v44  ;;  %v3152_v45 = vsel %vm601_vm1, %v6063_v0, %v3788_v7  ;;  %v3159_v37 = vsel %vm601_vm1, %v6068_v16, %v3834_v31 }
 0x9f1   : > { %v3168_v22 = vsel %vm811_vm2, %v3152_v45, %v3793_v62  ;;  %v3169_v17 = vsel %vm811_vm2, %v3153_v2, %v3794_v24  ;;  %v3171_v3 = vsel %vm811_vm2, %v3155_v63, %v3809_v61  ;;  %v3170_v12 = vsel %vm811_vm2, %v3154_v9, %v3808_v21  ;;  %v6069_v2 = vld [vmem:[#allocation17_spill] sm:$0xff]  ;;  %v6071_v63 = vld [vmem:[#allocation23_spill] sm:$0xff] }
 0x9f4   : > { %3620 = vmatmul.msk.bf16.gmra.mxu0 %vm504_vm0, %v3198_v1  ;;  %v3833_v1 = vunpack.i.l.bf16 %v3832_v47 }
 0x9f6   : > { %v3822_v48 = vpop.permute.xlu1 %3821  ;;  %v3158_v0 = vsel %vm601_vm1, %v6069_v2, %v3833_v1 }
 0x9f7   : > { %v3824_v41 = vunpack.i.h.bf16 %v3822_v48  ;;  %v3823_v29 = vunpack.i.l.bf16 %v3822_v48 }
 0x9f8   : > { %3856 = vrot.lane.b32.xlu0 %v3855_v18, %s4365_s24 }
 0x9f9   : > { %v3173_v25 = vsel %vm811_vm2, %v3157_v19, %v3824_v41  ;;  %v3172_v13 = vsel %vm811_vm2, %v3156_v36, %v3823_v29  ;;  %v6072_v36 = vld [vmem:[#allocation30_spill] sm:$0xff] }
 0x9fe   : > { %v3837_v6 = vpop.permute.xlu1 %3836 }
 0x9ff   : > { %v3839_v34 = vunpack.i.h.bf16 %v3837_v6  ;;  %v3838_v18 = vunpack.i.l.bf16 %v3837_v6 }
 0xa01   : > { %v3175_v62 = vsel %vm811_vm2, %v3159_v37, %v3839_v34 }
 0xa0b   : > { %v3797_v33 = vpop.permute.xlu0 %3796 }
 0xa0c   : > { %v3799_v59 = vunpack.i.h.bf16 %v3797_v33  ;;  %v3798_v27 = vunpack.i.l.bf16 %v3797_v33  ;;  %v3174_v33 = vsel %vm811_vm2, %v3158_v0, %v3838_v18 }
 0xa0e   : > { %v3185_v11 = vsel %vm3180_vm3, %v3168_v22, %v3798_v27  ;;  %v3186_v46 = vsel %vm3180_vm3, %v3169_v17, %v3799_v59 }
 0xa0f   : > { %v3199_v23 = vpack.c.bf16 %v3186_v46, %v3185_v11  ;;  %v3847_v46 = vpop.permute.xlu2 %3846 }
 0xa10   : > { %v3849_v53 = vunpack.i.h.bf16 %v3847_v46  ;;  %v3848_v49 = vunpack.i.l.bf16 %v3847_v46 }
 0xa11   : > { %3621 = vmatmul.msk.bf16.gmra.mxu0 %vm504_vm0, %v3199_v23 }
 0xa12   : > { %v3160_v38 = vsel %vm601_vm1, %v6071_v63, %v3848_v49 }
 0xa17   : > { %v3862_v43 = vpop.permute.xlu2 %3861 }
 0xa18   : > { %v3863_v40 = vunpack.i.l.bf16 %v3862_v43 }
 0xa19   : > { %v2951_v4 = vpop.f32.mrf.mxu3 }
 0xa21   : > { %v2953_v5 = vpop.f32.mrf.mxu3 }
 0xa22   : > { %v3870_v56 = vpack.i.bf16 %v2953_v5, %v2951_v4  ;;  %v3852_v4 = vpop.permute.xlu1 %3851 }
 0xa23   : > { %v3854_v50 = vunpack.i.h.bf16 %v3852_v4  ;;  %v3853_v57 = vunpack.i.l.bf16 %v3852_v4 }
 0xa24   : > { %3871 = vrot.lane.b32.xlu0 %v3870_v56, %s4365_s24 }
 0xa2a   : > { %v3812_v15 = vpop.permute.xlu0 %3811  ;;  %v3867_v29 = vpop.permute.xlu1 %3866 }
 0xa2b   : > { %v3814_v8 = vunpack.i.h.bf16 %v3812_v15  ;;  %v3813_v60 = vunpack.i.l.bf16 %v3812_v15  ;;  %v6070_v15 = vld [vmem:[#allocation24_spill] sm:$0xff]  ;;  %v3869_v19 = vunpack.i.h.bf16 %v3867_v29  ;;  %v3868_v20 = vunpack.i.l.bf16 %v3867_v29 }
 0xa2c   : > { %v3161_v55 = vsel %vm601_vm1, %v6070_v15, %v3849_v53 }
 0xa2d   : > { %v3187_v10 = vsel %vm3180_vm3, %v3170_v12, %v3813_v60  ;;  %v3188_v14 = vsel %vm3180_vm3, %v3171_v3, %v3814_v8  ;;  %v3177_v8 = vsel %vm811_vm2, %v3161_v55, %v3854_v50  ;;  %v3176_v60 = vsel %vm811_vm2, %v3160_v38, %v3853_v57 }
 0xa2e   : > { %v3200_v28 = vpack.c.bf16 %v3188_v14, %v3187_v10 }
 0xa30   : > { %3622 = vmatmul.msk.bf16.gmra.mxu0 %vm504_vm0, %v3200_v28 }
 0xa32   : > { %v3827_v54 = vpop.permute.xlu0 %3826 }
 0xa33   : > { %v3829_v42 = vunpack.i.h.bf16 %v3827_v54  ;;  %v3828_v51 = vunpack.i.l.bf16 %v3827_v54 }
 0xa35   : > { %v3189_v39 = vsel %vm3180_vm3, %v3172_v13, %v3828_v51  ;;  %v3190_v52 = vsel %vm3180_vm3, %v3173_v25, %v3829_v42  ;;  %v3864_v51 = vunpack.i.h.bf16 %v3862_v43 }
 0xa36   : > { %v3201_v30 = vpack.c.bf16 %v3190_v52, %v3189_v39  ;;  %v6073_v52 = vld [vmem:[#allocation29_spill] sm:$0xff] }
 0xa37   : > { %v3163_v25 = vsel %vm601_vm1, %v6072_v36, %v3864_v51 }
 0xa38   : > { %v3179_v1 = vsel %vm811_vm2, %v3163_v25, %v3869_v19 }
 0xa40   : > { %3623 = vmatmul.msk.bf16.gmra.mxu0 %vm504_vm0, %v3201_v30  ;;  %v3162_v30 = vsel %vm601_vm1, %v6073_v52, %v3863_v40 }
 0xa41   : > { %v3178_v34 = vsel %vm811_vm2, %v3162_v30, %v3868_v20 }
 0xa61   : > { %v3253_v26 = vpop.f32.mrf.mxu0 }
 0xa62   : > { %v3254_v44 = vadd.f32 %v5851_v32, %v3253_v26  ;;  %v3842_v7 = vpop.permute.xlu0 %3841 }
 0xa63   : > { %v3844_v45 = vunpack.i.h.bf16 %v3842_v7  ;;  %v3843_v24 = vunpack.i.l.bf16 %v3842_v7 }
 0xa64   : > { %v3309_v59 = vrot.slane %v3254_v44, 4  ;;  %3342 = vst.msk [vmem:[%s5862_s1] sm:$0xf] %vm3341_vm4, %v3254_v44 }
 0xa65   : > { %v3191_v27 = vsel %vm3180_vm3, %v3174_v33, %v3843_v24  ;;  %v3192_v22 = vsel %vm3180_vm3, %v3175_v62, %v3844_v45 }
 0xa66   : > { %3343 = vst.msk [vmem:[%s5862_s1 + $0x4] sm:$0xf] %vm3341_vm4, %v3309_v59  ;;  %v3202_v17 = vpack.c.bf16 %v3192_v22, %v3191_v27 }
 0xa68   : > { %3624 = vmatmul.msk.bf16.gmra.mxu0 %vm504_vm0, %v3202_v17 }
 0xa69   : > { %v3255_v11 = vpop.f32.mrf.mxu0 }
 0xa6a   : > { %v3256_v23 = vadd.f32 %v5851_v32, %v3255_v11  ;;  %v3857_v56 = vpop.permute.xlu0 %3856 }
 0xa6b   : > { %v3859_v61 = vunpack.i.h.bf16 %v3857_v56  ;;  %v3858_v21 = vunpack.i.l.bf16 %v3857_v56 }
 0xa6c   : > { %v3310_v5 = vrot.slane %v3256_v23, 4  ;;  %3344 = vst.msk [vmem:[%s5862_s1 + $0x8] sm:$0xf] %vm3341_vm4, %v3256_v23 }
 0xa6d   : > { %v3193_v12 = vsel %vm3180_vm3, %v3176_v60, %v3858_v21  ;;  %v3194_v10 = vsel %vm3180_vm3, %v3177_v8, %v3859_v61 }
 0xa6e   : > { %3345 = vst.msk [vmem:[%s5862_s1 + $0xc] sm:$0xf] %vm3341_vm4, %v3310_v5  ;;  %v3203_v28 = vpack.c.bf16 %v3194_v10, %v3193_v12 }
 0xa71   : > { %v3258_v9 = vpop.f32.mrf.mxu0 }
 0xa72   : > { %v3259_v3 = vadd.f32 %v5851_v32, %v3258_v9 }
 0xa74   : > { %v3311_v14 = vrot.slane %v3259_v3, 4  ;;  %3346 = vst.msk [vmem:[%s5862_s1 + $0x10] sm:$0xf] %vm3341_vm4, %v3259_v3 }
 0xa76   : > { %3347 = vst.msk [vmem:[%s5862_s1 + $0x14] sm:$0xf] %vm3341_vm4, %v3311_v14 }
 0xa78   : > { %3625 = vmatmul.msk.bf16.gmra.mxu0 %vm504_vm0, %v3203_v28 }
 0xa79   : > { %v3260_v35 = vpop.f32.mrf.mxu0 }
 0xa7a   : > { %v3261_v48 = vadd.f32 %v5851_v32, %v3260_v35 }
 0xa7c   : > { %v3312_v54 = vrot.slane %v3261_v48, 4  ;;  %3348 = vst.msk [vmem:[%s5862_s1 + $0x18] sm:$0xf] %vm3341_vm4, %v3261_v48 }
 0xa7e   : > { %3349 = vst.msk [vmem:[%s5862_s1 + $0x1c] sm:$0xf] %vm3341_vm4, %v3312_v54 }
 0xa8e   : > { %v3263_v58 = vpop.f32.mrf.mxu0 }
 0xa8f   : > { %v3264_v41 = vadd.f32 %v5851_v32, %v3263_v58 }
 0xa91   : > { %v3313_v42 = vrot.slane %v3264_v41, 4  ;;  %3350 = vst.msk [vmem:[%s5862_s1 + $0x20] sm:$0xf] %vm3341_vm4, %v3264_v41 }
 0xa93   : > { %3351 = vst.msk [vmem:[%s5862_s1 + $0x24] sm:$0xf] %vm3341_vm4, %v3313_v42 }
 0xa96   : > { %v3872_v13 = vpop.permute.xlu0 %3871  ;;  %v3265_v39 = vpop.f32.mrf.mxu0 }
 0xa97   : > { %v3874_v47 = vunpack.i.h.bf16 %v3872_v13  ;;  %v3873_v6 = vunpack.i.l.bf16 %v3872_v13  ;;  %v3266_v31 = vadd.f32 %v5851_v32, %v3265_v39 }
 0xa99   : > { %v3195_v18 = vsel %vm3180_vm3, %v3178_v34, %v3873_v6  ;;  %v3196_v26 = vsel %vm3180_vm3, %v3179_v1, %v3874_v47  ;;  %v3314_v44 = vrot.slane %v3266_v31, 4  ;;  %3352 = vst.msk [vmem:[%s5862_s1 + $0x28] sm:$0xf] %vm3341_vm4, %v3266_v31 }
 0xa9a   : > { %v3204_v7 = vpack.c.bf16 %v3196_v26, %v3195_v18 }
 0xa9b   : > { %3353 = vst.msk [vmem:[%s5862_s1 + $0x2c] sm:$0xf] %vm3341_vm4, %v3314_v44 }
 0xa9c   : > { %3626 = vmatmul.msk.bf16.gmra.mxu0 %vm504_vm0, %v3204_v7 }
 0xaad   : > { %v3268_v16 = vpop.f32.mrf.mxu0 }
 0xaae   : > { %v3269_v37 = vadd.f32 %v5851_v32, %v3268_v16 }
 0xab0   : > { %v3315_v2 = vrot.slane %v3269_v37, 4  ;;  %3354 = vst.msk [vmem:[%s5862_s1 + $0x30] sm:$0xf] %vm3341_vm4, %v3269_v37 }
 0xab2   : > { %3355 = vst.msk [vmem:[%s5862_s1 + $0x34] sm:$0xf] %vm3341_vm4, %v3315_v2 }
 0xab5   : > { %v3270_v0 = vpop.f32.mrf.mxu0 }
 0xab6   : > { %v3271_v45 = vadd.f32 %v5851_v32, %v3270_v0 }
 0xab8   : > { %v3316_v24 = vrot.slane %v3271_v45, 4  ;;  %3356 = vst.msk [vmem:[%s5862_s1 + $0x38] sm:$0xf] %vm3341_vm4, %v3271_v45 }
 0xaba   : > { %3357 = vst.msk [vmem:[%s5862_s1 + $0x3c] sm:$0xf] %vm3341_vm4, %v3316_v24 }
 0xabd   : > { %v3273_v62 = vpop.f32.mrf.mxu0 }
 0xabe   : > { %v3274_v33 = vadd.f32 %v5851_v32, %v3273_v62 }
 0xac0   : > { %v3317_v59 = vrot.slane %v3274_v33, 4  ;;  %3358 = vst.msk [vmem:[%s5862_s1 + $0x40] sm:$0xf] %vm3341_vm4, %v3274_v33 }
 0xac2   : > { %3359 = vst.msk [vmem:[%s5862_s1 + $0x44] sm:$0xf] %vm3341_vm4, %v3317_v59 }
 0xac5   : > { %v3275_v27 = vpop.f32.mrf.mxu0 }
 0xac6   : > { %v3276_v22 = vadd.f32 %v5851_v32, %v3275_v27 }
 0xac8   : > { %v3318_v17 = vrot.slane %v3276_v22, 4  ;;  %3360 = vst.msk [vmem:[%s5862_s1 + $0x48] sm:$0xf] %vm3341_vm4, %v3276_v22 }
 0xaca   : > { %3361 = vst.msk [vmem:[%s5862_s1 + $0x4c] sm:$0xf] %vm3341_vm4, %v3318_v17 }
 0xae5   : > { %v3278_v11 = vpop.f32.mrf.mxu0 }
 0xae6   : > { %v3279_v46 = vadd.f32 %v5851_v32, %v3278_v11 }
 0xae8   : > { %v3319_v23 = vrot.slane %v3279_v46, 4  ;;  %3362 = vst.msk [vmem:[%s5862_s1 + $0x50] sm:$0xf] %vm3341_vm4, %v3279_v46 }
 0xaea   : > { %3363 = vst.msk [vmem:[%s5862_s1 + $0x54] sm:$0xf] %vm3341_vm4, %v3319_v23 }
 0xaed   : > { %v3280_v4 = vpop.f32.mrf.mxu0 }
 0xaee   : > { %v3281_v5 = vadd.f32 %v5851_v32, %v3280_v4 }
 0xaf0   : > { %v3320_v56 = vrot.slane %v3281_v5, 4  ;;  %3364 = vst.msk [vmem:[%s5862_s1 + $0x58] sm:$0xf] %vm3341_vm4, %v3281_v5 }
 0xaf2   : > { %3365 = vst.msk [vmem:[%s5862_s1 + $0x5c] sm:$0xf] %vm3341_vm4, %v3320_v56 }
 0xaf5   : > { %v3283_v53 = vpop.f32.mrf.mxu0 }
 0xaf6   : > { %v3284_v49 = vadd.f32 %v5851_v32, %v3283_v53 }
 0xaf8   : > { %v3321_v50 = vrot.slane %v3284_v49, 4  ;;  %3366 = vst.msk [vmem:[%s5862_s1 + $0x60] sm:$0xf] %vm3341_vm4, %v3284_v49 }
 0xafa   : > { %3367 = vst.msk [vmem:[%s5862_s1 + $0x64] sm:$0xf] %vm3341_vm4, %v3321_v50 }
 0xafd   : > { %v3285_v57 = vpop.f32.mrf.mxu0 }
 0xafe   : > { %v3286_v61 = vadd.f32 %v5851_v32, %v3285_v57 }
 0xb00   : > { %v3322_v21 = vrot.slane %v3286_v61, 4  ;;  %3368 = vst.msk [vmem:[%s5862_s1 + $0x68] sm:$0xf] %vm3341_vm4, %v3286_v61 }
 0xb02   : > { %3369 = vst.msk [vmem:[%s5862_s1 + $0x6c] sm:$0xf] %vm3341_vm4, %v3322_v21 }
 0xb19   : > { %v3288_v15 = vpop.f32.mrf.mxu0 }
 0xb1a   : > { %v3289_v55 = vadd.f32 %v5851_v32, %v3288_v15 }
 0xb1c   : > { %v3323_v63 = vrot.slane %v3289_v55, 4  ;;  %3370 = vst.msk [vmem:[%s5862_s1 + $0x70] sm:$0xf] %vm3341_vm4, %v3289_v55 }
 0xb1e   : > { %3371 = vst.msk [vmem:[%s5862_s1 + $0x74] sm:$0xf] %vm3341_vm4, %v3323_v63 }
 0xb21   : > { %v3290_v38 = vpop.f32.mrf.mxu0 }
 0xb22   : > { %v3291_v9 = vadd.f32 %v5851_v32, %v3290_v38 }
 0xb24   : > { %v3324_v8 = vrot.slane %v3291_v9, 4  ;;  %3372 = vst.msk [vmem:[%s5862_s1 + $0x78] sm:$0xf] %vm3341_vm4, %v3291_v9 }
 0xb26   : > { %3373 = vst.msk [vmem:[%s5862_s1 + $0x7c] sm:$0xf] %vm3341_vm4, %v3324_v8 }
 0xb27   : > { %4279 = shalt.err (!%p4276_p12)
}
 0xb28   : > { %s4366_s13 = smov 256   ;;  %s4367_s6 = smov 4  }
 0xb29   : > { %3655 = dma.vmem_to_hbm [thread:$0]  (%p4492_p0), %s3393_s28, 2048, %s3395_s8, %s3375_s21, %s4359_s16, %s4366_s13, %s4367_s6  }
 0xb2a PF: > { %p3682_p13 = scmp.ge.s32.totalorder %s4342_s23, 2  ;;  %s3409_s14 = sand.u32 1, %s4322_s18  }
 0xb2b   : > { %s3410_s1 = scalar_lea.sflag [#allocation4], %s3409_s14 }
 0xb2c   : > { %p3672_p3 = pnand %p3682_p13, %p4447_p6 }
 0xb2e   : > { %p3673_p5 = pneg %p3672_p3 }
 0xb30   : > { %4317 = dma.done.wait (%p3673_p5), %s3410_s1, 2048  }
 0xb31   : > { %4319 = vsyncadd (%p3673_p5), %s3410_s1, 4294965248  ;;  %s23_s23 = sadd.s32 1, %s4342_s23   ;;  %s6074_s18 = smov %s4326_s19 }
 0xb32   : > { %p20_p7 = scmp.ge.s32.totalorder %s23_s23, 6   ;;  %s6075_s19 = smov %s4330_s20 }
 0xb33   : > { %s6076_s20 = smov %s4508_s27  ;;  %s6077_s21 = smov %s4338_s22 }
 0xb34   : > { %s6078_s22 = smov %s6080_s17  ;;  %22 = sbr.rel (!%p20_p7) target bundleno = 12 (0xc), region = 104 }
 0xb39   :  { %3416 = vsyncpa [#allocation3], 1 }
 0xb3a   :  { %3418 = vsyncpa [#allocation3 + $0x1], 1 }
 0xb3b   :  { %3419 = vsyncpa [#allocation6], 1 }
 0xb3c   :  { %3420 = vsyncpa [#allocation9], 1 }
 0xb3d   :  { %3421 = vsyncpa [#allocation4], 1 }
 0xb3e   :  { %3423 = vsyncpa [#allocation4 + $0x1], 1 }

</bundles_post_ra>
